<compile_context>
chip_gen: v5e
topology: v5e:2x2
jax: 0.10.0
libtpu: 0.0.40
codegen_flags: <defaults>
</compile_context>

<pallas_src>
import math

import jax
import jax.numpy as jnp
from jax.experimental import pallas as pl
from jax.experimental.pallas import tpu as pltpu


def attn_kernel(x_ref, wqkv_ref, bqkv_ref, wo_ref, bo_ref, cosf_ref, sins_ref,
                mask_ref, o_ref, acc_ref):
    g = pl.program_id(1)
    last_g = pl.num_programs(1) - 1

    hd = cosf_ref.shape[1]          # head dim (packed as [even_half|odd_half])
    hd2 = hd // 2
    gw = wo_ref.shape[0]            # heads_per_group * hd (lane-dense slab)
    hpg = gw // hd

    x = x_ref[...]                                                # (T, C) bf16

    # Fused QKV projection for the whole head group (bf16 MXU, f32 acc).
    # Column layout: [Q_group | K_group | V_group]; each head's Q/K columns are
    # pre-permuted to [even_half | odd_half]; 1/sqrt(hd) is folded into Q.
    qkv = jnp.dot(x, wqkv_ref[...],
                  preferred_element_type=jnp.float32) + bqkv_ref[...]

    cosf = cosf_ref[...]            # (T, hd) f32  [cos | cos]
    sins = sins_ref[...]            # (T, hd) f32  [-sin | sin]
    mask = mask_ref[...]            # (T, T) f32 additive causal bias

    y_heads = []
    for i in range(hpg):            # short unrolled loop over heads in group
        q = qkv[:, i * hd:(i + 1) * hd]
        k = qkv[:, gw + i * hd:gw + (i + 1) * hd]
        v = qkv[:, 2 * gw + i * hd:2 * gw + (i + 1) * hd]

        # RoPE: with [e|o] packing, rolling by hd/2 swaps the halves, so the
        # full rotation is two full-width FMAs (roll runs on the XLU slot).
        q = q * cosf + pltpu.roll(q, hd2, axis=1) * sins
        k = k * cosf + pltpu.roll(k, hd2, axis=1) * sins

        # Causal softmax attention (scores already scaled via the Q weights).
        s = jnp.einsum('td,sd->ts', q.astype(jnp.bfloat16),
                       k.astype(jnp.bfloat16),
                       preferred_element_type=jnp.float32) + mask
        m = jnp.max(s, axis=-1, keepdims=True)
        p = jnp.exp(s - m)
        l = jnp.sum(p, axis=-1, keepdims=True)
        # Deferred normalization: divide the (T,hd) PV result, not (T,T) p.
        y = jnp.dot(p.astype(jnp.bfloat16), v.astype(jnp.bfloat16),
                    preferred_element_type=jnp.float32)
        y_heads.append(y * pl.reciprocal(l, approx=True))

    y_grp = jnp.concatenate(y_heads, axis=-1)                     # (T, gw) f32

    # This group's slice of the output projection (K = gw contraction),
    # accumulated in an f32 VMEM scratch across the head-group grid axis.
    contrib = jnp.dot(y_grp.astype(jnp.bfloat16), wo_ref[...],
                      preferred_element_type=jnp.float32)

    @pl.when(g == 0)
    def _():
        acc_ref[...] = contrib

    @pl.when(g != 0)
    def _():
        acc_ref[...] += contrib

    @pl.when(g == last_g)
    def _():
        o_ref[...] = (acc_ref[...] + bo_ref[...]).astype(o_ref.dtype)


def causal_self_attention_rope(x, w_attn, b_attn, w_proj, b_proj, *, n_head,
                               rope_base=1000.0):
    """Forward pass of CausalSelfAttentionWithRoPE (eval mode).

    x:      (B, T, C) float32
    w_attn: (3C, C)  PyTorch nn.Linear layout (out, in);  b_attn: (3C,)
    w_proj: (C, C);                                       b_proj: (C,)
    """
    B, T, C = x.shape
    out_dtype = x.dtype
    assert C % n_head == 0
    hd = C // n_head
    assert hd % 2 == 0
    hd2 = hd // 2

    # Group heads so each group's slab is lane-dense (>=128 lanes) and the
    # QKV projection output width is a multiple of 128.
    hpg = 1
    while hpg < n_head and n_head % (2 * hpg) == 0 and hpg * hd < 128:
        hpg *= 2
    n_groups = n_head // hpg
    gw = hpg * hd

    scale = 1.0 / math.sqrt(hd)

    w_attn = jnp.asarray(w_attn, jnp.float32)
    b_attn = jnp.asarray(b_attn, jnp.float32)
    wq, wk, wv = w_attn[:C], w_attn[C:2 * C], w_attn[2 * C:]
    bq, bk, bv = b_attn[:C], b_attn[C:2 * C], b_attn[2 * C:]

    def perm_w(w):     # (C, C) -> (n_head, hd, C); rows -> [even | odd] dims
        wh = w.reshape(n_head, hd, C)
        return jnp.concatenate([wh[:, 0::2, :], wh[:, 1::2, :]], axis=1)

    def perm_b(b):
        bh = b.reshape(n_head, hd)
        return jnp.concatenate([bh[:, 0::2], bh[:, 1::2]], axis=1)

    # (n_groups, 3*gw, C): per group [Q heads | K heads | V heads].
    wqkv = jnp.concatenate(
        [(perm_w(wq) * scale).reshape(n_groups, gw, C),
         perm_w(wk).reshape(n_groups, gw, C),
         wv.reshape(n_groups, gw, C)], axis=1)
    wqkv = jnp.transpose(wqkv, (0, 2, 1)).astype(jnp.bfloat16)  # (G, C, 3*gw)

    bqkv = jnp.concatenate(
        [(perm_b(bq) * scale).reshape(n_groups, gw),
         perm_b(bk).reshape(n_groups, gw),
         bv.reshape(n_groups, gw)], axis=1)[:, None, :]         # (G, 1, 3*gw)

    wo = jnp.transpose(w_proj).reshape(n_groups, gw, C).astype(jnp.bfloat16)
    bo = jnp.asarray(b_proj, jnp.float32).reshape(1, C)

    # RoPE tables (same formula as the PyTorch buffers), full head-dim width.
    freqs = jnp.arange(0, hd, 2, dtype=jnp.float32) / hd
    theta = rope_base ** (-freqs)
    pos = jnp.arange(T, dtype=jnp.float32)
    ang = pos[:, None] * theta[None, :]
    cos_t, sin_t = jnp.cos(ang), jnp.sin(ang)                   # (T, hd2)
    cosf = jnp.concatenate([cos_t, cos_t], axis=-1)             # (T, hd)
    sins = jnp.concatenate([-sin_t, sin_t], axis=-1)            # (T, hd)

    # Resident additive causal mask (replaces per-step iota/compare/select).
    idx = jnp.arange(T)
    mask = jnp.where(idx[None, :] <= idx[:, None], 0.0,
                     -1e30).astype(jnp.float32)

    x_bf = x.astype(jnp.bfloat16)

    return pl.pallas_call(
        attn_kernel,
        out_shape=jax.ShapeDtypeStruct((B, T, C), out_dtype),
        grid_spec=pltpu.PrefetchScalarGridSpec(
            num_scalar_prefetch=0,
            grid=(B, n_groups),
            in_specs=[
                pl.BlockSpec((None, T, C), lambda b, g: (b, 0, 0)),       # x
                pl.BlockSpec((None, C, 3 * gw), lambda b, g: (g, 0, 0)),  # wqkv
                pl.BlockSpec((None, 1, 3 * gw), lambda b, g: (g, 0, 0)),  # bqkv
                pl.BlockSpec((None, gw, C), lambda b, g: (g, 0, 0)),      # wo
                pl.BlockSpec((1, C), lambda b, g: (0, 0)),                # bo
                pl.BlockSpec((T, hd), lambda b, g: (0, 0)),               # cos
                pl.BlockSpec((T, hd), lambda b, g: (0, 0)),               # sin
                pl.BlockSpec((T, T), lambda b, g: (0, 0)),                # mask
            ],
            out_specs=pl.BlockSpec((None, T, C), lambda b, g: (b, 0, 0)),
            scratch_shapes=[pltpu.VMEM((T, C), jnp.float32)],
        ),
        compiler_params=pltpu.CompilerParams(
            # Batch axis is megacore-parallel (v7x); head-group axis carries
            # the f32 scratch accumulation so it must stay "arbitrary".
            dimension_semantics=("parallel", "arbitrary"),
            vmem_limit_bytes=32 * 1024 * 1024,
        ),
    )(x_bf, wqkv, bqkv, wo, bo, cosf, sins, mask)


def reference(x, w_attn, b_attn, w_proj, b_proj, *, n_head, rope_base=1000.0):
    """Pure-JAX f32 reference matching the PyTorch forward (eval mode)."""
    B, T, C = x.shape
    hd = C // n_head
    P = jax.lax.Precision.HIGHEST

    qkv = jnp.einsum('btc,dc->btd', x, w_attn, precision=P) + b_attn
    q, k, v = qkv[..., :C], qkv[..., C:2 * C], qkv[..., 2 * C:]

    def split_heads(t):
        return jnp.transpose(t.reshape(B, T, n_head, hd), (0, 2, 1, 3))

    q, k, v = split_heads(q), split_heads(k), split_heads(v)

    freqs = jnp.arange(0, hd, 2, dtype=jnp.float32) / hd
    theta = rope_base ** (-freqs)
    pos = jnp.arange(T, dtype=jnp.float32)
    ang = pos[:, None] * theta[None, :]
    cos = jnp.cos(ang)[None, None]
    sin = jnp.sin(ang)[None, None]

    def rope(t):
        t1, t2 = t[..., 0::2], t[..., 1::2]
        return jnp.concatenate([t1 * cos - t2 * sin, t1 * sin + t2 * cos],
                               axis=-1)

    q, k = rope(q), rope(k)

    s = jnp.einsum('bhqd,bhkd->bhqk', q, k, precision=P) / math.sqrt(hd)
    mask = jnp.tril(jnp.ones((T, T), dtype=bool))
    s = jnp.where(mask[None, None], s, -jnp.inf)
    a = jax.nn.softmax(s, axis=-1)
    y = jnp.einsum('bhqk,bhkd->bhqd', a, v, precision=P)
    y = jnp.transpose(y, (0, 2, 1, 3)).reshape(B, T, C)
    return jnp.einsum('btc,dc->btd', y, w_proj, precision=P) + b_proj


if __name__ == "__main__":
    key = jax.random.PRNGKey(0)
    # Small, TPU-tile-friendly shapes consistent with the module's forward:
    # x is (B, T, n_embd), n_embd % n_head == 0, head_dim even.
    B, T_len, n_head, n_embd = 2, 128, 4, 256

    ks = jax.random.split(key, 5)
    x = jax.random.normal(ks[0], (B, T_len, n_embd), dtype=jnp.float32)
    w_attn = jax.random.normal(ks[1], (3 * n_embd, n_embd),
                               dtype=jnp.float32) * (n_embd ** -0.5)
    b_attn = jax.random.normal(ks[2], (3 * n_embd,), dtype=jnp.float32) * 0.02
    w_proj = jax.random.normal(ks[3], (n_embd, n_embd),
                               dtype=jnp.float32) * (n_embd ** -0.5)
    b_proj = jax.random.normal(ks[4], (n_embd,), dtype=jnp.float32) * 0.02

    out = causal_self_attention_rope(x, w_attn, b_attn, w_proj, b_proj,
                                     n_head=n_head)
    out = jax.block_until_ready(out)

    ref = reference(x, w_attn, b_attn, w_proj, b_proj, n_head=n_head)
    assert out.shape == (B, T_len, n_embd)
    max_err = float(jnp.max(jnp.abs(out.astype(jnp.float32) - ref)))
    # bf16 matmul operands vs. an all-f32 HIGHEST-precision reference.
    assert jnp.allclose(out.astype(jnp.float32), ref, atol=5e-2, rtol=5e-2), (
        f"mismatch vs reference, max abs err={max_err}")
    print("KERNEL_OK")
</pallas_src>

<mosaic_0001>
module attributes {stable_mosaic.version = 11 : i64} {
  func.func @attn_kernel(%arg0: i32, %arg1: i32, %arg2: memref<1x128x256xbf16, #tpu.memory_space<vmem>>, %arg3: memref<1x256x384xbf16, #tpu.memory_space<vmem>>, %arg4: memref<1x1x384xf32, #tpu.memory_space<vmem>>, %arg5: memref<1x128x256xbf16, #tpu.memory_space<vmem>>, %arg6: memref<1x256xf32, #tpu.memory_space<vmem>>, %arg7: memref<128x64xf32, #tpu.memory_space<vmem>>, %arg8: memref<128x64xf32, #tpu.memory_space<vmem>>, %arg9: memref<128x128xf32, #tpu.memory_space<vmem>>, %arg10: memref<1x128x256xf32, #tpu.memory_space<vmem>>, %arg11: memref<128x256xf32, #tpu.memory_space<vmem>>) attributes {dimension_semantics = [#tpu.dimension_semantics<parallel>, #tpu.dimension_semantics<arbitrary>], iteration_bounds = array<i64: 2, 2>, scalar_prefetch = 0 : i64, scratch_operands = 1 : i64, tpu.core_type = #tpu.core_type<tc>, window_params = [{transform_indices = @transform_0, window_bounds = array<i64: 1, 128, 256>}, {transform_indices = @transform_1, window_bounds = array<i64: 1, 256, 384>}, {transform_indices = @transform_2, window_bounds = array<i64: 1, 1, 384>}, {transform_indices = @transform_3, window_bounds = array<i64: 1, 128, 256>}, {pipeline_mode = #tpu.pipeline_mode<synchronous>, transform_indices = @transform_4, window_bounds = array<i64: 1, 256>}, {pipeline_mode = #tpu.pipeline_mode<synchronous>, transform_indices = @transform_5, window_bounds = array<i64: 128, 64>}, {pipeline_mode = #tpu.pipeline_mode<synchronous>, transform_indices = @transform_6, window_bounds = array<i64: 128, 64>}, {pipeline_mode = #tpu.pipeline_mode<synchronous>, transform_indices = @transform_7, window_bounds = array<i64: 128, 128>}, {transform_indices = @transform_8, window_bounds = array<i64: 1, 128, 256>}]} {
    %c0 = arith.constant 0 : index
    %c0_0 = arith.constant 0 : index
    %c0_1 = arith.constant 0 : index
    %0 = vector.load %arg2[%c0, %c0_0, %c0_1] : memref<1x128x256xbf16, #tpu.memory_space<vmem>>, vector<1x128x256xbf16>
    %1 = vector.shape_cast %0 : vector<1x128x256xbf16> to vector<128x256xbf16>
    %c0_2 = arith.constant 0 : index
    %c0_3 = arith.constant 0 : index
    %c0_4 = arith.constant 0 : index
    %2 = vector.load %arg3[%c0_2, %c0_3, %c0_4] : memref<1x256x384xbf16, #tpu.memory_space<vmem>>, vector<1x256x384xbf16>
    %3 = vector.shape_cast %2 : vector<1x256x384xbf16> to vector<256x384xbf16>
    %cst = arith.constant dense<0.000000e+00> : vector<128x384xf32>
    %4 = tpu.matmul %1, %3, %cst {dimension_numbers = #tpu.dot_dimension_numbers<[1], [0], [0], [1], [0, 0, 1, 1], [], []>} : vector<128x256xbf16>, vector<256x384xbf16>, vector<128x384xf32> -> vector<128x384xf32>
    %c0_5 = arith.constant 0 : index
    %c0_6 = arith.constant 0 : index
    %c0_7 = arith.constant 0 : index
    %5 = vector.load %arg4[%c0_5, %c0_6, %c0_7] : memref<1x1x384xf32, #tpu.memory_space<vmem>>, vector<1x1x384xf32>
    %6 = vector.shape_cast %5 : vector<1x1x384xf32> to vector<1x384xf32>
    %7 = vector.broadcast %6 : vector<1x384xf32> to vector<128x384xf32>
    %8 = arith.addf %4, %7 : vector<128x384xf32>
    %c0_8 = arith.constant 0 : index
    %c0_9 = arith.constant 0 : index
    %9 = vector.load %arg7[%c0_8, %c0_9] : memref<128x64xf32, #tpu.memory_space<vmem>>, vector<128x64xf32>
    %c0_10 = arith.constant 0 : index
    %c0_11 = arith.constant 0 : index
    %10 = vector.load %arg8[%c0_10, %c0_11] : memref<128x64xf32, #tpu.memory_space<vmem>>, vector<128x64xf32>
    %c0_12 = arith.constant 0 : index
    %c0_13 = arith.constant 0 : index
    %11 = vector.load %arg9[%c0_12, %c0_13] : memref<128x128xf32, #tpu.memory_space<vmem>>, vector<128x128xf32>
    %12 = vector.extract_strided_slice %8 {offsets = [0, 0], sizes = [128, 64], strides = [1, 1]} : vector<128x384xf32> to vector<128x64xf32>
    %13 = vector.extract_strided_slice %8 {offsets = [0, 128], sizes = [128, 64], strides = [1, 1]} : vector<128x384xf32> to vector<128x64xf32>
    %14 = vector.extract_strided_slice %8 {offsets = [0, 256], sizes = [128, 64], strides = [1, 1]} : vector<128x384xf32> to vector<128x64xf32>
    %15 = arith.mulf %12, %9 : vector<128x64xf32>
    %c32_i32 = arith.constant 32 : i32
    %16 = tpu.dynamic_rotate %12 by %c32_i32 dim 1 : vector<128x64xf32>, i32 -> vector<128x64xf32>
    %17 = arith.mulf %16, %10 : vector<128x64xf32>
    %18 = arith.addf %15, %17 : vector<128x64xf32>
    %19 = arith.mulf %13, %9 : vector<128x64xf32>
    %c32_i32_14 = arith.constant 32 : i32
    %20 = tpu.dynamic_rotate %13 by %c32_i32_14 dim 1 : vector<128x64xf32>, i32 -> vector<128x64xf32>
    %21 = arith.mulf %20, %10 : vector<128x64xf32>
    %22 = arith.addf %19, %21 : vector<128x64xf32>
    %23 = arith.truncf %18 : vector<128x64xf32> to vector<128x64xbf16>
    %24 = arith.truncf %22 : vector<128x64xf32> to vector<128x64xbf16>
    "tpu.trace_start"() <{level = 10 : i32, message = "td,sd->ts"}> : () -> ()
    %cst_15 = arith.constant dense<0.000000e+00> : vector<128x128xf32>
    %25 = tpu.matmul %23, %24, %cst_15 {dimension_numbers = #tpu.dot_dimension_numbers<[1], [1], [0], [0], [0, 0, 1, 0], [], []>} : vector<128x64xbf16>, vector<128x64xbf16>, vector<128x128xf32> -> vector<128x128xf32>
    "tpu.trace_stop"() : () -> ()
    %26 = arith.addf %25, %11 : vector<128x128xf32>
    %cst_16 = arith.constant dense<0xFF800000> : vector<128xf32>
    %27 = vector.multi_reduction <maximumf>, %26, %cst_16 [1] : vector<128x128xf32> to vector<128xf32>
    %28 = vector.shape_cast %27 : vector<128xf32> to vector<128x1xf32>
    %29 = vector.broadcast %28 : vector<128x1xf32> to vector<128x128xf32>
    %30 = arith.subf %26, %29 : vector<128x128xf32>
    %31 = math.exp %30 : vector<128x128xf32>
    %cst_17 = arith.constant dense<0.000000e+00> : vector<128xf32>
    %32 = vector.multi_reduction <add>, %31, %cst_17 [1] : vector<128x128xf32> to vector<128xf32>
    %33 = vector.shape_cast %32 : vector<128xf32> to vector<128x1xf32>
    %34 = arith.truncf %31 : vector<128x128xf32> to vector<128x128xbf16>
    %35 = arith.truncf %14 : vector<128x64xf32> to vector<128x64xbf16>
    %cst_18 = arith.constant dense<0.000000e+00> : vector<128x64xf32>
    %36 = tpu.matmul %34, %35, %cst_18 {dimension_numbers = #tpu.dot_dimension_numbers<[1], [0], [0], [1], [0, 0, 1, 1], [], []>} : vector<128x128xbf16>, vector<128x64xbf16>, vector<128x64xf32> -> vector<128x64xf32>
    %37 = tpu.reciprocal %33 {approx = true} : vector<128x1xf32> -> vector<128x1xf32>
    %38 = vector.broadcast %37 : vector<128x1xf32> to vector<128x64xf32>
    %39 = arith.mulf %36, %38 : vector<128x64xf32>
    %40 = vector.extract_strided_slice %8 {offsets = [0, 64], sizes = [128, 64], strides = [1, 1]} : vector<128x384xf32> to vector<128x64xf32>
    %41 = vector.extract_strided_slice %8 {offsets = [0, 192], sizes = [128, 64], strides = [1, 1]} : vector<128x384xf32> to vector<128x64xf32>
    %42 = vector.extract_strided_slice %8 {offsets = [0, 320], sizes = [128, 64], strides = [1, 1]} : vector<128x384xf32> to vector<128x64xf32>
    %43 = arith.mulf %40, %9 : vector<128x64xf32>
    %c32_i32_19 = arith.constant 32 : i32
    %44 = tpu.dynamic_rotate %40 by %c32_i32_19 dim 1 : vector<128x64xf32>, i32 -> vector<128x64xf32>
    %45 = arith.mulf %44, %10 : vector<128x64xf32>
    %46 = arith.addf %43, %45 : vector<128x64xf32>
    %47 = arith.mulf %41, %9 : vector<128x64xf32>
    %c32_i32_20 = arith.constant 32 : i32
    %48 = tpu.dynamic_rotate %41 by %c32_i32_20 dim 1 : vector<128x64xf32>, i32 -> vector<128x64xf32>
    %49 = arith.mulf %48, %10 : vector<128x64xf32>
    %50 = arith.addf %47, %49 : vector<128x64xf32>
    %51 = arith.truncf %46 : vector<128x64xf32> to vector<128x64xbf16>
    %52 = arith.truncf %50 : vector<128x64xf32> to vector<128x64xbf16>
    "tpu.trace_start"() <{level = 10 : i32, message = "td,sd->ts"}> : () -> ()
    %cst_21 = arith.constant dense<0.000000e+00> : vector<128x128xf32>
    %53 = tpu.matmul %51, %52, %cst_21 {dimension_numbers = #tpu.dot_dimension_numbers<[1], [1], [0], [0], [0, 0, 1, 0], [], []>} : vector<128x64xbf16>, vector<128x64xbf16>, vector<128x128xf32> -> vector<128x128xf32>
    "tpu.trace_stop"() : () -> ()
    %54 = arith.addf %53, %11 : vector<128x128xf32>
    %cst_22 = arith.constant dense<0xFF800000> : vector<128xf32>
    %55 = vector.multi_reduction <maximumf>, %54, %cst_22 [1] : vector<128x128xf32> to vector<128xf32>
    %56 = vector.shape_cast %55 : vector<128xf32> to vector<128x1xf32>
    %57 = vector.broadcast %56 : vector<128x1xf32> to vector<128x128xf32>
    %58 = arith.subf %54, %57 : vector<128x128xf32>
    %59 = math.exp %58 : vector<128x128xf32>
    %cst_23 = arith.constant dense<0.000000e+00> : vector<128xf32>
    %60 = vector.multi_reduction <add>, %59, %cst_23 [1] : vector<128x128xf32> to vector<128xf32>
    %61 = vector.shape_cast %60 : vector<128xf32> to vector<128x1xf32>
    %62 = arith.truncf %59 : vector<128x128xf32> to vector<128x128xbf16>
    %63 = arith.truncf %42 : vector<128x64xf32> to vector<128x64xbf16>
    %cst_24 = arith.constant dense<0.000000e+00> : vector<128x64xf32>
    %64 = tpu.matmul %62, %63, %cst_24 {dimension_numbers = #tpu.dot_dimension_numbers<[1], [0], [0], [1], [0, 0, 1, 1], [], []>} : vector<128x128xbf16>, vector<128x64xbf16>, vector<128x64xf32> -> vector<128x64xf32>
    %65 = tpu.reciprocal %61 {approx = true} : vector<128x1xf32> -> vector<128x1xf32>
    %66 = vector.broadcast %65 : vector<128x1xf32> to vector<128x64xf32>
    %67 = arith.mulf %64, %66 : vector<128x64xf32>
    %68 = tpu.concatenate %39, %67 in 1 : vector<128x64xf32>, vector<128x64xf32> -> vector<128x128xf32>
    %69 = arith.truncf %68 : vector<128x128xf32> to vector<128x128xbf16>
    %c0_25 = arith.constant 0 : index
    %c0_26 = arith.constant 0 : index
    %c0_27 = arith.constant 0 : index
    %70 = vector.load %arg5[%c0_25, %c0_26, %c0_27] : memref<1x128x256xbf16, #tpu.memory_space<vmem>>, vector<1x128x256xbf16>
    %71 = vector.shape_cast %70 : vector<1x128x256xbf16> to vector<128x256xbf16>
    %cst_28 = arith.constant dense<0.000000e+00> : vector<128x256xf32>
    %72 = tpu.matmul %69, %71, %cst_28 {dimension_numbers = #tpu.dot_dimension_numbers<[1], [0], [0], [1], [0, 0, 1, 1], [], []>} : vector<128x128xbf16>, vector<128x256xbf16>, vector<128x256xf32> -> vector<128x256xf32>
    %c0_i32 = arith.constant 0 : i32
    %73 = arith.cmpi eq, %arg1, %c0_i32 : i32
    %74 = arith.extui %73 : i1 to i32
    %c0_i32_29 = arith.constant 0 : i32
    %75 = arith.cmpi ne, %74, %c0_i32_29 : i32
    scf.if %75 {
      %c0_33 = arith.constant 0 : index
      %c0_34 = arith.constant 0 : index
      %82 = vector.load %arg11[%c0_33, %c0_34] : memref<128x256xf32, #tpu.memory_space<vmem>>, vector<128x256xf32>
      tpu.vector_store %arg11[%c0_33, %c0_34], %72 {strides = array<i32>} : memref<128x256xf32, #tpu.memory_space<vmem>>, vector<128x256xf32>,
    } else {
    }
    %c0_i32_30 = arith.constant 0 : i32
    %76 = arith.cmpi ne, %arg1, %c0_i32_30 : i32
    %77 = arith.extui %76 : i1 to i32
    %c0_i32_31 = arith.constant 0 : i32
    %78 = arith.cmpi ne, %77, %c0_i32_31 : i32
    scf.if %78 {
      %c0_33 = arith.constant 0 : index
      %c0_34 = arith.constant 0 : index
      %82 = vector.load %arg11[%c0_33, %c0_34] : memref<128x256xf32, #tpu.memory_space<vmem>>, vector<128x256xf32>
      %83 = arith.addf %82, %72 : vector<128x256xf32>
      %c0_35 = arith.constant 0 : index
      %c0_36 = arith.constant 0 : index
      %84 = vector.load %arg11[%c0_35, %c0_36] : memref<128x256xf32, #tpu.memory_space<vmem>>, vector<128x256xf32>
      tpu.vector_store %arg11[%c0_35, %c0_36], %83 {strides = array<i32>} : memref<128x256xf32, #tpu.memory_space<vmem>>, vector<128x256xf32>,
    } else {
    }
    %c1_i32 = arith.constant 1 : i32
    %79 = arith.cmpi eq, %arg1, %c1_i32 : i32
    %80 = arith.extui %79 : i1 to i32
    %c0_i32_32 = arith.constant 0 : i32
    %81 = arith.cmpi ne, %80, %c0_i32_32 : i32
    scf.if %81 {
      %c0_33 = arith.constant 0 : index
      %c0_34 = arith.constant 0 : index
      %82 = vector.load %arg11[%c0_33, %c0_34] : memref<128x256xf32, #tpu.memory_space<vmem>>, vector<128x256xf32>
      %c0_35 = arith.constant 0 : index
      %c0_36 = arith.constant 0 : index
      %83 = vector.load %arg6[%c0_35, %c0_36] : memref<1x256xf32, #tpu.memory_space<vmem>>, vector<1x256xf32>
      %84 = vector.broadcast %83 : vector<1x256xf32> to vector<128x256xf32>
      %85 = arith.addf %82, %84 : vector<128x256xf32>
      %c0_37 = arith.constant 0 : index
      %c0_38 = arith.constant 0 : index
      %c0_39 = arith.constant 0 : index
      %86 = vector.load %arg10[%c0_37, %c0_38, %c0_39] : memref<1x128x256xf32, #tpu.memory_space<vmem>>, vector<1x128x256xf32>
      %87 = vector.shape_cast %86 : vector<1x128x256xf32> to vector<128x256xf32>
      %88 = vector.shape_cast %85 : vector<128x256xf32> to vector<1x128x256xf32>
      tpu.vector_store %arg10[%c0_37, %c0_38, %c0_39], %88 {strides = array<i32>} : memref<1x128x256xf32, #tpu.memory_space<vmem>>, vector<1x128x256xf32>,
    } else {
    }
    return
  }
  func.func @transform_0(%arg0: i32, %arg1: i32) -> (i32, i32, i32) {
    %c0_i32 = arith.constant 0 : i32
    %c0_i32_0 = arith.constant 0 : i32
    %c0_i32_1 = arith.constant 0 : i32
    return %arg0, %c0_i32, %c0_i32_0 : i32, i32, i32
  }
  func.func @transform_1(%arg0: i32, %arg1: i32) -> (i32, i32, i32) {
    %c0_i32 = arith.constant 0 : i32
    %c0_i32_0 = arith.constant 0 : i32
    %c0_i32_1 = arith.constant 0 : i32
    return %arg1, %c0_i32, %c0_i32_0 : i32, i32, i32
  }
  func.func @transform_2(%arg0: i32, %arg1: i32) -> (i32, i32, i32) {
    %c0_i32 = arith.constant 0 : i32
    %c0_i32_0 = arith.constant 0 : i32
    %c0_i32_1 = arith.constant 0 : i32
    return %arg1, %c0_i32, %c0_i32_0 : i32, i32, i32
  }
  func.func @transform_3(%arg0: i32, %arg1: i32) -> (i32, i32, i32) {
    %c0_i32 = arith.constant 0 : i32
    %c0_i32_0 = arith.constant 0 : i32
    %c0_i32_1 = arith.constant 0 : i32
    return %arg1, %c0_i32, %c0_i32_0 : i32, i32, i32
  }
  func.func @transform_4(%arg0: i32, %arg1: i32) -> (i32, i32) {
    %c0_i32 = arith.constant 0 : i32
    %c0_i32_0 = arith.constant 0 : i32
    %c0_i32_1 = arith.constant 0 : i32
    return %c0_i32, %c0_i32_0 : i32, i32
  }
  func.func @transform_5(%arg0: i32, %arg1: i32) -> (i32, i32) {
    %c0_i32 = arith.constant 0 : i32
    %c0_i32_0 = arith.constant 0 : i32
    %c0_i32_1 = arith.constant 0 : i32
    return %c0_i32, %c0_i32_0 : i32, i32
  }
  func.func @transform_6(%arg0: i32, %arg1: i32) -> (i32, i32) {
    %c0_i32 = arith.constant 0 : i32
    %c0_i32_0 = arith.constant 0 : i32
    %c0_i32_1 = arith.constant 0 : i32
    return %c0_i32, %c0_i32_0 : i32, i32
  }
  func.func @transform_7(%arg0: i32, %arg1: i32) -> (i32, i32) {
    %c0_i32 = arith.constant 0 : i32
    %c0_i32_0 = arith.constant 0 : i32
    %c0_i32_1 = arith.constant 0 : i32
    return %c0_i32, %c0_i32_0 : i32, i32
  }
  func.func @transform_8(%arg0: i32, %arg1: i32) -> (i32, i32, i32) {
    %c0_i32 = arith.constant 0 : i32
    %c0_i32_0 = arith.constant 0 : i32
    %c0_i32_1 = arith.constant 0 : i32
    return %arg0, %c0_i32, %c0_i32_0 : i32, i32, i32
  }
}

</mosaic_0001>

<bundles_post_ra>
// kernel: tpu_custom_call.1
= control target key start
LH: loop header
LB: loop body
LE: loop exit
PB: predicated region body
PF: predicated region fallthrough
CT: control target
= control target key end

     0   :  { %s7250_s0 = inlined_call_operand.vmem [shape: bf16[2,128,256], index: 0, kind: input, shape index: {}]   ;;  %s7251_s1 = inlined_call_operand.hbm [shape: bf16[2,256,384], index: 1, kind: input, shape index: {}]   ;;  %s7252_s2 = inlined_call_operand.vmem [shape: f32[2,1,384], index: 2, kind: input, shape index: {}]   ;;  %s7253_s3 = inlined_call_operand.hbm [shape: bf16[2,128,256], index: 3, kind: input, shape index: {}]   ;;  %s7254_s4 = inlined_call_operand.vmem [shape: f32[1,256], index: 4, kind: input, shape index: {}]   ;;  %s7255_s5 = inlined_call_operand.vmem [shape: f32[128,64], index: 5, kind: input, shape index: {}]   ;;  %s7256_s6 = inlined_call_operand.vmem [shape: f32[128,64], index: 6, kind: input, shape index: {}]   ;;  %s7257_s7 = inlined_call_operand.hbm [shape: f32[128,128], index: 7, kind: input, shape index: {}]   ;;  %s7258_s8 = inlined_call_operand.hbm [shape: f32[2,128,256], index: 8, kind: output, shape index: {}]  }
   0x1   :  { %7410 = sst [smem:[#allocation123_spill]] %s7252_s2 }
   0x2   :  { %7411 = sst [smem:[#allocation124_spill]] %s7254_s4 }
   0x3   :  { %7412 = sst [smem:[#allocation125_spill]] %s7255_s5 }
   0x4   :  { %7413 = sst [smem:[#allocation126_spill]] %s7257_s7 }
   0x5   :  { %7414 = sst [smem:[#allocation127_spill]] %s7258_s8 }
   0x6   :  { %13 = vsyncpa [#allocation4], 0 }
   0x7   :  { %15 = vsyncpa [#allocation4 + $0x1], 0 }
   0x8   :  { %16 = vsyncpa [#allocation7], 0 }
   0x9   :  { %18 = vsyncpa [#allocation7 + $0x1], 0 }
   0xa   :  { %19 = vsyncpa [#allocation5], 0 }
   0xb   :  { %21 = vsyncpa [#allocation5 + $0x1], 0  ;;  %s4722_s27 = smov 0   ;;  %s4724_s28 = smov 0  }
   0xc   :  { %s4726_s29 = smov 0   ;;  %s4728_s30 = smov 0  }
   0xd   :  { %s4730_s9 = smov 0   ;;  %s4732_s10 = smov 0  }
   0xe   :  { %s4734_s11 = smov 0   ;;  %s4736_s12 = smov 0  }
   0xf   :  { %s4738_s13 = smov 0   ;;  %s4740_s14 = smov 0  }
  0x10   :  { %s4742_s15 = smov 0  }
  0x11 LB: > { %7415 = sst [smem:[#allocation14_spill]] %s4625_s27  ;;  %s4776_s16 = sadd.s32 4294967295, %s4665_s15   ;;  %s4665_s15 = sphi %s4742_s15, %s27_s15   ;;  %s4661_s14 = sphi %s4740_s14, %s7711_s14   ;;  %s4657_s13 = sphi %s4738_s13, %s7710_s13   ;;  %s4653_s12 = sphi %s4736_s12, %s7701_s12   ;;  %s4649_s11 = sphi %s4734_s11, %s7709_s11   ;;  %s4645_s10 = sphi %s4732_s10, %s7708_s10   ;;  %s4641_s9 = sphi %s4730_s9, %s7707_s9   ;;  %s4637_s30 = sphi %s4728_s30, %s7706_s30   ;;  %s4633_s29 = sphi %s4726_s29, %s7698_s29   ;;  %s4629_s28 = sphi %s4724_s28, %s7705_s28   ;;  %s4625_s27 = sphi %s4722_s27, %s7704_s27  }
  0x12   : > { %7416 = sst [smem:[#allocation15_spill]] %s4633_s29  ;;  %s3686_s17 = sadd.s32 4294967294, %s4665_s15  }
  0x13   : > { %7417 = sst [smem:[#allocation16_spill]] %s4645_s10  ;;  %p85_p0 = scmp.ne.s32.totalorder %s4641_s9, %s4637_s30 }
  0x14   : > { %7418 = sst [smem:[#allocation17_spill]] %s4649_s11  ;;  %p86_p1 = scmp.eq.s32.totalorder %s4776_s16, 0 }
  0x15   : > { %7419 = sst [smem:[#allocation18_spill]] %s4661_s14  ;;  %p244_p2 = scmp.ne.s32.totalorder %s4633_s29, %s4629_s28 }
  0x16   : > { %p4786_p3 = por %p86_p1, %p85_p0  ;;  %p245_p4 = scmp.eq.s32.totalorder %s4776_s16, 3 }
  0x17   : > { %p250_p5 = scmp.ne.s32.totalorder %s4629_s28, %s4625_s27  ;;  %p251_p6 = scmp.eq.s32.totalorder %s3686_s17, 3 }
  0x18   : > { %p4793_p7 = por %p245_p4, %p244_p2  ;;  %p3687_p8 = scmp.ge.s32.totalorder %s4665_s15, 1 }
  0x19   : > { %p4798_p9 = por %p251_p6, %p250_p5  ;;  %p258_p10 = scmp.lt.s32.totalorder %s4665_s15, 5 }
  0x1a   : > { %s7421_s20 = scalar_select %p4793_p7, 1, 0 }
  0x1b   : > { %s7423_s21 = scalar_select %p4798_p9, 1, 0 }
  0x1c   : > { %7422 = sst [smem:[#allocation19_spill]] %s7421_s20  ;;  %p4806_p11 = pnand %p3687_p8, %p258_p10 }
  0x1d   : > { %7424 = sst [smem:[#allocation20_spill]] %s7423_s21  ;;  %s4667_s26 = smov [#allocation8]  }
  0x1e   : > { %s7425_s7 = sld [smem:[#allocation126_spill]]  ;;  %p4141_p12 = pneg %p4806_p11 }
  0x1f   : > { %s280_s30 = sshll.u32 %s4667_s26, 4  ;;  %s7259_s17 = smov 128   ;;  %s281_s30 = int_to_ptr.vmem [resolvable:$true] %s280_s30 }
  0x20   : > { %p4142_p13 = pnand %p4141_p12, %p86_p1  ;;  %s7260_s22 = smov 8  }
  0x21   : > { %s36_s23 = sadd.s32 1, %s4657_s13  ;;  %s39_s18 = sadd.s32 1, %s4661_s14 }
  0x22   : > { %p37_p0 = scmp.ge.s32.totalorder %s36_s23, 2  ;;  %p79_p2 = scmp.ne.s32.totalorder %s4645_s10, %s4641_s9 }
  0x23   : > { %p80_p4 = scmp.eq.s32.totalorder %s4665_s15, 0  ;;  %p4157_p10 = scmp.lt.s32.totalorder %s4665_s15, 4 }
  0x24   : > { %s278_s24 = sshll.u32 %s7425_s7, 4  ;;  %s72_s7 = sadd.s32 1, %s4645_s10  ;;  %s279_s24 = int_to_ptr.hbm [resolvable:$true] %s278_s24 }
  0x25   : > { %4144 = dma.hbm_to_vmem [thread:$0]  (!%p4142_p13), %s279_s24, 2048, %s281_s30, [#allocation7], %s7259_s17, %s7259_s17, %s7260_s22  }
  0x26   : > { %s7713_s23 = smov (%p37_p0, %s36_s23), 0  ;;  %s7715_s18 = smov (!%p37_p0, %s39_s18), %s4661_s14 }
  0x27   : > { %7427 = sst [smem:[#allocation21_spill]] %s7713_s23  ;;  %s69_s26 = ssub.s32 %s4657_s13, %s7713_s23 }
  0x28   : > { %p41_p5 = scmp.ge.s32.totalorder %s7715_s18, 2  ;;  %p70_p6 = scmp.eq.s32.totalorder %s69_s26, 0 }
  0x29   : > { %p81_p8 = por %p80_p4, %p79_p2  ;;  %s302_s17 = sand.u32 1, %s4645_s10  }
  0x2a   : > { %s7717_s18 = smov (%p41_p5, %s7715_s18), 0  ;;  %s4127_s22 = smul.u32 384, %s302_s17 }
  0x2b   : > { %7428 = sst [smem:[#allocation22_spill]] %s7717_s18  ;;  %s231_s30 = ssub.s32 %s4661_s14, %s7717_s18 }
  0x2c   : > { %s4832_s24 = scalar_select %p70_p6, %s4645_s10, %s72_s7  }
  0x2d   : > { %p232_p12 = scmp.eq.s32.totalorder %s231_s30, 0  ;;  %p4837_p13 = pnand %p4157_p10, %p81_p8 }
  0x2e   : > { %7429 = sst [smem:[#allocation23_spill]] %s4832_s24  ;;  %s7431_s23 = sadd.s32 1, %s4633_s29 }
  0x2f   : > { %s4844_s26 = scalar_select %p232_p12, %s4633_s29, %s7431_s23  }
  0x30   : > { %s4128_s27 = smul.u32 384, %s4657_s13  ;;  %s306_s8 = scalar_lea.vmem [#allocation3], %s4127_s22 }
  0x31   : > { %7432 = sst [smem:[#allocation24_spill]] %s4844_s26  ;;  %s314_s20 = sshll.u32 %s306_s8, 4  ;;  %s315_s20 = int_to_ptr.vmem [resolvable:$true] %s314_s20 }
  0x32   : > { %s311_s18 = scalar_lea.hbm %s7251_s1, %s4128_s27  ;;  %s303_s30 = scalar_lea.sflag [#allocation4], %s302_s17 }
  0x33   : > { %s312_s14 = sshll.u32 %s311_s18, 4  ;;  %s4670_s24 = smov 192   ;;  %s313_s14 = int_to_ptr.hbm [resolvable:$true] %s312_s14 }
  0x34   : > { %s4671_s10 = smov 12   ;;  %s331_s2 = sand.u32 1, %s4665_s15  }
  0x35   : > { %4148 = dma.hbm_to_vmem [thread:$0]  (!%p4837_p13), %s313_s14, 6144, %s315_s20, %s303_s30, %s4670_s24, %s4670_s24, %s4671_s10  }
  0x36   : > { %s3691_s11 = sshll.u32 %s302_s17, 7  ;;  %s4044_s23 = sshll.u32 %s4657_s13, 7 }
  0x37   : > { %s335_s26 = scalar_lea.vmem [#allocation6], %s3691_s11  ;;  %s340_s5 = scalar_lea.hbm %s7253_s3, %s4044_s23 }
  0x38   : > { %s343_s29 = sshll.u32 %s335_s26, 4  ;;  %s341_s4 = sshll.u32 %s340_s5, 4  ;;  %s344_s29 = int_to_ptr.vmem [resolvable:$true] %s343_s29  ;;  %s342_s4 = int_to_ptr.hbm [resolvable:$true] %s341_s4 }
  0x39   : > { %s332_s27 = scalar_lea.sflag [#allocation7], %s331_s2  ;;  %s7433_s18 = smov 8  }
  0x3a   : > { %s7434_s7 = smov 128   ;;  %355 = sbr.rel (%p4806_p11) target bundleno = 2316 (0x90c), region = 52 }
  0x3b   : > { %4151 = dma.hbm_to_vmem [thread:$0]  (!%p4837_p13), %s342_s4, 2048, %s344_s29, %s332_s27, %s7434_s7, %s7434_s7, %s7433_s18  }
  0x3f   : > { %s357_s10 = sand.u32 1, %s4641_s9  }
  0x40   : > { %s4129_s11 = smul.u32 384, %s357_s10  ;;  %s358_s14 = scalar_lea.sflag [#allocation4], %s357_s10 }
  0x42   : > { %s4865_s20 = scalar_lea.vmem [#allocation3], %s4129_s11 }
  0x43   : > { %4608 = dma.done.wait (%p4786_p3), %s358_s14, 6144  }
  0x44   : > { %4610 = vsyncadd (%p4786_p3), %s358_s14, 4294961152  ;;  %s367_s2 = sand.u32 1, %s4776_s16   ;;  %s3695_s5 = sshll.u32 %s357_s10, 7 }
  0x45   : > { %s368_s29 = scalar_lea.sflag [#allocation7], %s367_s2  ;;  %s4872_s21 = scalar_lea.vmem [#allocation6], %s3695_s5 }
  0x46   : > { %4612 = dma.done.wait (%p4786_p3), %s368_s29, 2048  }
  0x47   : > { %4614 = vsyncadd (%p4786_p3), %s368_s29, 4294965248 }
  0x48   : > { %4616 = dma.done.wait (%p86_p1), [#allocation7], 2048  }
  0x49   : > { %4618 = vsyncadd (%p86_p1), [#allocation7], 4294965248  ;;  %s421_s25 = sand.u32 1, %s4629_s28   ;;  %v1168_v0 = vld [vmem:[%s7256_s6 + $0x8] sm:$0xff]  ;;  %v1167_v1 = vld [vmem:[%s7256_s6] sm:$0xff]  ;;  %s4672_s30 = smov 32  }
  0x4a   : > { %s4885_s17 = sshll.u32 %s421_s25, 8  ;;  %v3850_v2 = vld [vmem:[%s4865_s20 + $0xa8] sm:$0xf]  ;;  %1330 = vrot.lane.b32.xlu0 %v1168_v0, %s4672_s30  ;;  %1328 = vrot.lane.b32.xlu2 %v1167_v1, %s4672_s30  ;;  %v4084_v3 = vld [vmem:[%s4865_s20 + $0xb0] sm:$0xf0]  ;;  %p424_p1 = scmp.lt.s32.totalorder %s4653_s12, 1 }
  0x4b   : > { %v3946_v4 = vld [vmem:[%s4865_s20 + $0x168] sm:$0xf]  ;;  %v3851_v5 = vor.u32 %v4084_v3, %v3850_v2  ;;  %v4108_v6 = vld [vmem:[%s4865_s20 + $0x170] sm:$0xf0]  ;;  %v4083_v7 = vld [vmem:[%s4865_s20 + $0xac] sm:$0xf] }
  0x4c   : > { %v3852_v8 = vld [vmem:[%s4865_s20 + $0xb4] sm:$0xf0]  ;;  %v3947_v9 = vor.u32 %v4108_v6, %v3946_v4  ;;  %v4107_v11 = vld [vmem:[%s4865_s20 + $0x16c] sm:$0xf]  ;;  %v3838_v13 = vld [vmem:[%s4865_s20 + $0x90] sm:$0xf] }
  0x4d   : > { %v3855_v10 = vor.u32 %v4083_v7, %v3852_v8  ;;  %v3948_v12 = vld [vmem:[%s4865_s20 + $0x174] sm:$0xf0]  ;;  %857 = vmatpush.bf16.msra.mxu0 %v3851_v5  ;;  %v4081_v15 = vld [vmem:[%s4865_s20 + $0x98] sm:$0xf0]  ;;  %v3934_v16 = vld [vmem:[%s4865_s20 + $0x150] sm:$0xf] }
  0x4e   : > { %v3951_v14 = vor.u32 %v4107_v11, %v3948_v12  ;;  %v4105_v17 = vld [vmem:[%s4865_s20 + $0x158] sm:$0xf0]  ;;  %906 = vmatpush.bf16.msra.mxu1 %v3947_v9  ;;  %v3839_v18 = vor.u32 %v4081_v15, %v3838_v13  ;;  %v4080_v20 = vld [vmem:[%s4865_s20 + $0x94] sm:$0xf]  ;;  %v3840_v21 = vld [vmem:[%s4865_s20 + $0x9c] sm:$0xf0] }
  0x4f   : > { %955 = vmatpush.bf16.msra.mxu2 %v3855_v10  ;;  %v3935_v19 = vor.u32 %v4105_v17, %v3934_v16  ;;  %v4104_v22 = vld [vmem:[%s4865_s20 + $0x154] sm:$0xf]  ;;  %v3843_v23 = vor.u32 %v4080_v20, %v3840_v21  ;;  %v3936_v24 = vld [vmem:[%s4865_s20 + $0x15c] sm:$0xf0]  ;;  %v1170_v26 = vld [vmem:[%s7256_s6 + $0x18] sm:$0xff]  ;;  %s4957_s2 = scalar_select %p424_p1, %s4653_s12, 1 }
  0x50   : > { %1004 = vmatpush.bf16.msra.mxu3 %v3951_v14  ;;  %v1171_v25 = vld [vmem:[%s7256_s6 + $0x20] sm:$0xff]  ;;  %v3939_v27 = vor.u32 %v4104_v22, %v3936_v24  ;;  %v3826_v28 = vld [vmem:[%s4865_s20 + $0x78] sm:$0xf]  ;;  %v4077_v33 = vld [vmem:[%s4865_s20 + $0x7c] sm:$0xf]  ;;  %s7437_s24 = sld [smem:[#allocation125_spill]] }
  0x51   : > { %v4078_v29 = vld [vmem:[%s4865_s20 + $0x80] sm:$0xf0]  ;;  %v3922_v30 = vld [vmem:[%s4865_s20 + $0x138] sm:$0xf]  ;;  %858 = vmatpush.bf16.msra.mxu0 %v3839_v18  ;;  %v3828_v34 = vld [vmem:[%s4865_s20 + $0x84] sm:$0xf0] }
  0x52   : > { %v3827_v31 = vor.u32 %v4078_v29, %v3826_v28  ;;  %v4102_v32 = vld [vmem:[%s4865_s20 + $0x140] sm:$0xf0]  ;;  %907 = vmatpush.bf16.msra.mxu1 %v3935_v19  ;;  %v3831_v36 = vor.u32 %v4077_v33, %v3828_v34  ;;  %v4101_v37 = vld [vmem:[%s4865_s20 + $0x13c] sm:$0xf]  ;;  %v3924_v38 = vld [vmem:[%s4865_s20 + $0x144] sm:$0xf0]  ;;  %1336 = vrot.lane.b32.xlu0 %v1171_v25, %s4672_s30 }
  0x53   : > { %956 = vmatpush.bf16.msra.mxu2 %v3843_v23  ;;  %v3923_v35 = vor.u32 %v4102_v32, %v3922_v30  ;;  %v3814_v39 = vld [vmem:[%s4865_s20 + $0x60] sm:$0xf]  ;;  %v3927_v40 = vor.u32 %v4101_v37, %v3924_v38  ;;  %v4075_v41 = vld [vmem:[%s4865_s20 + $0x68] sm:$0xf0]  ;;  %1334 = vrot.lane.b32.xlu2 %v1170_v26, %s4672_s30  ;;  %v4074_v44 = vld [vmem:[%s4865_s20 + $0x64] sm:$0xf] }
  0x54   : > { %1005 = vmatpush.bf16.msra.mxu3 %v3939_v27  ;;  %v3910_v42 = vld [vmem:[%s4865_s20 + $0x120] sm:$0xf]  ;;  %v4099_v43 = vld [vmem:[%s4865_s20 + $0x128] sm:$0xf0]  ;;  %v3816_v45 = vld [vmem:[%s4865_s20 + $0x6c] sm:$0xf0]  ;;  %v3815_v47 = vor.u32 %v4075_v41, %v3814_v39 }
  0x55   : > { %v4098_v46 = vld [vmem:[%s4865_s20 + $0x124] sm:$0xf]  ;;  %859 = vmatpush.bf16.msra.mxu0 %v3827_v31  ;;  %v3912_v48 = vld [vmem:[%s4865_s20 + $0x12c] sm:$0xf0]  ;;  %v3911_v49 = vor.u32 %v4099_v43, %v3910_v42  ;;  %v3819_v50 = vor.u32 %v4074_v44, %v3816_v45  ;;  %v1174_v51 = vld [vmem:[%s7256_s6 + $0x38] sm:$0xff]  ;;  %s4045_s19 = sshll.u32 %s4957_s2, 7 }
  0x56   : > { %908 = vmatpush.bf16.msra.mxu1 %v3923_v35  ;;  %v3802_v52 = vld [vmem:[%s4865_s20 + $0x48] sm:$0xf]  ;;  %v4072_v53 = vld [vmem:[%s4865_s20 + $0x50] sm:$0xf0]  ;;  %v3915_v55 = vor.u32 %v4098_v46, %v3912_v48  ;;  %v4071_v57 = vld [vmem:[%s4865_s20 + $0x4c] sm:$0xf]  ;;  %s4994_s4 = scalar_lea.vmem %s7250_s0, %s4045_s19 }
  0x57   : > { %957 = vmatpush.bf16.msra.mxu2 %v3831_v36  ;;  %v3898_v54 = vld [vmem:[%s4865_s20 + $0x108] sm:$0xf]  ;;  %v4096_v56 = vld [vmem:[%s4865_s20 + $0x110] sm:$0xf0]  ;;  %v3804_v58 = vld [vmem:[%s4865_s20 + $0x54] sm:$0xf0]  ;;  %v3803_v63 = vor.u32 %v4072_v53, %v3802_v52 }
  0x58   : > { %1006 = vmatpush.bf16.msra.mxu3 %v3927_v40  ;;  %v4095_v59 = vld [vmem:[%s4865_s20 + $0x10c] sm:$0xf]  ;;  %v3900_v60 = vld [vmem:[%s4865_s20 + $0x114] sm:$0xf0]  ;;  %v1169_v61 = vld [vmem:[%s7256_s6 + $0x10] sm:$0xff]  ;;  %v3899_v0 = vor.u32 %v4096_v56, %v3898_v54  ;;  %v3807_v1 = vor.u32 %v4071_v57, %v3804_v58  ;;  %s4673_s23 = smov 64  }
  0x59   : > { %860 = vmatpush.bf16.msra.mxu0 %v3815_v47  ;;  %v1173_v62 = vld [vmem:[%s7256_s6 + $0x30] sm:$0xff]  ;;  %1332 = vrot.lane.b32.xlu1 %v1169_v61, %s4672_s30  ;;  %v4069_v3 = vld [vmem:[%s4865_s20 + $0x38] sm:$0xf0]  ;;  %v3903_v5 = vor.u32 %v4095_v59, %v3900_v60  ;;  %v3792_v8 = vld [vmem:[%s4865_s20 + $0x3c] sm:$0xf0]  ;;  %s7447_s7 = sld [smem:[#allocation17_spill]] }
  0x5a   : > { %909 = vmatpush.bf16.msra.mxu1 %v3911_v49  ;;  %v3790_v2 = vld [vmem:[%s4865_s20 + $0x30] sm:$0xf]  ;;  %1342 = vrot.lane.b32.xlu0 %v1174_v51, %s4672_s30  ;;  %v4093_v6 = vld [vmem:[%s4865_s20 + $0xf8] sm:$0xf0]  ;;  %v4068_v7 = vld [vmem:[%s4865_s20 + $0x34] sm:$0xf] }
  0x5b   : > { %958 = vmatpush.bf16.msra.mxu2 %v3819_v50  ;;  %v3886_v4 = vld [vmem:[%s4865_s20 + $0xf0] sm:$0xf]  ;;  %1340 = vrot.lane.b32.xlu2 %v1173_v62, %s4672_s30  ;;  %v4092_v9 = vld [vmem:[%s4865_s20 + $0xf4] sm:$0xf]  ;;  %v3888_v10 = vld [vmem:[%s4865_s20 + $0xfc] sm:$0xf0]  ;;  %v3791_v11 = vor.u32 %v4069_v3, %v3790_v2  ;;  %v3795_v14 = vor.u32 %v4068_v7, %v3792_v8 }
  0x5c   : > { %1007 = vmatpush.bf16.msra.mxu3 %v3915_v55  ;;  %v3778_v12 = vld [vmem:[%s4865_s20 + $0x18] sm:$0xf]  ;;  %v3887_v13 = vor.u32 %v4093_v6, %v3886_v4  ;;  %v4066_v15 = vld [vmem:[%s4865_s20 + $0x20] sm:$0xf0]  ;;  %v3891_v18 = vor.u32 %v4092_v9, %v3888_v10  ;;  %v4065_v19 = vld [vmem:[%s4865_s20 + $0x1c] sm:$0xf] }
  0x5d   : > { %861 = vmatpush.bf16.msra.mxu0 %v3803_v63  ;;  %v3874_v16 = vld [vmem:[%s4865_s20 + $0xd8] sm:$0xf]  ;;  %v4090_v17 = vld [vmem:[%s4865_s20 + $0xe0] sm:$0xf0]  ;;  %v3780_v20 = vld [vmem:[%s4865_s20 + $0x24] sm:$0xf0]  ;;  %v3779_v26 = vor.u32 %v4066_v15, %v3778_v12 }
  0x5e   : > { %910 = vmatpush.bf16.msra.mxu1 %v3899_v0  ;;  %v1172_v21 = vld [vmem:[%s7256_s6 + $0x28] sm:$0xff]  ;;  %v1177_v22 = vld [vmem:[%s7256_s6 + $0x50] sm:$0xff]  ;;  %v4089_v23 = vld [vmem:[%s4865_s20 + $0xdc] sm:$0xf]  ;;  %v3875_v27 = vor.u32 %v4090_v17, %v3874_v16  ;;  %v3783_v28 = vor.u32 %v4065_v19, %v3780_v20  ;;  %s7453_s5 = sld [smem:[#allocation123_spill]]  ;;  %vm1215_vm0 = vcmask 1048064  }
  0x5f   : > { %959 = vmatpush.bf16.msra.mxu2 %v3807_v1  ;;  %v3876_v24 = vld [vmem:[%s4865_s20 + $0xe4] sm:$0xf0]  ;;  %v3766_v29 = vld [vmem:[%s4865_s20] sm:$0xf]  ;;  %v4063_v30 = vld [vmem:[%s4865_s20 + $0x8] sm:$0xf0] }
  0x60   : > { %1008 = vmatpush.bf16.msra.mxu3 %v3903_v5  ;;  %v1176_v25 = vld [vmem:[%s7256_s6 + $0x48] sm:$0xff]  ;;  %v3862_v31 = vld [vmem:[%s4865_s20 + $0xc0] sm:$0xf]  ;;  %v3879_v32 = vor.u32 %v4089_v23, %v3876_v24  ;;  %v4062_v34 = vld [vmem:[%s4865_s20 + $0x4] sm:$0xf]  ;;  %v3767_v38 = vor.u32 %v4063_v30, %v3766_v29  ;;  %p429_p3 = scmp.lt.s32.totalorder %s7447_s7, 1 }
  0x61   : > { %862 = vmatpush.bf16.msra.mxu0 %v3791_v11  ;;  %1338 = vrot.lane.b32.xlu1 %v1172_v21, %s4672_s30  ;;  %v4087_v33 = vld [vmem:[%s4865_s20 + $0xc8] sm:$0xf0]  ;;  %v3768_v35 = vld [vmem:[%s4865_s20 + $0xc] sm:$0xf0]  ;;  %v4086_v36 = vld [vmem:[%s4865_s20 + $0xc4] sm:$0xf] }
  0x62   : > { %911 = vmatpush.bf16.msra.mxu1 %v3887_v13  ;;  %1348 = vrot.lane.b32.xlu0 %v1177_v22, %s4672_s30  ;;  %v3864_v37 = vld [vmem:[%s4865_s20 + $0xcc] sm:$0xf0]  ;;  %v3702_v39 = vld [vmem:[%s4994_s4] sm:$0xf]  ;;  %v4047_v40 = vld [vmem:[%s4994_s4 + $0x4] sm:$0xf0]  ;;  %v3863_v41 = vor.u32 %v4087_v33, %v3862_v31  ;;  %v3771_v42 = vor.u32 %v4062_v34, %v3768_v35 }
  0x63   : > { %960 = vmatpush.bf16.msra.mxu2 %v3795_v14  ;;  %1346 = vrot.lane.b32.xlu2 %v1176_v25, %s4672_s30  ;;  %v4046_v43 = vld [vmem:[%s4994_s4 + $0x4] sm:$0xf]  ;;  %v3704_v44 = vld [vmem:[%s4994_s4 + $0x8] sm:$0xf0]  ;;  %v3867_v46 = vor.u32 %v4086_v36, %v3864_v37  ;;  %v5013_v48 = vor.u32 %v4047_v40, %v3702_v39  ;;  %v1178_v51 = vld [vmem:[%s7256_s6 + $0x58] sm:$0xff]  ;;  %s430_s10 = scalar_select %p429_p3, %s7447_s7, 1 }
  0x64   : > { %1009 = vmatpush.bf16.msra.mxu3 %v3891_v18  ;;  %v1175_v45 = vld [vmem:[%s7256_s6 + $0x40] sm:$0xff]  ;;  %v1180_v47 = vld [vmem:[%s7256_s6 + $0x68] sm:$0xff]  ;;  %v5018_v50 = vor.u32 %v4046_v43, %v3704_v44  ;;  %v1165_v52 = vld [vmem:[%s7437_s24 + $0x70] sm:$0xff]  ;;  %vm1696_vm1 = vcmask 523264   ;;  %p4036_p11 = scmp.ne.s32.totalorder %s7447_s7, 0 }
  0x65   : > { %863 = vmatpush.bf16.msra.mxu0 %v3779_v26  ;;  %7435 = vst [vmem:[#allocation25_spill] sm:$0xff] %v5013_v48  ;;  %v1179_v49 = vld [vmem:[%s7256_s6 + $0x60] sm:$0xff]  ;;  %v1182_v53 = vld [vmem:[%s7256_s6 + $0x78] sm:$0xff]  ;;  %v3710_v54 = vld [vmem:[%s4994_s4 + $0x10] sm:$0xf]  ;;  %s4130_s11 = smul.u32 3, %s430_s10 }
  0x66   : > { %912 = vmatpush.bf16.msra.mxu1 %v3875_v27  ;;  %7436 = vst [vmem:[#allocation26_spill] sm:$0xff] %v5018_v50  ;;  %v4049_v55 = vld [vmem:[%s4994_s4 + $0x14] sm:$0xf0]  ;;  %v4048_v56 = vld [vmem:[%s4994_s4 + $0x14] sm:$0xf]  ;;  %v1164_v59 = vld [vmem:[%s7437_s24 + $0x68] sm:$0xff] }
  0x67   : > { %961 = vmatpush.bf16.msra.mxu2 %v3783_v28  ;;  %v3712_v57 = vld [vmem:[%s4994_s4 + $0x18] sm:$0xf0]  ;;  %v1181_v58 = vld [vmem:[%s7256_s6 + $0x70] sm:$0xff]  ;;  %v5049_v60 = vor.u32 %v4049_v55, %v3710_v54  ;;  %v1163_v61 = vld [vmem:[%s7437_s24 + $0x60] sm:$0xff]  ;;  %s5192_s29 = scalar_lea.vmem %s7453_s5, %s4130_s11 }
  0x68   : > { %1010 = vmatpush.bf16.msra.mxu3 %v3879_v32  ;;  %v5054_v62 = vor.u32 %v4048_v56, %v3712_v57  ;;  %v1166_v63 = vld [vmem:[%s7437_s24 + $0x78] sm:$0xff]  ;;  %v1159_v0 = vld [vmem:[%s7437_s24 + $0x40] sm:$0xff]  ;;  %v4051_v3 = vld [vmem:[%s4994_s4 + $0x24] sm:$0xf0] }
  0x69   : > { %864 = vmatpush.bf16.msra.mxu0 %v3767_v38  ;;  %1344 = vrot.lane.b32.xlu1 %v1175_v45, %s4672_s30  ;;  %7438 = vst [vmem:[#allocation27_spill] sm:$0xff] %v5049_v60  ;;  %v1162_v1 = vld [vmem:[%s7437_s24 + $0x58] sm:$0xff]  ;;  %v3718_v2 = vld [vmem:[%s4994_s4 + $0x20] sm:$0xf]  ;;  %v4050_v4 = vld [vmem:[%s4994_s4 + $0x24] sm:$0xf] }
  0x6a   : > { %913 = vmatpush.bf16.msra.mxu1 %v3863_v41  ;;  %1354 = vrot.lane.b32.xlu0 %v1180_v47, %s4672_s30  ;;  %7439 = vst [vmem:[#allocation28_spill] sm:$0xff] %v5054_v62  ;;  %v3720_v5 = vld [vmem:[%s4994_s4 + $0x28] sm:$0xf0]  ;;  %v1161_v6 = vld [vmem:[%s7437_s24 + $0x50] sm:$0xff]  ;;  %v1155_v7 = vld [vmem:[%s7437_s24 + $0x20] sm:$0xff]  ;;  %v5085_v8 = vor.u32 %v4051_v3, %v3718_v2 }
  0x6b   : > { %962 = vmatpush.bf16.msra.mxu2 %v3771_v42  ;;  %1352 = vrot.lane.b32.xlu2 %v1179_v49, %s4672_s30  ;;  %v1158_v9 = vld [vmem:[%s7437_s24 + $0x38] sm:$0xff]  ;;  %v5090_v10 = vor.u32 %v4050_v4, %v3720_v5  ;;  %v1160_v11 = vld [vmem:[%s7437_s24 + $0x48] sm:$0xff]  ;;  %v1153_v13 = vld [vmem:[%s7437_s24 + $0x10] sm:$0xff] }
  0x6c   : > { %1011 = vmatpush.bf16.msra.mxu3 %v3867_v46  ;;  %865 = vmatmul.bf16.vlgmr.msra.gmra.mxu0 %v5013_v48  ;;  %7440 = vst [vmem:[#allocation29_spill] sm:$0xff] %v5085_v8  ;;  %v1154_v12 = vld [vmem:[%s7437_s24 + $0x18] sm:$0xff]  ;;  %v3726_v14 = vld [vmem:[%s4994_s4 + $0x30] sm:$0xf]  ;;  %v4052_v16 = vld [vmem:[%s4994_s4 + $0x34] sm:$0xf] }
  0x6d   : > { %914 = vmatmul.bf16.vlgmr.msra.gmra.mxu1 %v5018_v50  ;;  %7441 = vst [vmem:[#allocation30_spill] sm:$0xff] %v5090_v10  ;;  %v4053_v15 = vld [vmem:[%s4994_s4 + $0x34] sm:$0xf0]  ;;  %v3728_v17 = vld [vmem:[%s4994_s4 + $0x38] sm:$0xf0]  ;;  %v1157_v18 = vld [vmem:[%s7437_s24 + $0x30] sm:$0xff] }
  0x6e   : > { %963 = vmatmul.bf16.vlgmr.msra.gmra.mxu2 %v5013_v48  ;;  %v1152_v19 = vld [vmem:[%s7437_s24 + $0x8] sm:$0xff]  ;;  %v5121_v20 = vor.u32 %v4053_v15, %v3726_v14  ;;  %v1151_v21 = vld [vmem:[%s7437_s24] sm:$0xff]  ;;  %v5126_v22 = vor.u32 %v4052_v16, %v3728_v17  ;;  %v3742_v30 = vld [vmem:[%s4994_s4 + $0x50] sm:$0xf] }
  0x6f   : > { %1012 = vmatmul.bf16.vlgmr.msra.gmra.mxu3 %v5018_v50  ;;  %v1156_v23 = vld [vmem:[%s7437_s24 + $0x28] sm:$0xff]  ;;  %v3734_v24 = vld [vmem:[%s4994_s4 + $0x40] sm:$0xf]  ;;  %v4054_v26 = vld [vmem:[%s4994_s4 + $0x44] sm:$0xf] }
  0x70   : > { %7442 = vst [vmem:[#allocation31_spill] sm:$0xff] %v5121_v20  ;;  %v4055_v25 = vld [vmem:[%s4994_s4 + $0x44] sm:$0xf0]  ;;  %v3736_v27 = vld [vmem:[%s4994_s4 + $0x48] sm:$0xf0] }
  0x71   : > { %1350 = vrot.lane.b32.xlu1 %v1178_v51, %s4672_s30  ;;  %7443 = vst [vmem:[#allocation32_spill] sm:$0xff] %v5126_v22  ;;  %v5143_v28 = vor.u32 %v4055_v25, %v3734_v24  ;;  %v5145_v29 = vor.u32 %v4054_v26, %v3736_v27  ;;  %v4057_v31 = vld [vmem:[%s4994_s4 + $0x54] sm:$0xf0]  ;;  %v4056_v32 = vld [vmem:[%s4994_s4 + $0x54] sm:$0xf] }
  0x72   : > { %2047 = vrot.lane.b32.xlu0 %v1165_v52, %s4673_s23  ;;  %v3744_v33 = vld [vmem:[%s4994_s4 + $0x58] sm:$0xf0]  ;;  %v5155_v34 = vor.u32 %v4057_v31, %v3742_v30  ;;  %v3750_v36 = vld [vmem:[%s4994_s4 + $0x60] sm:$0xf]  ;;  %v4059_v37 = vld [vmem:[%s4994_s4 + $0x64] sm:$0xf0] }
  0x73   : > { %1358 = vrot.lane.b32.xlu2 %v1182_v53, %s4672_s30  ;;  %7444 = vst [vmem:[#allocation33_spill] sm:$0xff] %v5143_v28  ;;  %v5157_v35 = vor.u32 %v4056_v32, %v3744_v33  ;;  %v4058_v38 = vld [vmem:[%s4994_s4 + $0x64] sm:$0xf]  ;;  %v3752_v39 = vld [vmem:[%s4994_s4 + $0x68] sm:$0xf0]  ;;  %v5167_v40 = vor.u32 %v4059_v37, %v3750_v36 }
  0x74   : > { %7445 = vst [vmem:[#allocation34_spill] sm:$0xff] %v5145_v29  ;;  %v5169_v41 = vor.u32 %v4058_v38, %v3752_v39  ;;  %v3758_v42 = vld [vmem:[%s4994_s4 + $0x70] sm:$0xf]  ;;  %v4061_v43 = vld [vmem:[%s4994_s4 + $0x74] sm:$0xf0] }
  0x75   : > { %7446 = vst [vmem:[#allocation35_spill] sm:$0xff] %v5155_v34  ;;  %v4060_v44 = vld [vmem:[%s4994_s4 + $0x74] sm:$0xf]  ;;  %v3760_v45 = vld [vmem:[%s4994_s4 + $0x78] sm:$0xf0]  ;;  %v5180_v46 = vor.u32 %v4061_v43, %v3758_v42  ;;  %s4674_s4 = smov 96  }
  0x76   : > { %7448 = vst [vmem:[#allocation36_spill] sm:$0xff] %v5157_v35  ;;  %v5183_v47 = vor.u32 %v4060_v44, %v3760_v45  ;;  %v513_v51 = vld [vmem:[%s5192_s29] sm:$0x7] }
  0x77   : > { %7449 = vst [vmem:[#allocation37_spill] sm:$0xff] %v5167_v40  ;;  %v5197_v52 = vperm.slane %v513_v51, 0 }
  0x78   : > { %7450 = vst [vmem:[#allocation38_spill] sm:$0xff] %v5169_v41 }
  0x79   : > { %1356 = vrot.lane.b32.xlu1 %v1181_v58, %s4672_s30  ;;  %7451 = vst [vmem:[#allocation39_spill] sm:$0xff] %v5180_v46  ;;  %v5204_v58 = vperm.slane %v513_v51, 1 }
  0x7a   : > { %2045 = vrot.lane.b32.xlu0 %v1164_v59, %s4673_s23  ;;  %7452 = vst [vmem:[#allocation40_spill] sm:$0xff] %v5183_v47 }
  0x7b   : > { %2043 = vrot.lane.b32.xlu2 %v1163_v61, %s4673_s23 }
  0x7c   : > { %870 = vmatmul.bf16.gmra.mxu0 %v5049_v60 }
  0x7d   : > { %919 = vmatmul.bf16.gmra.mxu1 %v5054_v62 }
  0x7e   : > { %968 = vmatmul.bf16.gmra.mxu2 %v5049_v60 }
  0x7f   : > { %1017 = vmatmul.bf16.gmra.mxu3 %v5054_v62 }
  0x81   : > { %2049 = vrot.lane.b32.xlu1 %v1166_v63, %s4673_s23 }
  0x82   : > { %2035 = vrot.lane.b32.xlu0 %v1159_v0, %s4673_s23 }
  0x83   : > { %2041 = vrot.lane.b32.xlu2 %v1162_v1, %s4673_s23 }
  0x89   : > { %2039 = vrot.lane.b32.xlu1 %v1161_v6, %s4673_s23 }
  0x8a   : > { %2027 = vrot.lane.b32.xlu0 %v1155_v7, %s4673_s23 }
  0x8b   : > { %2033 = vrot.lane.b32.xlu2 %v1158_v9, %s4673_s23 }
  0x8c   : > { %875 = vmatmul.bf16.gmra.mxu0 %v5085_v8 }
  0x8d   : > { %924 = vmatmul.bf16.gmra.mxu1 %v5090_v10 }
  0x8e   : > { %973 = vmatmul.bf16.gmra.mxu2 %v5085_v8 }
  0x8f   : > { %1022 = vmatmul.bf16.gmra.mxu3 %v5090_v10 }
  0x91   : > { %2037 = vrot.lane.b32.xlu1 %v1160_v11, %s4673_s23 }
  0x92   : > { %2025 = vrot.lane.b32.xlu0 %v1154_v12, %s4673_s23 }
  0x93   : > { %2023 = vrot.lane.b32.xlu2 %v1153_v13, %s4673_s23 }
  0x99   : > { %2031 = vrot.lane.b32.xlu1 %v1157_v18, %s4673_s23 }
  0x9a   : > { %2021 = vrot.lane.b32.xlu0 %v1152_v19, %s4673_s23 }
  0x9b   : > { %2019 = vrot.lane.b32.xlu2 %v1151_v21, %s4673_s23 }
  0x9c   : > { %880 = vmatmul.bf16.gmra.mxu0 %v5121_v20 }
  0x9d   : > { %929 = vmatmul.bf16.gmra.mxu1 %v5126_v22 }
  0x9e   : > { %978 = vmatmul.bf16.gmra.mxu2 %v5121_v20 }
  0x9f   : > { %1027 = vmatmul.bf16.gmra.mxu3 %v5126_v22 }
  0xa1   : > { %2029 = vrot.lane.b32.xlu1 %v1156_v23, %s4673_s23 }
  0xa4   : > { %v5194_v49 = vpop.permute.xlu2 %1328 }
  0xac   : > { %885 = vmatmul.bf16.gmra.mxu0 %v5143_v28 }
  0xad   : > { %934 = vmatmul.bf16.gmra.mxu1 %v5145_v29  ;;  %v5202_v57 = vpop.permute.xlu2 %1334 }
  0xae   : > { %983 = vmatmul.bf16.gmra.mxu2 %v5143_v28 }
  0xaf   : > { %1032 = vmatmul.bf16.gmra.mxu3 %v5145_v29 }
  0xb5   : > { %v5219_v4 = vpop.permute.xlu2 %1340 }
  0xb6   : > { %7456 = vst [vmem:[#allocation43_spill] sm:$0xff] %v5219_v4 }
  0xbc   : > { %890 = vmatmul.bf16.gmra.mxu0 %v5155_v34  ;;  %v5209_v1 = vpop.permute.xlu0 %1330 }
  0xbd   : > { %939 = vmatmul.bf16.gmra.mxu1 %v5157_v35  ;;  %v5236_v18 = vpop.permute.xlu2 %1346 }
  0xbe   : > { %988 = vmatmul.bf16.gmra.mxu2 %v5155_v34  ;;  %7460 = vst [vmem:[#allocation47_spill] sm:$0xff] %v5236_v18 }
  0xbf   : > { %1037 = vmatmul.bf16.gmra.mxu3 %v5157_v35 }
  0xc4   : > { %v5227_v14 = vpop.permute.xlu0 %1336 }
  0xc5   : > { %7459 = vst [vmem:[#allocation46_spill] sm:$0xff] %v5227_v14  ;;  %v5254_v36 = vpop.permute.xlu2 %1352 }
  0xc6   : > { %7464 = vst [vmem:[#allocation51_spill] sm:$0xff] %v5254_v36 }
  0xcb   : > { %v5240_v24 = vpop.permute.xlu1 %1332 }
  0xcc   : > { %895 = vmatmul.bf16.gmra.mxu0 %v5167_v40  ;;  %v5249_v26 = vpop.permute.xlu0 %1342 }
  0xcd   : > { %944 = vmatmul.bf16.gmra.mxu1 %v5169_v41  ;;  %7462 = vst [vmem:[#allocation49_spill] sm:$0xff] %v5249_v26 }
  0xce   : > { %993 = vmatmul.bf16.gmra.mxu2 %v5167_v40 }
  0xcf   : > { %1042 = vmatmul.bf16.gmra.mxu3 %v5169_v41 }
  0xd3   : > { %v5265_v42 = vpop.permute.xlu1 %1338 }
  0xdc   : > { %900 = vmatmul.bf16.gmra.mxu0 %v5180_v46 }
  0xdd   : > { %949 = vmatmul.bf16.gmra.mxu1 %v5183_v47 }
  0xde   : > { %998 = vmatmul.bf16.gmra.mxu2 %v5180_v46 }
  0xdf   : > { %1047 = vmatmul.bf16.gmra.mxu3 %v5183_v47 }
  0xe9   : > { %v866_v53 = vpop.f32.mrf.mxu0 }
  0xea   : > { %v867_v54 = vadd.f32 %v866_v53, %v5197_v52  ;;  %v915_v55 = vpop.f32.mrf.mxu1  ;;  %v5270_v53 = vpop.permute.xlu0 %1348 }
  0xeb   : > { %7467 = vst [vmem:[#allocation54_spill] sm:$0xff] %v5270_v53 }
  0xec   : > { %v5200_v56 = vadd.f32 %v915_v55, %v867_v54 }
  0xee   : > { %7454 = vst [vmem:[#allocation41_spill] sm:$0xff] %v5200_v56  ;;  %1216 = vrot.lane.b32.xlu0 %v5200_v56, %s4673_s23 }
  0xf1   : > { %v964_v59 = vpop.f32.mrf.mxu2  ;;  %v868_v0 = vpop.f32.mrf.mxu0 }
  0xf2   : > { %v965_v61 = vadd.f32 %v964_v59, %v5204_v58  ;;  %v1013_v63 = vpop.f32.mrf.mxu3  ;;  %v917_v3 = vpop.f32.mrf.mxu1  ;;  %v869_v5 = vadd.f32 %v868_v0, %v5197_v52 }
  0xf3   : > { %v5274_v59 = vpop.permute.xlu2 %1358  ;;  %v5283_v0 = vpop.permute.xlu1 %1344 }
  0xf4   : > { %v5211_v2 = vadd.f32 %v1013_v63, %v965_v61  ;;  %v5223_v12 = vadd.f32 %v917_v3, %v869_v5  ;;  %7469 = vst [vmem:[#allocation56_spill] sm:$0xff] %v5274_v59 }
  0xf5   : > { %7470 = vst [vmem:[#allocation57_spill] sm:$0xff] %v5283_v0 }
  0xf6   : > { %7455 = vst [vmem:[#allocation42_spill] sm:$0xff] %v5211_v2  ;;  %2371 = vrot.lane.b32.xlu2 %v5211_v2, %s4673_s23  ;;  %1488 = vrot.lane.b32.xlu1 %v5211_v2, %s4673_s23 }
  0xf7   : > { %2099 = vrot.lane.b32.xlu0 %v5200_v56, %s4673_s23  ;;  %7457 = vst [vmem:[#allocation44_spill] sm:$0xff] %v5223_v12 }
  0xf9   : > { %v966_v6 = vpop.f32.mrf.mxu2  ;;  %v871_v11 = vpop.f32.mrf.mxu0 }
  0xfa   : > { %v967_v7 = vadd.f32 %v966_v6, %v5204_v58  ;;  %v1015_v9 = vpop.f32.mrf.mxu3  ;;  %v872_v15 = vadd.f32 %v871_v11, %v5197_v52  ;;  %v920_v16 = vpop.f32.mrf.mxu1 }
  0xfb   : > { %v5287_v6 = vpop.permute.xlu0 %1354  ;;  %v5295_v11 = vpop.permute.xlu2 %2043 }
  0xfc   : > { %v5225_v13 = vadd.f32 %v1015_v9, %v967_v7  ;;  %v5238_v19 = vadd.f32 %v920_v16, %v872_v15  ;;  %7472 = vst [vmem:[#allocation59_spill] sm:$0xff] %v5287_v6 }
  0xfd   : > { %7473 = vst [vmem:[#allocation60_spill] sm:$0xff] %v5295_v11 }
  0xfe   : > { %7458 = vst [vmem:[#allocation45_spill] sm:$0xff] %v5225_v13  ;;  %1491 = vrot.lane.b32.xlu2 %v5225_v13, %s4673_s23  ;;  %2101 = vrot.lane.b32.xlu1 %v5223_v12, %s4673_s23 }
  0xff   : > { %1219 = vrot.lane.b32.xlu0 %v5223_v12, %s4673_s23  ;;  %7461 = vst [vmem:[#allocation48_spill] sm:$0xff] %v5238_v19 }
 0x101   : > { %v969_v17 = vpop.f32.mrf.mxu2  ;;  %v873_v23 = vpop.f32.mrf.mxu0 }
 0x102   : > { %v1018_v21 = vpop.f32.mrf.mxu3  ;;  %v970_v25 = vadd.f32 %v969_v17, %v5204_v58  ;;  %v922_v27 = vpop.f32.mrf.mxu1  ;;  %v874_v43 = vadd.f32 %v873_v23, %v5197_v52 }
 0x103   : > { %v5298_v17 = vpop.permute.xlu1 %1350 }
 0x104   : > { %v5251_v31 = vadd.f32 %v1018_v21, %v970_v25  ;;  %v5272_v54 = vadd.f32 %v922_v27, %v874_v43  ;;  %7474 = vst [vmem:[#allocation61_spill] sm:$0xff] %v5298_v17  ;;  %v5307_v27 = vpop.permute.xlu0 %2047 }
 0x105   : > { %7476 = vst [vmem:[#allocation63_spill] sm:$0xff] %v5307_v27 }
 0x106   : > { %2103 = vrot.lane.b32.xlu2 %v5238_v19, %s4673_s23  ;;  %1222 = vrot.lane.b32.xlu1 %v5238_v19, %s4673_s23  ;;  %7463 = vst [vmem:[#allocation50_spill] sm:$0xff] %v5251_v31 }
 0x107   : > { %2373 = vrot.lane.b32.xlu0 %v5225_v13, %s4673_s23  ;;  %7468 = vst [vmem:[#allocation55_spill] sm:$0xff] %v5272_v54 }
 0x109   : > { %v971_v30 = vpop.f32.mrf.mxu2  ;;  %v876_v38 = vpop.f32.mrf.mxu0 }
 0x10a   : > { %v972_v32 = vadd.f32 %v971_v30, %v5204_v58  ;;  %v1020_v33 = vpop.f32.mrf.mxu3  ;;  %v877_v39 = vadd.f32 %v876_v38, %v5197_v52  ;;  %v925_v44 = vpop.f32.mrf.mxu1 }
 0x10b   : > { %v5312_v38 = vpop.permute.xlu2 %2041 }
 0x10c   : > { %v5256_v37 = vadd.f32 %v1020_v33, %v972_v32  ;;  %v5268_v51 = vadd.f32 %v925_v44, %v877_v39  ;;  %7477 = vst [vmem:[#allocation64_spill] sm:$0xff] %v5312_v38 }
 0x10e   : > { %7465 = vst [vmem:[#allocation52_spill] sm:$0xff] %v5256_v37  ;;  %2377 = vrot.lane.b32.xlu2 %v5256_v37, %s4673_s23  ;;  %2375 = vrot.lane.b32.xlu1 %v5251_v31, %s4673_s23 }
 0x10f   : > { %1494 = vrot.lane.b32.xlu0 %v5251_v31, %s4673_s23  ;;  %7466 = vst [vmem:[#allocation53_spill] sm:$0xff] %v5268_v51 }
 0x111   : > { %v974_v45 = vpop.f32.mrf.mxu2  ;;  %v878_v63 = vpop.f32.mrf.mxu0 }
 0x112   : > { %v1023_v55 = vpop.f32.mrf.mxu3  ;;  %v975_v61 = vadd.f32 %v974_v45, %v5204_v58  ;;  %v927_v7 = vpop.f32.mrf.mxu1  ;;  %v879_v15 = vadd.f32 %v878_v63, %v5197_v52 }
 0x113   : > { %v5318_v45 = vpop.permute.xlu1 %1356 }
 0x114   : > { %v5285_v3 = vadd.f32 %v1023_v55, %v975_v61  ;;  %v5300_v21 = vadd.f32 %v927_v7, %v879_v15  ;;  %7480 = vst [vmem:[#allocation67_spill] sm:$0xff] %v5318_v45 }
 0x116   : > { %1228 = vrot.lane.b32.xlu2 %v5268_v51, %s4673_s23  ;;  %1225 = vrot.lane.b32.xlu1 %v5272_v54, %s4673_s23  ;;  %7471 = vst [vmem:[#allocation58_spill] sm:$0xff] %v5285_v3 }
 0x117   : > { %2105 = vrot.lane.b32.xlu0 %v5272_v54, %s4673_s23  ;;  %7475 = vst [vmem:[#allocation62_spill] sm:$0xff] %v5300_v21 }
 0x119   : > { %v976_v5 = vpop.f32.mrf.mxu2  ;;  %v881_v16 = vpop.f32.mrf.mxu0 }
 0x11a   : > { %v1025_v9 = vpop.f32.mrf.mxu3  ;;  %v930_v30 = vpop.f32.mrf.mxu1  ;;  %v977_v32 = vadd.f32 %v976_v5, %v5204_v58  ;;  %v882_v55 = vadd.f32 %v881_v16, %v5197_v52 }
 0x11b   : > { %v5328_v5 = vpop.permute.xlu0 %2045 }
 0x11c   : > { %v5316_v43 = vadd.f32 %v1025_v9, %v977_v32  ;;  %7481 = vst [vmem:[#allocation68_spill] sm:$0xff] %v5328_v5  ;;  %v5330_v9 = vadd.f32 %v930_v30, %v882_v55  ;;  %v5343_v32 = vpop.permute.xlu1 %2049 }
 0x11d   : > { %7485 = vst [vmem:[#allocation72_spill] sm:$0xff] %v5343_v32 }
 0x11e   : > { %1500 = vrot.lane.b32.xlu2 %v5285_v3, %s4673_s23  ;;  %1497 = vrot.lane.b32.xlu1 %v5256_v37, %s4673_s23  ;;  %7479 = vst [vmem:[#allocation66_spill] sm:$0xff] %v5316_v43 }
 0x11f   : > { %2107 = vrot.lane.b32.xlu0 %v5268_v51, %s4673_s23  ;;  %7482 = vst [vmem:[#allocation69_spill] sm:$0xff] %v5330_v9 }
 0x121   : > { %v979_v23 = vpop.f32.mrf.mxu2  ;;  %v883_v44 = vpop.f32.mrf.mxu0 }
 0x122   : > { %v980_v25 = vadd.f32 %v979_v23, %v5204_v58  ;;  %v1028_v33 = vpop.f32.mrf.mxu3  ;;  %v884_v61 = vadd.f32 %v883_v44, %v5197_v52  ;;  %v932_v7 = vpop.f32.mrf.mxu1 }
 0x123   : > { %v5334_v23 = vpop.permute.xlu2 %2033  ;;  %v5347_v55 = vpop.permute.xlu0 %2035 }
 0x124   : > { %v5314_v39 = vadd.f32 %v1028_v33, %v980_v25  ;;  %v5332_v15 = vadd.f32 %v932_v7, %v884_v61  ;;  %7484 = vst [vmem:[#allocation71_spill] sm:$0xff] %v5334_v23 }
 0x125   : > { %7487 = vst [vmem:[#allocation74_spill] sm:$0xff] %v5347_v55 }
 0x126   : > { %1231 = vrot.lane.b32.xlu2 %v5300_v21, %s4673_s23  ;;  %2109 = vrot.lane.b32.xlu1 %v5300_v21, %s4673_s23  ;;  %7478 = vst [vmem:[#allocation65_spill] sm:$0xff] %v5314_v39 }
 0x127   : > { %2379 = vrot.lane.b32.xlu0 %v5285_v3, %s4673_s23  ;;  %7483 = vst [vmem:[#allocation70_spill] sm:$0xff] %v5332_v15 }
 0x129   : > { %v981_v63 = vpop.f32.mrf.mxu2  ;;  %v886_v30 = vpop.f32.mrf.mxu0 }
 0x12a   : > { %v1030_v16 = vpop.f32.mrf.mxu3  ;;  %v982_v25 = vadd.f32 %v981_v63, %v5204_v58  ;;  %v935_v61 = vpop.f32.mrf.mxu1  ;;  %v887_v47 = vadd.f32 %v886_v30, %v5197_v52 }
 0x12b   : > { %v5349_v63 = vpop.permute.xlu2 %2023  ;;  %v5362_v40 = vpop.permute.xlu0 %2027 }
 0x12c   : > { %v5345_v33 = vadd.f32 %v1030_v16, %v982_v25  ;;  %7488 = vst [vmem:[#allocation75_spill] sm:$0xff] %v5349_v63  ;;  %v5358_v16 = vpop.permute.xlu1 %2039  ;;  %v5360_v25 = vadd.f32 %v935_v61, %v887_v47 }
 0x12d   : > { %7489 = vst [vmem:[#allocation76_spill] sm:$0xff] %v5358_v16 }
 0x12e   : > { %2383 = vrot.lane.b32.xlu2 %v5314_v39, %s4673_s23  ;;  %2381 = vrot.lane.b32.xlu1 %v5316_v43, %s4673_s23  ;;  %7486 = vst [vmem:[#allocation73_spill] sm:$0xff] %v5345_v33 }
 0x12f   : > { %1503 = vrot.lane.b32.xlu0 %v5316_v43, %s4673_s23  ;;  %7490 = vst [vmem:[#allocation77_spill] sm:$0xff] %v5360_v25 }
 0x130   : > { %7491 = vst [vmem:[#allocation78_spill] sm:$0xff] %v5362_v40 }
 0x131   : > { %v984_v44 = vpop.f32.mrf.mxu2  ;;  %v888_v46 = vpop.f32.mrf.mxu0 }
 0x132   : > { %v1033_v7 = vpop.f32.mrf.mxu3  ;;  %v985_v35 = vadd.f32 %v984_v44, %v5204_v58  ;;  %v937_v30 = vpop.f32.mrf.mxu1  ;;  %v889_v47 = vadd.f32 %v888_v46, %v5197_v52 }
 0x133   : > { %v5371_v29 = vpop.permute.xlu2 %2019  ;;  %v5384_v40 = vpop.permute.xlu0 %2025 }
 0x134   : > { %7492 = vst [vmem:[#allocation79_spill] sm:$0xff] %v5371_v29  ;;  %v5374_v61 = vadd.f32 %v1033_v7, %v985_v35  ;;  %v5376_v28 = vpop.permute.xlu1 %2037  ;;  %v5378_v44 = vadd.f32 %v937_v30, %v889_v47 }
 0x135   : > { %7494 = vst [vmem:[#allocation81_spill] sm:$0xff] %v5376_v28 }
 0x136   : > { %2113 = vrot.lane.b32.xlu2 %v5332_v15, %s4673_s23  ;;  %2111 = vrot.lane.b32.xlu1 %v5330_v9, %s4673_s23  ;;  %7493 = vst [vmem:[#allocation80_spill] sm:$0xff] %v5374_v61 }
 0x137   : > { %1234 = vrot.lane.b32.xlu0 %v5330_v9, %s4673_s23  ;;  %7495 = vst [vmem:[#allocation82_spill] sm:$0xff] %v5378_v44 }
 0x138   : > { %7496 = vst [vmem:[#allocation83_spill] sm:$0xff] %v5384_v40 }
 0x139   : > { %v986_v41 = vpop.f32.mrf.mxu2  ;;  %v891_v22 = vpop.f32.mrf.mxu0 }
 0x13a   : > { %v1035_v34 = vpop.f32.mrf.mxu3  ;;  %v987_v35 = vadd.f32 %v986_v41, %v5204_v58  ;;  %v940_v30 = vpop.f32.mrf.mxu1 }
 0x13c   : > { %v5392_v29 = vadd.f32 %v1035_v34, %v987_v35  ;;  %v5396_v8 = vpop.permute.xlu1 %2031 }
 0x13d   : > { %7499 = vst [vmem:[#allocation86_spill] sm:$0xff] %v5396_v8 }
 0x13e   : > { %1509 = vrot.lane.b32.xlu2 %v5345_v33, %s4673_s23  ;;  %1506 = vrot.lane.b32.xlu1 %v5314_v39, %s4673_s23  ;;  %7497 = vst [vmem:[#allocation84_spill] sm:$0xff] %v5392_v29 }
 0x13f   : > { %2385 = vrot.lane.b32.xlu0 %v5345_v33, %s4673_s23 }
 0x141   : > { %v989_v20 = vpop.f32.mrf.mxu2  ;;  %v893_v32 = vpop.f32.mrf.mxu0 }
 0x142   : > { %v990_v46 = vadd.f32 %v989_v20, %v5204_v58  ;;  %v1038_v47 = vpop.f32.mrf.mxu3  ;;  %v892_v20 = vadd.f32 %v891_v22, %v5197_v52  ;;  %v894_v41 = vadd.f32 %v893_v32, %v5197_v52 }
 0x144   : > { %v5394_v10 = vadd.f32 %v1038_v47, %v990_v46  ;;  %v5408_v46 = vpop.permute.xlu0 %2021  ;;  %v942_v47 = vpop.f32.mrf.mxu1  ;;  %v5410_v63 = vadd.f32 %v940_v30, %v892_v20 }
 0x145   : > { %7501 = vst [vmem:[#allocation88_spill] sm:$0xff] %v5408_v46  ;;  %v5412_v40 = vadd.f32 %v942_v47, %v894_v41  ;;  %v5420_v22 = vpop.permute.xlu1 %2029 }
 0x146   : > { %1240 = vrot.lane.b32.xlu2 %v5360_v25, %s4673_s23  ;;  %1237 = vrot.lane.b32.xlu1 %v5332_v15, %s4673_s23  ;;  %7498 = vst [vmem:[#allocation85_spill] sm:$0xff] %v5394_v10 }
 0x147   : > { %2115 = vrot.lane.b32.xlu0 %v5360_v25, %s4673_s23  ;;  %7502 = vst [vmem:[#allocation89_spill] sm:$0xff] %v5410_v63 }
 0x148   : > { %7503 = vst [vmem:[#allocation90_spill] sm:$0xff] %v5412_v40 }
 0x149   : > { %v991_v34 = vpop.f32.mrf.mxu2  ;;  %7504 = vst [vmem:[#allocation91_spill] sm:$0xff] %v5420_v22  ;;  %v896_v20 = vpop.f32.mrf.mxu0 }
 0x14a   : > { %v1040_v27 = vpop.f32.mrf.mxu3  ;;  %v992_v41 = vadd.f32 %v991_v34, %v5204_v58  ;;  %v897_v60 = vadd.f32 %v896_v20, %v5197_v52 }
 0x14c   : > { %v945_v11 = vpop.f32.mrf.mxu1  ;;  %v5440_v50 = vadd.f32 %v1040_v27, %v992_v41 }
 0x14d   : > { %v5442_v16 = vadd.f32 %v945_v11, %v897_v60 }
 0x14e   : > { %2387 = vrot.lane.b32.xlu2 %v5374_v61, %s4673_s23  ;;  %2117 = vrot.lane.b32.xlu1 %v5378_v44, %s4673_s23  ;;  %7506 = vst [vmem:[#allocation93_spill] sm:$0xff] %v5440_v50 }
 0x14f   : > { %1512 = vrot.lane.b32.xlu0 %v5374_v61, %s4673_s23  ;;  %7507 = vst [vmem:[#allocation94_spill] sm:$0xff] %v5442_v16 }
 0x150   : > { %v5390_v7 = vpop.permute.xlu2 %2371 }
 0x151   : > { %v994_v62 = vpop.f32.mrf.mxu2  ;;  %v898_v41 = vpop.f32.mrf.mxu0 }
 0x152   : > { %v1043_v30 = vpop.f32.mrf.mxu3  ;;  %v995_v20 = vadd.f32 %v994_v62, %v5204_v58  ;;  %v899_v62 = vadd.f32 %v898_v41, %v5197_v52 }
 0x154   : > { %v5455_v60 = vadd.f32 %v1043_v30, %v995_v20  ;;  %v947_v11 = vpop.f32.mrf.mxu1 }
 0x155   : > { %v5469_v2 = vadd.f32 %v947_v11, %v899_v62 }
 0x156   : > { %1518 = vrot.lane.b32.xlu2 %v5394_v10, %s4673_s23  ;;  %1515 = vrot.lane.b32.xlu1 %v5392_v29, %s4673_s23  ;;  %7508 = vst [vmem:[#allocation95_spill] sm:$0xff] %v5455_v60 }
 0x157   : > { %1243 = vrot.lane.b32.xlu0 %v5378_v44, %s4673_s23  ;;  %7510 = vst [vmem:[#allocation97_spill] sm:$0xff] %v5469_v2 }
 0x158   : > { %v5406_v35 = vpop.permute.xlu2 %1491 }
 0x159   : > { %7500 = vst [vmem:[#allocation87_spill] sm:$0xff] %v5406_v35  ;;  %v996_v48 = vpop.f32.mrf.mxu2  ;;  %v901_v37 = vpop.f32.mrf.mxu0 }
 0x15a   : > { %v1045_v34 = vpop.f32.mrf.mxu3  ;;  %v902_v13 = vadd.f32 %v901_v37, %v5197_v52 }
 0x15c   : > { %v950_v41 = vpop.f32.mrf.mxu1 }
 0x15e   : > { %1249 = vrot.lane.b32.xlu2 %v5412_v40, %s4673_s23  ;;  %1246 = vrot.lane.b32.xlu1 %v5410_v63, %s4673_s23 }
 0x15f   : > { %2389 = vrot.lane.b32.xlu0 %v5392_v29, %s4673_s23 }
 0x160   : > { %v5422_v32 = vpop.permute.xlu2 %2103  ;;  %v5424_v46 = vpop.permute.xlu0 %1216 }
 0x161   : > { %v999_v28 = vpop.f32.mrf.mxu2  ;;  %v903_v59 = vpop.f32.mrf.mxu0 }
 0x162   : > { %v1048_v20 = vpop.f32.mrf.mxu3  ;;  %v904_v6 = vadd.f32 %v903_v59, %v5197_v52  ;;  %v1218_v59 = vsel %vm1215_vm0, %v5424_v46, %v5200_v56 }
 0x166   : > { %2121 = vrot.lane.b32.xlu2 %v5412_v40, %s4673_s23  ;;  %2119 = vrot.lane.b32.xlu1 %v5410_v63, %s4673_s23 }
 0x167   : > { %2391 = vrot.lane.b32.xlu0 %v5394_v10, %s4673_s23 }
 0x168   : > { %v5433_v47 = vpop.permute.xlu1 %1488  ;;  %v5435_v22 = vpop.permute.xlu2 %2377 }
 0x169   : > { %7505 = vst [vmem:[#allocation92_spill] sm:$0xff] %v5433_v47  ;;  %v5438_v5 = vpop.permute.xlu0 %2099  ;;  %v1000_v47 = vadd.f32 %v999_v28, %v5204_v58  ;;  %v997_v28 = vadd.f32 %v996_v48, %v5204_v58  ;;  %v1001_v52 = vpop.f32.mrf.mxu2 }
 0x16a   : > { %v1050_v36 = vpop.f32.mrf.mxu3 }
 0x16b   : > { %v5471_v35 = vadd.f32 %v1048_v20, %v1000_v47  ;;  %v5487_v62 = vadd.f32 %v1045_v34, %v997_v28  ;;  %v5489_v20 = vadd.f32 %v950_v41, %v902_v13  ;;  %v952_v34 = vpop.f32.mrf.mxu1 }
 0x16c   : > { %v5502_v13 = vadd.f32 %v952_v34, %v904_v6  ;;  %v1002_v6 = vadd.f32 %v1001_v52, %v5204_v58 }
 0x16d   : > { %7512 = vst [vmem:[#allocation99_spill] sm:$0xff] %v5489_v20 }
 0x16e   : > { %1521 = vrot.lane.b32.xlu2 %v5440_v50, %s4673_s23  ;;  %2393 = vrot.lane.b32.xlu1 %v5440_v50, %s4673_s23  ;;  %7515 = vst [vmem:[#allocation102_spill] sm:$0xff] %v5502_v13  ;;  %v5531_v17 = vadd.f32 %v1050_v36, %v1002_v6 }
 0x16f   : > { %1252 = vrot.lane.b32.xlu0 %v5442_v16, %s4673_s23 }
 0x170   : > { %v5451_v38 = vpop.permute.xlu2 %1228  ;;  %v5453_v55 = vpop.permute.xlu1 %2101 }
 0x171   : > { %v1220_v27 = vpop.permute.xlu0 %1219 }
 0x172   : > { %v1221_v46 = vsel %vm1215_vm0, %v1220_v27, %v5223_v12 }
 0x176   : > { %1524 = vrot.lane.b32.xlu2 %v5455_v60, %s4673_s23  ;;  %2123 = vrot.lane.b32.xlu1 %v5442_v16, %s4673_s23 }
 0x177   : > { %2395 = vrot.lane.b32.xlu0 %v5455_v60, %s4673_s23 }
 0x178   : > { %v5464_v23 = vpop.permute.xlu2 %1500  ;;  %v1223_v8 = vpop.permute.xlu1 %1222 }
 0x179   : > { %7509 = vst [vmem:[#allocation96_spill] sm:$0xff] %v5464_v23  ;;  %v5467_v30 = vpop.permute.xlu0 %2373  ;;  %v1224_v36 = vsel %vm1215_vm0, %v1223_v8, %v5238_v19 }
 0x17e   : > { %2125 = vrot.lane.b32.xlu2 %v5469_v2, %s4673_s23  ;;  %1255 = vrot.lane.b32.xlu1 %v5469_v2, %s4673_s23 }
 0x17f   : > { %2399 = vrot.lane.b32.xlu0 %v5471_v35, %s4673_s23 }
 0x180   : > { %v5481_v31 = vpop.permute.xlu2 %1231  ;;  %v5483_v11 = vpop.permute.xlu1 %2375 }
 0x181   : > { %v5485_v47 = vpop.permute.xlu0 %1494 }
 0x182   : > { %7511 = vst [vmem:[#allocation98_spill] sm:$0xff] %v5485_v47 }
 0x186   : > { %1258 = vrot.lane.b32.xlu2 %v5489_v20, %s4673_s23  ;;  %2397 = vrot.lane.b32.xlu1 %v5487_v62, %s4673_s23 }
 0x187   : > { %1530 = vrot.lane.b32.xlu0 %v5471_v35, %s4673_s23 }
 0x188   : > { %v5497_v48 = vpop.permute.xlu2 %2383  ;;  %v1226_v37 = vpop.permute.xlu1 %1225 }
 0x189   : > { %7513 = vst [vmem:[#allocation100_spill] sm:$0xff] %v5497_v48  ;;  %v5500_v47 = vpop.permute.xlu0 %2105 }
 0x18a   : > { %7514 = vst [vmem:[#allocation101_spill] sm:$0xff] %v5500_v47 }
 0x18e   : > { %1527 = vrot.lane.b32.xlu1 %v5487_v62, %s4673_s23  ;;  %2147 = vrot.lane.b32.xlu2 %v5438_v5, %s4673_s23 }
 0x18f   : > { %1261 = vrot.lane.b32.xlu0 %v5502_v13, %s4673_s23 }
 0x190   : > { %v5510_v41 = vpop.permute.xlu2 %2113  ;;  %v5512_v28 = vpop.permute.xlu1 %1497 }
 0x191   : > { %7516 = vst [vmem:[#allocation103_spill] sm:$0xff] %v5510_v41  ;;  %v5514_v45 = vpop.permute.xlu0 %2107 }
 0x192   : > { %7517 = vst [vmem:[#allocation104_spill] sm:$0xff] %v5512_v28 }
 0x193   : > { %7518 = vst [vmem:[#allocation105_spill] sm:$0xff] %v5514_v45 }
 0x196   : > { %1264 = vrot.lane.b32.xlu1 %v1218_v59, %s4673_s23  ;;  %2419 = vrot.lane.b32.xlu2 %v5390_v7, %s4673_s23 }
 0x197   : > { %2150 = vrot.lane.b32.xlu0 %v5453_v55, %s4673_s23 }
 0x198   : > { %v5525_v34 = vpop.permute.xlu2 %1509  ;;  %v5527_v28 = vpop.permute.xlu1 %2109 }
 0x199   : > { %7519 = vst [vmem:[#allocation106_spill] sm:$0xff] %v5527_v28  ;;  %v5529_v53 = vpop.permute.xlu0 %2379 }
 0x19a   : > { %7520 = vst [vmem:[#allocation107_spill] sm:$0xff] %v5529_v53 }
 0x19e   : > { %2401 = vrot.lane.b32.xlu1 %v5531_v17, %s4673_s23  ;;  %1266 = vrot.lane.b32.xlu2 %v1221_v46, %s4673_s23 }
 0x19f   : > { %2422 = vrot.lane.b32.xlu0 %v5467_v30, %s4673_s23 }
 0x1a0   : > { %v1241_v58 = vpop.permute.xlu2 %1240  ;;  %v5540_v52 = vpop.permute.xlu1 %2381 }
 0x1a1   : > { %7521 = vst [vmem:[#allocation108_spill] sm:$0xff] %v5540_v52  ;;  %v5542_v59 = vpop.permute.xlu0 %1503 }
 0x1a2   : > { %7522 = vst [vmem:[#allocation109_spill] sm:$0xff] %v5542_v59  ;;  %v1230_v59 = vsel %vm1215_vm0, %v5451_v38, %v5268_v51  ;;  %v1233_v38 = vsel %vm1215_vm0, %v5481_v31, %v5300_v21 }
 0x1a6   : > { %1533 = vrot.lane.b32.xlu1 %v5531_v17, %s4673_s23  ;;  %2153 = vrot.lane.b32.xlu2 %v5422_v32, %s4673_s23 }
 0x1a7   : > { %1268 = vrot.lane.b32.xlu0 %v1224_v36, %s4673_s23  ;;  %v1227_v36 = vsel %vm1215_vm0, %v1226_v37, %v5272_v54 }
 0x1a8   : > { %v5551_v27 = vpop.permute.xlu2 %2387  ;;  %v5553_v6 = vpop.permute.xlu1 %2111 }
 0x1a9   : > { %7523 = vst [vmem:[#allocation110_spill] sm:$0xff] %v5553_v6  ;;  %v1235_v46 = vpop.permute.xlu0 %1234 }
 0x1ae   : > { %2425 = vrot.lane.b32.xlu1 %v5483_v11, %s4673_s23  ;;  %2428 = vrot.lane.b32.xlu2 %v5435_v22, %s4673_s23 }
 0x1af   : > { %2156 = vrot.lane.b32.xlu0 %v5500_v47, %s4673_s23 }
 0x1b0   : > { %v1519_v18 = vpop.permute.xlu2 %1518  ;;  %v5561_v26 = vpop.permute.xlu1 %1506 }
 0x1b1   : > { %v5563_v8 = vpop.permute.xlu0 %2385 }
 0x1b6   : > { %1270 = vrot.lane.b32.xlu1 %v1227_v36, %s4673_s23  ;;  %1272 = vrot.lane.b32.xlu2 %v1230_v59, %s4673_s23 }
 0x1b7   : > { %2159 = vrot.lane.b32.xlu0 %v5514_v45, %s4673_s23 }
 0x1b8   : > { %v1250_v43 = vpop.permute.xlu2 %1249  ;;  %v1238_v0 = vpop.permute.xlu1 %1237 }
 0x1b9   : > { %v5574_v23 = vpop.permute.xlu0 %2115  ;;  %v1239_v31 = vsel %vm1215_vm0, %v1238_v0, %v5332_v15  ;;  %v1242_v0 = vsel %vm1215_vm0, %v1241_v58, %v5360_v25 }
 0x1ba   : > { %7524 = vst [vmem:[#allocation111_spill] sm:$0xff] %v5574_v23 }
 0x1be   : > { %2434 = vrot.lane.b32.xlu2 %v5540_v52, %s4673_s23  ;;  %2431 = vrot.lane.b32.xlu1 %v5529_v53, %s4673_s23 }
 0x1bf   : > { %1274 = vrot.lane.b32.xlu0 %v1233_v38, %s4673_s23  ;;  %v1236_v38 = vsel %vm1215_vm0, %v1235_v46, %v5330_v9 }
 0x1c0   : > { %v5584_v37 = vpop.permute.xlu2 %2121  ;;  %v5586_v59 = vpop.permute.xlu1 %2117 }
 0x1c1   : > { %7525 = vst [vmem:[#allocation112_spill] sm:$0xff] %v5584_v37  ;;  %v1513_v36 = vpop.permute.xlu0 %1512 }
 0x1c2   : > { %7526 = vst [vmem:[#allocation113_spill] sm:$0xff] %v5586_v59 }
 0x1c6   : > { %2437 = vrot.lane.b32.xlu2 %v5497_v48, %s4673_s23  ;;  %2162 = vrot.lane.b32.xlu1 %v5527_v28, %s4673_s23 }
 0x1c7   : > { %2165 = vrot.lane.b32.xlu0 %v5553_v6, %s4673_s23 }
 0x1c8   : > { %v1522_v3 = vpop.permute.xlu2 %1521  ;;  %v1516_v53 = vpop.permute.xlu1 %1515 }
 0x1c9   : > { %v1244_v4 = vpop.permute.xlu0 %1243 }
 0x1ce   : > { %1278 = vrot.lane.b32.xlu2 %v1239_v31, %s4673_s23  ;;  %1276 = vrot.lane.b32.xlu1 %v1236_v38, %s4673_s23 }
 0x1cf   : > { %2440 = vrot.lane.b32.xlu0 %v5563_v8, %s4673_s23 }
 0x1d0   : > { %v1525_v48 = vpop.permute.xlu2 %1524  ;;  %v1247_v52 = vpop.permute.xlu1 %1246 }
 0x1d1   : > { %v5602_v14 = vpop.permute.xlu0 %2389 }
 0x1d6   : > { %2174 = vrot.lane.b32.xlu2 %v5586_v59, %s4673_s23  ;;  %2168 = vrot.lane.b32.xlu1 %v5510_v41, %s4673_s23  ;;  %v1514_v59 = vsel %vm1215_vm0, %v1513_v36, %v5374_v61 }
 0x1d7   : > { %1280 = vrot.lane.b32.xlu0 %v1242_v0, %s4673_s23 }
 0x1d8   : > { %v5611_v46 = vpop.permute.xlu2 %2125  ;;  %v5613_v31 = vpop.permute.xlu1 %2119 }
 0x1d9   : > { %7527 = vst [vmem:[#allocation114_spill] sm:$0xff] %v5611_v46  ;;  %v5615_v38 = vpop.permute.xlu0 %2391  ;;  %v1248_v46 = vsel %vm1215_vm0, %v1247_v52, %v5410_v63  ;;  %v1520_v52 = vsel %vm1215_vm0, %v1519_v18, %v5394_v10 }
 0x1da   : > { %7528 = vst [vmem:[#allocation115_spill] sm:$0xff] %v5613_v31 }
 0x1db   : > { %7529 = vst [vmem:[#allocation116_spill] sm:$0xff] %v5615_v38 }
 0x1de   : > { %2171 = vrot.lane.b32.xlu1 %v5574_v23, %s4673_s23  ;;  %2446 = vrot.lane.b32.xlu2 %v5602_v14, %s4673_s23 }
 0x1df   : > { %1552 = vrot.lane.b32.xlu0 %v1514_v59, %s4673_s23  ;;  %v1245_v59 = vsel %vm1215_vm0, %v1244_v4, %v5378_v44  ;;  %v1526_v4 = vsel %vm1215_vm0, %v1525_v48, %v5455_v60  ;;  %v1523_v48 = vsel %vm1215_vm0, %v1522_v3, %v5440_v50 }
 0x1e0   : > { %v1259_v58 = vpop.permute.xlu2 %1258  ;;  %v5624_v41 = vpop.permute.xlu1 %2393 }
 0x1e1   : > { %v1253_v0 = vpop.permute.xlu0 %1252 }
 0x1e2   : > { %v1254_v60 = vsel %vm1215_vm0, %v1253_v0, %v5442_v16 }
 0x1e6   : > { %2443 = vrot.lane.b32.xlu1 %v5551_v27, %s4673_s23  ;;  %1284 = vrot.lane.b32.xlu2 %v1248_v46, %s4673_s23 }
 0x1e7   : > { %2449 = vrot.lane.b32.xlu0 %v5615_v38, %s4673_s23 }
 0x1e8   : > { %v5633_v23 = vpop.permute.xlu1 %2123  ;;  %v2148_v36 = vpop.permute.xlu2 %2147 }
 0x1e9   : > { %7530 = vst [vmem:[#allocation117_spill] sm:$0xff] %v5633_v23  ;;  %v5635_v61 = vpop.permute.xlu0 %2395  ;;  %v1517_v23 = vsel %vm1215_vm0, %v1516_v53, %v5392_v29 }
 0x1ea   : > { %7531 = vst [vmem:[#allocation118_spill] sm:$0xff] %v5635_v61 }
 0x1ee   : > { %1282 = vrot.lane.b32.xlu1 %v1245_v59, %s4673_s23  ;;  %2455 = vrot.lane.b32.xlu2 %v5635_v61, %s4673_s23  ;;  %v1251_v59 = vsel %vm1215_vm0, %v1250_v43, %v5412_v40 }
 0x1ef   : > { %1556 = vrot.lane.b32.xlu0 %v1520_v52, %s4673_s23 }
 0x1f0   : > { %v1256_v46 = vpop.permute.xlu1 %1255  ;;  %v2420_v6 = vpop.permute.xlu2 %2419 }
 0x1f1   : > { %v5645_v38 = vpop.permute.xlu0 %2399  ;;  %v1257_v61 = vsel %vm1215_vm0, %v1256_v46, %v5469_v2  ;;  %v2421_v3 = vsel %vm1215_vm0, %v2420_v6, %v5390_v7 }
 0x1f6   : > { %1554 = vrot.lane.b32.xlu1 %v1517_v23, %s4673_s23  ;;  %1560 = vrot.lane.b32.xlu2 %v1526_v4, %s4673_s23  ;;  %v2149_v4 = vsel %vm1215_vm0, %v2148_v36, %v5438_v5  ;;  %v1260_v36 = vsel %vm1215_vm0, %v1259_v58, %v5489_v20 }
 0x1f7   : > { %1286 = vrot.lane.b32.xlu0 %v1251_v59, %s4673_s23 }
 0x1f8   : > { %v5656_v18 = vpop.permute.xlu1 %2397  ;;  %v1267_v52 = vpop.permute.xlu2 %1266 }
 0x1f9   : > { %v1531_v10 = vpop.permute.xlu0 %1530 }
 0x1fe   : > { %2452 = vrot.lane.b32.xlu1 %v5624_v41, %s4673_s23  ;;  %1290 = vrot.lane.b32.xlu2 %v1257_v61, %s4673_s23 }
 0x1ff   : > { %2458 = vrot.lane.b32.xlu0 %v5656_v18, %s4673_s23 }
 0x200   : > { %v1528_v53 = vpop.permute.xlu1 %1527  ;;  %v2154_v23 = vpop.permute.xlu2 %2153 }
 0x201   : > { %v1262_v43 = vpop.permute.xlu0 %1261  ;;  %v1529_v46 = vsel %vm1215_vm0, %v1528_v53, %v5487_v62 }
 0x206   : > { %1558 = vrot.lane.b32.xlu1 %v1523_v48, %s4673_s23  ;;  %2195 = vrot.lane.b32.xlu2 %v2149_v4, %s4673_s23 }
 0x207   : > { %1562 = vrot.lane.b32.xlu0 %v1529_v46, %s4673_s23 }
 0x208   : > { %v1265_v61 = vpop.permute.xlu1 %1264  ;;  %v2429_v59 = vpop.permute.xlu2 %2428 }
 0x209   : > { %v2151_v29 = vpop.permute.xlu0 %2150  ;;  %v1296_v0 = vsel %vm1215_vm0, %v1265_v61, %v5200_v56  ;;  %v1263_v61 = vsel %vm1215_vm0, %v1262_v43, %v5502_v13  ;;  %v1297_v56 = vsel %vm1215_vm0, %v1267_v52, %v5223_v12 }
 0x20a   : > { %v1376_v46 = vmul.f32 %v5194_v49, %v1296_v0  ;;  %v1377_v43 = vmul.f32 %v5209_v1, %v1297_v56 }
 0x20e   : > { %1288 = vrot.lane.b32.xlu1 %v1254_v60, %s4673_s23  ;;  %2467 = vrot.lane.b32.xlu2 %v2421_v3, %s4673_s23  ;;  %v2155_v3 = vsel %vm1215_vm0, %v2154_v23, %v5422_v32 }
 0x20f   : > { %1292 = vrot.lane.b32.xlu0 %v1260_v36, %s4673_s23  ;;  %v1532_v36 = vsel %vm1215_vm0, %v1531_v10, %v5471_v35 }
 0x210   : > { %v5683_v53 = vpop.permute.xlu1 %2401  ;;  %v5685_v48 = vpop.permute.xlu2 %1272 }
 0x211   : > { %v2423_v4 = vpop.permute.xlu0 %2422 }
 0x216   : > { %2464 = vrot.lane.b32.xlu2 %v5683_v53, %s4673_s23  ;;  %2461 = vrot.lane.b32.xlu1 %v5645_v38, %s4673_s23 }
 0x217   : > { %1408 = vrot.lane.b32.xlu0 %v1376_v46, %s4674_s4 }
 0x218   : > { %v1534_v60 = vpop.permute.xlu1 %1533  ;;  %v5695_v6 = vpop.permute.xlu2 %2434 }
 0x219   : > { %v1269_v58 = vpop.permute.xlu0 %1268  ;;  %v1535_v56 = vsel %vm1215_vm0, %v1534_v60, %v5531_v17 }
 0x21a   : > { %v1298_v23 = vsel %vm1215_vm0, %v1269_v58, %v5238_v19  ;;  %v1508_v58 = vsel %vm1215_vm0, %v5561_v26, %v5314_v39 }
 0x21b   : > { %v1378_v10 = vmul.f32 %v5240_v24, %v1298_v23 }
 0x21e   : > { %2199 = vrot.lane.b32.xlu2 %v2155_v3, %s4673_s23  ;;  %1294 = vrot.lane.b32.xlu1 %v1263_v61, %s4673_s23  ;;  %v2152_v3 = vsel %vm1215_vm0, %v2151_v29, %v5453_v55  ;;  %v2424_v29 = vsel %vm1215_vm0, %v2423_v4, %v5467_v30 }
 0x21f   : > { %1564 = vrot.lane.b32.xlu0 %v1532_v36, %s4673_s23 }
 0x220   : > { %v2426_v0 = vpop.permute.xlu1 %2425  ;;  %v5706_v46 = vpop.permute.xlu2 %2437 }
 0x221   : > { %v2157_v50 = vpop.permute.xlu0 %2156 }
 0x222   : > { %v2158_v26 = vsel %vm1215_vm0, %v2157_v50, %v5500_v47  ;;  %v7539_v47 = vld [vmem:[#allocation58_spill] sm:$0xff] }
 0x226   : > { %1410 = vrot.lane.b32.xlu1 %v1377_v43, %s4674_s4  ;;  %1412 = vrot.lane.b32.xlu2 %v1378_v10, %s4674_s4 }
 0x227   : > { %2197 = vrot.lane.b32.xlu0 %v2152_v3, %s4673_s23  ;;  %v2427_v3 = vsel %vm1215_vm0, %v2426_v0, %v5483_v11  ;;  %v2430_v0 = vsel %vm1215_vm0, %v2429_v59, %v5435_v22 }
 0x228   : > { %v1271_v61 = vpop.permute.xlu1 %1270  ;;  %v5719_v36 = vpop.permute.xlu2 %1278 }
 0x229   : > { %v2160_v52 = vpop.permute.xlu0 %2159 }
 0x22e   : > { %1566 = vrot.lane.b32.xlu1 %v1535_v56, %s4673_s23  ;;  %1548 = vrot.lane.b32.xlu2 %v1508_v58, %s4673_s23  ;;  %v1299_v56 = vsel %vm1215_vm0, %v1271_v61, %v5272_v54 }
 0x22f   : > { %2469 = vrot.lane.b32.xlu0 %v2424_v29, %s4673_s23  ;;  %v1379_v29 = vmul.f32 %v5202_v57, %v1299_v56 }
 0x230   : > { %v5731_v23 = vpop.permute.xlu2 %2174  ;;  %v2432_v43 = vpop.permute.xlu1 %2431 }
 0x231   : > { %7532 = vst [vmem:[#allocation119_spill] sm:$0xff] %v5731_v23  ;;  %v1275_v10 = vpop.permute.xlu0 %1274 }
 0x232   : > { %v1301_v56 = vsel %vm1215_vm0, %v1275_v10, %v5300_v21  ;;  %v1300_v10 = vsel %vm1215_vm0, %v5685_v48, %v5268_v51 }
 0x236   : > { %2471 = vrot.lane.b32.xlu1 %v2427_v3, %s4673_s23  ;;  %2180 = vrot.lane.b32.xlu2 %v5584_v37, %s4673_s23  ;;  %v7537_v37 = vld [vmem:[#allocation100_spill] sm:$0xff] }
 0x237   : > { %2201 = vrot.lane.b32.xlu0 %v2158_v26, %s4673_s23 }
 0x238   : > { %v2163_v4 = vpop.permute.xlu1 %2162  ;;  %v2447_v60 = vpop.permute.xlu2 %2446 }
 0x239   : > { %v5741_v58 = vpop.permute.xlu0 %2165  ;;  %v2164_v19 = vsel %vm1215_vm0, %v2163_v4, %v5527_v28  ;;  %v2161_v4 = vsel %vm1215_vm0, %v2160_v52, %v5514_v45 }
 0x23e   : > { %2129 = vrot.lane.b32.xlu1 %v5502_v13, %s4673_s23  ;;  %2473 = vrot.lane.b32.xlu2 %v2430_v0, %s4673_s23 }
 0x23f   : > { %1414 = vrot.lane.b32.xlu0 %v1379_v29, %s4674_s4  ;;  %v1381_v29 = vmul.f32 %v5265_v42, %v1301_v56 }
 0x240   : > { %v1277_v50 = vpop.permute.xlu1 %1276  ;;  %v5752_v3 = vpop.permute.xlu2 %1284 }
 0x241   : > { %v2441_v26 = vpop.permute.xlu0 %2440  ;;  %v1302_v52 = vsel %vm1215_vm0, %v1277_v50, %v5330_v9  ;;  %v2439_v50 = vsel %vm1215_vm0, %v5706_v46, %v7537_v37  ;;  %v7541_v46 = vld [vmem:[#allocation57_spill] sm:$0xff] }
 0x246   : > { %2177 = vrot.lane.b32.xlu1 %v5613_v31, %s4673_s23  ;;  %2205 = vrot.lane.b32.xlu2 %v2164_v19, %s4673_s23  ;;  %v1511_v19 = vsel %vm1215_vm0, %v5525_v34, %v5345_v33  ;;  %v7534_v34 = vld [vmem:[#allocation46_spill] sm:$0xff]  ;;  %v7543_v31 = vld [vmem:[#allocation109_spill] sm:$0xff] }
 0x247   : > { %2127 = vrot.lane.b32.xlu0 %v5489_v20, %s4673_s23  ;;  %v1380_v21 = vmul.f32 %v7534_v34, %v1300_v10  ;;  %v7538_v10 = vld [vmem:[#allocation107_spill] sm:$0xff] }
 0x248   : > { %v5761_v59 = vpop.permute.xlu1 %2168  ;;  %v5763_v61 = vpop.permute.xlu2 %2455  ;;  %v2433_v9 = vsel %vm1215_vm0, %v2432_v43, %v7538_v10  ;;  %v7542_v43 = vld [vmem:[#allocation66_spill] sm:$0xff] }
 0x249   : > { %v1281_v0 = vpop.permute.xlu0 %1280  ;;  %v1505_v33 = vsel %vm1215_vm0, %v7543_v31, %v7542_v43 }
 0x24e   : > { %2203 = vrot.lane.b32.xlu1 %v2161_v4, %s4673_s23  ;;  %1418 = vrot.lane.b32.xlu2 %v1381_v29, %s4674_s4  ;;  %v7535_v4 = vld [vmem:[#allocation108_spill] sm:$0xff] }
 0x24f   : > { %1550 = vrot.lane.b32.xlu0 %v1511_v19, %s4673_s23  ;;  %v2436_v29 = vsel %vm1215_vm0, %v5695_v6, %v7535_v4  ;;  %v7536_v19 = vld [vmem:[#allocation43_spill] sm:$0xff]  ;;  %v7540_v6 = vld [vmem:[#allocation96_spill] sm:$0xff] }
 0x250   : > { %v5776_v54 = vpop.permute.xlu1 %2171  ;;  %v5778_v28 = vpop.permute.xlu2 %1560  ;;  %v1382_v12 = vmul.f32 %v7536_v19, %v1302_v52  ;;  %v1502_v52 = vsel %vm1215_vm0, %v7540_v6, %v7539_v47  ;;  %v1303_v6 = vsel %vm1215_vm0, %v5719_v36, %v5332_v15 }
 0x251   : > { %v5783_v56 = vpop.permute.xlu0 %1552 }
 0x252   : > { %7533 = vst [vmem:[#allocation120_spill] sm:$0xff] %v5783_v56 }
 0x256   : > { %1416 = vrot.lane.b32.xlu1 %v1380_v21, %s4674_s4  ;;  %2477 = vrot.lane.b32.xlu2 %v2436_v29, %s4673_s23  ;;  %v1304_v29 = vsel %vm1215_vm0, %v1281_v0, %v5360_v25 }
 0x257   : > { %1420 = vrot.lane.b32.xlu0 %v1382_v12, %s4674_s4  ;;  %v1384_v23 = vmul.f32 %v7541_v46, %v1304_v29  ;;  %v7544_v29 = vld [vmem:[#allocation49_spill] sm:$0xff] }
 0x258   : > { %v2444_v48 = vpop.permute.xlu1 %2443  ;;  %v1291_v51 = vpop.permute.xlu2 %1290  ;;  %v1383_v25 = vmul.f32 %v7544_v29, %v1303_v6 }
 0x259   : > { %v2450_v56 = vpop.permute.xlu0 %2449 }
 0x25e   : > { %2475 = vrot.lane.b32.xlu1 %v2433_v9, %s4673_s23  ;;  %2479 = vrot.lane.b32.xlu2 %v2439_v50, %s4673_s23  ;;  %v2442_v9 = vsel %vm1215_vm0, %v2441_v26, %v5563_v8  ;;  %v7545_v26 = vld [vmem:[#allocation47_spill] sm:$0xff] }
 0x25f   : > { %1544 = vrot.lane.b32.xlu0 %v1502_v52, %s4673_s23 }
 0x260   : > { %v1283_v12 = vpop.permute.xlu1 %1282  ;;  %v2196_v21 = vpop.permute.xlu2 %2195 }
 0x261   : > { %v5808_v45 = vpop.permute.xlu0 %1556  ;;  %v1305_v31 = vsel %vm1215_vm0, %v1283_v12, %v5378_v44  ;;  %v7546_v44 = vld [vmem:[#allocation61_spill] sm:$0xff] }
 0x266   : > { %1546 = vrot.lane.b32.xlu1 %v1505_v33, %s4673_s23  ;;  %1424 = vrot.lane.b32.xlu2 %v1384_v23, %s4674_s4  ;;  %v2448_v33 = vsel %vm1215_vm0, %v2447_v60, %v5602_v14  ;;  %v1385_v23 = vmul.f32 %v7545_v26, %v1305_v31  ;;  %v2445_v60 = vsel %vm1215_vm0, %v2444_v48, %v5551_v27 }
 0x267   : > { %2481 = vrot.lane.b32.xlu0 %v2442_v9, %s4673_s23 }
 0x268   : > { %v5819_v50 = vpop.permute.xlu1 %1554  ;;  %v2468_v0 = vpop.permute.xlu2 %2467 }
 0x269   : > { %v1287_v52 = vpop.permute.xlu0 %1286 }
 0x26a   : > { %v1307_v36 = vsel %vm1215_vm0, %v1287_v52, %v5412_v40  ;;  %v7548_v52 = vld [vmem:[#allocation54_spill] sm:$0xff] }
 0x26b   : > { %v1387_v6 = vmul.f32 %v7546_v44, %v1307_v36 }
 0x26e   : > { %1422 = vrot.lane.b32.xlu1 %v1383_v25, %s4674_s4  ;;  %2485 = vrot.lane.b32.xlu2 %v2448_v33, %s4673_s23  ;;  %v1306_v33 = vsel %vm1215_vm0, %v5752_v3, %v5410_v63 }
 0x26f   : > { %1426 = vrot.lane.b32.xlu0 %v1385_v23, %s4674_s4  ;;  %v1386_v40 = vmul.f32 %v7548_v52, %v1306_v33  ;;  %v7551_v33 = vld [vmem:[#allocation67_spill] sm:$0xff] }
 0x270   : > { %v2453_v9 = vpop.permute.xlu1 %2452  ;;  %v5833_v47 = vpop.permute.xlu2 %2464 }
 0x271   : > { %v2459_v12 = vpop.permute.xlu0 %2458  ;;  %v2454_v36 = vsel %vm1215_vm0, %v2453_v9, %v5624_v41  ;;  %v7552_v9 = vld [vmem:[#allocation116_spill] sm:$0xff] }
 0x276   : > { %2483 = vrot.lane.b32.xlu1 %v2445_v60, %s4673_s23  ;;  %1430 = vrot.lane.b32.xlu2 %v1387_v6, %s4674_s4 }
 0x278   : > { %v5842_v25 = vpop.permute.xlu1 %1558  ;;  %v5844_v31 = vpop.permute.xlu2 %2199 }
 0x279   : > { %7547 = vst [vmem:[#allocation46_spill] sm:$0xff] %v5842_v25  ;;  %v5849_v23 = vpop.permute.xlu0 %1562  ;;  %v7550_v25 = vld [vmem:[#allocation51_spill] sm:$0xff] }
 0x27e   : > { %1428 = vrot.lane.b32.xlu1 %v1386_v40, %s4674_s4  ;;  %2489 = vrot.lane.b32.xlu2 %v2454_v36, %s4673_s23  ;;  %v2451_v40 = vsel %vm1215_vm0, %v2450_v56, %v7552_v9  ;;  %v7555_v56 = vld [vmem:[#allocation59_spill] sm:$0xff] }
 0x280   : > { %v1289_v48 = vpop.permute.xlu1 %1288  ;;  %v5856_v6 = vpop.permute.xlu2 %1412 }
 0x281   : > { %7549 = vst [vmem:[#allocation108_spill] sm:$0xff] %v5856_v6  ;;  %v1308_v60 = vsel %vm1215_vm0, %v1289_v48, %v5442_v16  ;;  %v1293_v15 = vpop.permute.xlu0 %1292  ;;  %v1309_v48 = vsel %vm1215_vm0, %v1291_v51, %v5469_v2  ;;  %v7557_v16 = vld [vmem:[#allocation56_spill] sm:$0xff] }
 0x282   : > { %v1388_v3 = vmul.f32 %v7550_v25, %v1308_v60  ;;  %v1310_v63 = vsel %vm1215_vm0, %v1293_v15, %v5489_v20  ;;  %v2227_v15 = vsel %vm1215_vm0, %v2196_v21, %v5438_v5  ;;  %v1389_v20 = vmul.f32 %v7555_v56, %v1309_v48 }
 0x283   : > { %v1390_v43 = vmul.f32 %v7551_v33, %v1310_v63  ;;  %v7554_v63 = vld [vmem:[#allocation118_spill] sm:$0xff] }
 0x284   : > { %1432 = vrot.lane.b32.xlu0 %v1388_v3, %s4674_s4  ;;  %v2457_v3 = vsel %vm1215_vm0, %v5763_v61, %v7554_v63  ;;  %v2460_v61 = vsel %vm1215_vm0, %v2459_v12, %v5656_v18 }
 0x286   : > { %2487 = vrot.lane.b32.xlu1 %v2451_v40, %s4673_s23  ;;  %1436 = vrot.lane.b32.xlu2 %v1390_v43, %s4674_s4  ;;  %v2243_v40 = vmul.f32 %v2227_v15, %v5194_v49 }
 0x288   : > { %v2462_v36 = vpop.permute.xlu1 %2461  ;;  %v5869_v6 = vpop.permute.xlu2 %1548 }
 0x289   : > { %v5875_v60 = vpop.permute.xlu0 %1408  ;;  %v2463_v21 = vsel %vm1215_vm0, %v2462_v36, %v5645_v38 }
 0x28a   : > { %7553 = vst [vmem:[#allocation43_spill] sm:$0xff] %v5875_v60 }
 0x28c   : > { %2491 = vrot.lane.b32.xlu0 %v2457_v3, %s4673_s23  ;;  %v2499_v3 = vsel %vm1215_vm0, %v2468_v0, %v5390_v7 }
 0x28d   : > { %v2515_v36 = vmul.f32 %v2499_v3, %v5194_v49 }
 0x28e   : > { %1434 = vrot.lane.b32.xlu1 %v1389_v20, %s4674_s4  ;;  %2275 = vrot.lane.b32.xlu2 %v2243_v40, %s4672_s30 }
 0x290   : > { %v1295_v51 = vpop.permute.xlu1 %1294  ;;  %v5885_v43 = vpop.permute.xlu2 %2180 }
 0x291   : > { %v1565_v5 = vpop.permute.xlu0 %1564  ;;  %v1311_v48 = vsel %vm1215_vm0, %v1295_v51, %v5502_v13 }
 0x292   : > { %v1391_v2 = vmul.f32 %v7557_v16, %v1311_v48 }
 0x294   : > { %2495 = vrot.lane.b32.xlu0 %v2463_v21, %s4673_s23 }
 0x296   : > { %2493 = vrot.lane.b32.xlu1 %v2460_v61, %s4673_s23 }
 0x298   : > { %v5895_v20 = vpop.permute.xlu1 %1410  ;;  %v2474_v15 = vpop.permute.xlu2 %2473 }
 0x299   : > { %7556 = vst [vmem:[#allocation100_spill] sm:$0xff] %v5895_v20  ;;  %v2198_v40 = vpop.permute.xlu0 %2197 }
 0x29a   : > { %v2228_v12 = vsel %vm1215_vm0, %v2198_v40, %v5453_v55  ;;  %v2502_v55 = vsel %vm1215_vm0, %v2474_v15, %v5435_v22 }
 0x29b   : > { %v2244_v7 = vmul.f32 %v2228_v12, %v5209_v1 }
 0x29c   : > { %1438 = vrot.lane.b32.xlu0 %v1391_v2, %s4674_s4  ;;  %v2466_v2 = vsel %vm1215_vm0, %v5833_v47, %v5683_v53 }
 0x29e   : > { %2547 = vrot.lane.b32.xlu1 %v2515_v36, %s4672_s30  ;;  %v1582_v36 = vsel %vm1215_vm0, %v1565_v5, %v5471_v35 }
 0x2a0   : > { %v1567_v21 = vpop.permute.xlu1 %1566  ;;  %v5905_v51 = vpop.permute.xlu2 %2205 }
 0x2a1   : > { %v1583_v61 = vsel %vm1215_vm0, %v1567_v21, %v5531_v17  ;;  %v2470_v13 = vpop.permute.xlu0 %2469  ;;  %v2518_v21 = vmul.f32 %v2502_v55, %v5202_v57 }
 0x2a2   : > { %v1599_v0 = vmul.f32 %v1583_v61, %v7557_v16  ;;  %v2500_v48 = vsel %vm1215_vm0, %v2470_v13, %v5467_v30  ;;  %v1598_v61 = vmul.f32 %v1582_v36, %v7551_v33 }
 0x2a3   : > { %v2516_v47 = vmul.f32 %v2500_v48, %v5209_v1 }
 0x2a4   : > { %1646 = vrot.lane.b32.xlu2 %v1599_v0, %s4674_s4  ;;  %2277 = vrot.lane.b32.xlu0 %v2244_v7, %s4672_s30 }
 0x2a6   : > { %2497 = vrot.lane.b32.xlu1 %v2466_v2, %s4673_s23  ;;  %v7560_v2 = vld [vmem:[#allocation110_spill] sm:$0xff] }
 0x2a8   : > { %v2472_v3 = vpop.permute.xlu1 %2471  ;;  %v5921_v40 = vpop.permute.xlu2 %1418 }
 0x2a9   : > { %7558 = vst [vmem:[#allocation107_spill] sm:$0xff] %v5921_v40  ;;  %v5925_v12 = vpop.permute.xlu0 %2201  ;;  %v2501_v22 = vsel %vm1215_vm0, %v2472_v3, %v5483_v11  ;;  %v2167_v11 = vsel %vm1215_vm0, %v5741_v58, %v7560_v2  ;;  %v7588_v40 = vld [vmem:[#allocation73_spill] sm:$0xff] }
 0x2aa   : > { %v2517_v7 = vmul.f32 %v2501_v22, %v5240_v24 }
 0x2ac   : > { %2553 = vrot.lane.b32.xlu0 %v2518_v21, %s4672_s30  ;;  %2549 = vrot.lane.b32.xlu2 %v2516_v47, %s4672_s30 }
 0x2ae   : > { %1644 = vrot.lane.b32.xlu1 %v1598_v61, %s4674_s4 }
 0x2b0   : > { %v5935_v30 = vpop.permute.xlu1 %2129  ;;  %v2478_v13 = vpop.permute.xlu2 %2477 }
 0x2b1   : > { %v2504_v5 = vsel %vm1215_vm0, %v2478_v13, %v7535_v4  ;;  %v5939_v15 = vpop.permute.xlu0 %1414 }
 0x2b2   : > { %7559 = vst [vmem:[#allocation96_spill] sm:$0xff] %v5939_v15  ;;  %v2520_v0 = vmul.f32 %v2504_v5, %v5265_v42 }
 0x2b4   : > { %2557 = vrot.lane.b32.xlu0 %v2520_v0, %s4672_s30  ;;  %2551 = vrot.lane.b32.xlu2 %v2517_v7, %s4672_s30 }
 0x2b6   : > { %2207 = vrot.lane.b32.xlu1 %v2167_v11, %s4673_s23 }
 0x2b8   : > { %v5949_v55 = vpop.permute.xlu1 %2177  ;;  %v2480_v48 = vpop.permute.xlu2 %2479 }
 0x2b9   : > { %v2505_v4 = vsel %vm1215_vm0, %v2480_v48, %v7537_v37  ;;  %v5953_v3 = vpop.permute.xlu0 %2127 }
 0x2ba   : > { %v2521_v36 = vmul.f32 %v2505_v4, %v7536_v19 }
 0x2be   : > { %2559 = vrot.lane.b32.xlu1 %v2521_v36, %s4672_s30 }
 0x2c0   : > { %v5957_v21 = vpop.permute.xlu1 %2203  ;;  %v5959_v47 = vpop.permute.xlu2 %1424 }
 0x2c1   : > { %7561 = vst [vmem:[#allocation57_spill] sm:$0xff] %v5959_v47  ;;  %v5961_v61 = vpop.permute.xlu0 %1550 }
 0x2c8   : > { %v5963_v58 = vpop.permute.xlu1 %1416  ;;  %v2486_v22 = vpop.permute.xlu2 %2485 }
 0x2c9   : > { %7562 = vst [vmem:[#allocation109_spill] sm:$0xff] %v5963_v58  ;;  %v2508_v13 = vsel %vm1215_vm0, %v2486_v22, %v5602_v14  ;;  %v5967_v5 = vpop.permute.xlu0 %1420  ;;  %v7589_v58 = vld [vmem:[#allocation71_spill] sm:$0xff] }
 0x2ca   : > { %7563 = vst [vmem:[#allocation49_spill] sm:$0xff] %v5967_v5  ;;  %v2524_v37 = vmul.f32 %v2508_v13, %v7545_v26  ;;  %v2346_v15 = vmul.f32 %v7589_v58, %v7588_v40  ;;  %v4085_v58 = vld [vmem:[%s4865_s20 + $0xb8] sm:$0xf0] }
 0x2cc   : > { %2565 = vrot.lane.b32.xlu0 %v2524_v37, %s4672_s30 }
 0x2d0   : > { %v2476_v7 = vpop.permute.xlu1 %2475  ;;  %v5985_v37 = vpop.permute.xlu2 %1430 }
 0x2d1   : > { %v2503_v0 = vsel %vm1215_vm0, %v2476_v7, %v7538_v10  ;;  %v5973_v11 = vpop.permute.xlu0 %1544  ;;  %7565 = vst [vmem:[#allocation61_spill] sm:$0xff] %v5985_v37 }
 0x2d2   : > { %v2519_v48 = vmul.f32 %v2503_v0, %v7534_v34 }
 0x2d4   : > { %2555 = vrot.lane.b32.xlu2 %v2519_v48, %s4672_s30 }
 0x2d8   : > { %v5977_v4 = vpop.permute.xlu1 %1546  ;;  %v2490_v48 = vpop.permute.xlu2 %2489 }
 0x2d9   : > { %v2482_v36 = vpop.permute.xlu0 %2481 }
 0x2da   : > { %v2506_v14 = vsel %vm1215_vm0, %v2482_v36, %v5563_v8  ;;  %v2510_v8 = vsel %vm1215_vm0, %v2490_v48, %v5624_v41 }
 0x2db   : > { %v2522_v22 = vmul.f32 %v2506_v14, %v7544_v29  ;;  %v2526_v14 = vmul.f32 %v2510_v8, %v7546_v44 }
 0x2dd   : > { %2561 = vrot.lane.b32.xlu2 %v2522_v22, %s4672_s30 }
 0x2e0   : > { %v5983_v13 = vpop.permute.xlu1 %1422  ;;  %v6010_v8 = vpop.permute.xlu2 %1436 }
 0x2e1   : > { %7564 = vst [vmem:[#allocation47_spill] sm:$0xff] %v5983_v13  ;;  %v5991_v47 = vpop.permute.xlu0 %1426 }
 0x2e2   : > { %7566 = vst [vmem:[#allocation116_spill] sm:$0xff] %v5991_v47 }
 0x2e3   : > { %7570 = vst [vmem:[#allocation122_spill] sm:$0xff] %v6010_v8 }
 0x2e8   : > { %v2484_v10 = vpop.permute.xlu1 %2483 }
 0x2e9   : > { %v2507_v7 = vsel %vm1215_vm0, %v2484_v10, %v5551_v27 }
 0x2ea   : > { %v2523_v0 = vmul.f32 %v2507_v7, %v7541_v46 }
 0x2ec   : > { %2563 = vrot.lane.b32.xlu2 %v2523_v0, %s4672_s30 }
 0x2f0   : > { %v5995_v36 = vpop.permute.xlu1 %1428 }
 0x2f1   : > { %7567 = vst [vmem:[#allocation118_spill] sm:$0xff] %v5995_v36 }
 0x2f4   : > { %2569 = vrot.lane.b32.xlu2 %v2526_v14, %s4672_s30 }
 0x2f6   : > { %v5999_v22 = vpop.permute.xlu0 %1432 }
 0x2f7   : > { %7568 = vst [vmem:[#allocation110_spill] sm:$0xff] %v5999_v22  ;;  %v7571_v22 = vld [vmem:[#allocation103_spill] sm:$0xff] }
 0x2f8   : > { %v2488_v37 = vpop.permute.xlu1 %2487 }
 0x2f9   : > { %v2509_v27 = vsel %vm1215_vm0, %v2488_v37, %v7552_v9  ;;  %v2170_v9 = vsel %vm1215_vm0, %v5761_v59, %v7571_v22 }
 0x2fa   : > { %v2525_v10 = vmul.f32 %v2509_v27, %v7548_v52 }
 0x2fc   : > { %2567 = vrot.lane.b32.xlu1 %v2525_v10, %s4672_s30 }
 0x2fe   : > { %v2492_v7 = vpop.permute.xlu0 %2491 }
 0x2ff   : > { %v2511_v41 = vsel %vm1215_vm0, %v2492_v7, %v7554_v63  ;;  %v6020_v63 = vpop.permute.xlu2 %2275  ;;  %v7572_v7 = vld [vmem:[#allocation95_spill] sm:$0xff] }
 0x300   : > { %v2527_v0 = vmul.f32 %v2511_v41, %v7550_v25  ;;  %v6008_v48 = vpop.permute.xlu1 %1434  ;;  %v1580_v41 = vsel %vm1215_vm0, %v5778_v28, %v7572_v7 }
 0x301   : > { %7569 = vst [vmem:[#allocation121_spill] sm:$0xff] %v6008_v48  ;;  %v1596_v59 = vmul.f32 %v1580_v41, %v7550_v25  ;;  %v7578_v48 = vld [vmem:[#allocation87_spill] sm:$0xff] }
 0x302   : > { %2571 = vrot.lane.b32.xlu2 %v2527_v0, %s4672_s30  ;;  %v3954_v25 = vld [vmem:[%s4865_s20 + $0x170] sm:$0xf] }
 0x306   : > { %v2496_v10 = vpop.permute.xlu0 %2495 }
 0x307   : > { %v2513_v0 = vsel %vm1215_vm0, %v2496_v10, %v5645_v38  ;;  %v7574_v38 = vld [vmem:[#allocation50_spill] sm:$0xff] }
 0x308   : > { %v2494_v14 = vpop.permute.xlu1 %2493  ;;  %v7575_v10 = vld [vmem:[#allocation98_spill] sm:$0xff] }
 0x309   : > { %v2512_v37 = vsel %vm1215_vm0, %v2494_v14, %v5656_v18  ;;  %v2529_v18 = vmul.f32 %v2513_v0, %v7551_v33  ;;  %v1647_v14 = vpop.permute.xlu2 %1646  ;;  %v1496_v41 = vsel %vm1215_vm0, %v7575_v10, %v7574_v38  ;;  %v7579_v33 = vld [vmem:[#allocation52_spill] sm:$0xff] }
 0x30a   : > { %v2528_v27 = vmul.f32 %v2512_v37, %v7555_v56  ;;  %2209 = vrot.lane.b32.xlu2 %v2170_v9, %s4673_s23 }
 0x30c   : > { %2573 = vrot.lane.b32.xlu0 %v2528_v27, %s4672_s30  ;;  %v7573_v27 = vld [vmem:[#allocation117_spill] sm:$0xff] }
 0x310   : > { %v6029_v8 = vpop.permute.xlu1 %2547 }
 0x311   : > { %v6044_v0 = vpop.permute.xlu2 %2549 }
 0x312   : > { %1640 = vrot.lane.b32.xlu2 %v1596_v59, %s4674_s4  ;;  %v6046_v59 = vpop.permute.xlu0 %1438 }
 0x313   : > { %7576 = vst [vmem:[#allocation103_spill] sm:$0xff] %v6046_v59 }
 0x314   : > { %2575 = vrot.lane.b32.xlu0 %v2529_v18, %s4672_s30  ;;  %v4426_v18 = vld [vmem:[%s7437_s24 + $0x78] sm:$0xff] }
 0x318   : > { %v2498_v9 = vpop.permute.xlu1 %2497 }
 0x319   : > { %v2514_v37 = vsel %vm1215_vm0, %v2498_v9, %v5683_v53  ;;  %v1581_v53 = vsel %vm1215_vm0, %v5849_v23, %v5487_v62  ;;  %v1487_v9 = vmul.f32 %v4426_v18, %v5531_v17  ;;  %v7580_v18 = vld [vmem:[#allocation104_spill] sm:$0xff] }
 0x31a   : > { %v2530_v28 = vmul.f32 %v2514_v37, %v7557_v16  ;;  %2183 = vrot.lane.b32.xlu2 %v7573_v27, %s4673_s23  ;;  %v4427_v37 = vld [vmem:[%s7437_s24 + $0x70] sm:$0xff]  ;;  %v1597_v23 = vmul.f32 %v1581_v53, %v7555_v56  ;;  %v1499_v5 = vsel %vm1215_vm0, %v7580_v18, %v7579_v33  ;;  %v6073_v53 = vpop.permute.xlu2 %2551 }
 0x31b   : > { %v1679_v36 = vadd.f32 %v1647_v14, %v1487_v9  ;;  %v6076_v9 = vpop.permute.xlu0 %2277  ;;  %v7593_v56 = vld [vmem:[#allocation115_spill] sm:$0xff] }
 0x31c   : > { %2577 = vrot.lane.b32.xlu1 %v2530_v28, %s4672_s30  ;;  %1540 = vrot.lane.b32.xlu0 %v1496_v41, %s4673_s23  ;;  %v1486_v28 = vmul.f32 %v4427_v37, %v5471_v35  ;;  %v7577_v41 = vld [vmem:[#allocation45_spill] sm:$0xff] }
 0x31d   : > { %v1493_v59 = vsel %vm1215_vm0, %v7578_v48, %v7577_v41  ;;  %v7581_v37 = vld [vmem:[#allocation85_spill] sm:$0xff] }
 0x31e   : > { %v1578_v48 = vsel %vm1215_vm0, %v5808_v45, %v7581_v37  ;;  %v7584_v45 = vld [vmem:[#allocation114_spill] sm:$0xff] }
 0x320   : > { %v1645_v10 = vpop.permute.xlu1 %1644 }
 0x321   : > { %v1678_v47 = vadd.f32 %v1645_v10, %v1486_v28 }
 0x322   : > { %1538 = vrot.lane.b32.xlu2 %v1493_v59, %s4673_s23  ;;  %v1594_v59 = vmul.f32 %v1578_v48, %v7548_v52 }
 0x323   : > { %v1695_v13 = vpack.c.bf16 %v1679_v36, %v1678_v47  ;;  %v7582_v47 = vld [vmem:[#allocation42_spill] sm:$0xff]  ;;  %v7583_v36 = vld [vmem:[#allocation92_spill] sm:$0xff] }
 0x324   : > { %1542 = vrot.lane.b32.xlu1 %v1499_v5, %s4673_s23  ;;  %1642 = vrot.lane.b32.xlu0 %v1597_v23, %s4674_s4  ;;  %v1490_v5 = vsel %vm1215_vm0, %v7583_v36, %v7582_v47  ;;  %v7585_v23 = vld [vmem:[#allocation111_spill] sm:$0xff] }
 0x325   : > { %v1743_v14 = vsel %vm1696_vm1, %v1695_v13, 0  ;;  %v2229_v13 = vsel %vm1215_vm0, %v5844_v31, %v5422_v32  ;;  %v2173_v18 = vsel %vm1215_vm0, %v5776_v54, %v7585_v23  ;;  %v7587_v32 = vld [vmem:[#allocation86_spill] sm:$0xff] }
 0x326   : > { %1745 = vmatpush.bf16.xpose.msrb.mxu2 %v1743_v14  ;;  %v2245_v48 = vmul.f32 %v2229_v13, %v5240_v24  ;;  %v6096_v14 = vpop.permute.xlu0 %2553  ;;  %v2345_v31 = vmul.f32 %v7587_v32, %v5314_v39 }
 0x328   : > { %v6082_v28 = vpop.permute.xlu1 %2207 }
 0x32a   : > { %1636 = vrot.lane.b32.xlu2 %v1594_v59, %s4674_s4  ;;  %v7586_v59 = vld [vmem:[#allocation84_spill] sm:$0xff] }
 0x32b   : > { %v1577_v36 = vsel %vm1215_vm0, %v5819_v50, %v7586_v59 }
 0x32c   : > { %1536 = vrot.lane.b32.xlu1 %v1490_v5, %s4673_s23  ;;  %2186 = vrot.lane.b32.xlu0 %v7584_v45, %s4673_s23  ;;  %v1593_v13 = vmul.f32 %v1577_v36, %v7545_v26  ;;  %v7592_v36 = vld [vmem:[#allocation74_spill] sm:$0xff] }
 0x32e   : > { %v6090_v10 = vpop.permute.xlu2 %2555 }
 0x330   : > { %v2560_v5 = vpop.permute.xlu1 %2559 }
 0x331   : > { %v2601_v16 = vadd.f32 %v2560_v5, %v2345_v31 }
 0x332   : > { %2211 = vrot.lane.b32.xlu2 %v2173_v18, %s4673_s23  ;;  %v6109_v18 = vpop.permute.xlu0 %2557 }
 0x334   : > { %2279 = vrot.lane.b32.xlu0 %v2245_v48, %s4672_s30  ;;  %v1574_v48 = vsel %vm1215_vm0, %v5869_v6, %v5314_v39  ;;  %v3858_v6 = vld [vmem:[%s4865_s20 + $0xb0] sm:$0xf] }
 0x337   : > { %v2562_v54 = vpop.permute.xlu2 %2561 }
 0x338   : > { %v2602_v60 = vadd.f32 %v2562_v54, %v2346_v15  ;;  %v7591_v15 = vld [vmem:[#allocation80_spill] sm:$0xff] }
 0x339   : > { %v2347_v5 = vmul.f32 %v7592_v36, %v7591_v15  ;;  %v4109_v36 = vld [vmem:[%s4865_s20 + $0x178] sm:$0xf0] }
 0x33a   : > { %v2622_v20 = vpack.c.bf16 %v2602_v60, %v2601_v16  ;;  %1634 = vrot.lane.b32.xlu2 %v1593_v13, %s4674_s4  ;;  %v7590_v16 = vld [vmem:[#allocation81_spill] sm:$0xff]  ;;  %v1590_v13 = vmul.f32 %v1574_v48, %v7536_v19  ;;  %v3955_v48 = vor.u32 %v4109_v36, %v3954_v25  ;;  %v4079_v36 = vld [vmem:[%s4865_s20 + $0x88] sm:$0xf0] }
 0x33b   : > { %v2348_v60 = vmul.f32 %v7590_v16, %v7586_v59  ;;  %v3859_v16 = vor.u32 %v4085_v58, %v3858_v6  ;;  %v3942_v58 = vld [vmem:[%s4865_s20 + $0x158] sm:$0xf]  ;;  %v3834_v25 = vld [vmem:[%s4865_s20 + $0x80] sm:$0xf] }
 0x33c   : > { %2665 = vrot.lane.b32.xlu1 %v2622_v20, %s4673_s23  ;;  %1102 = vmatpush.bf16.msrb.mxu1 %v3955_v48  ;;  %v3835_v6 = vor.u32 %v4079_v36, %v3834_v25  ;;  %v3810_v25 = vld [vmem:[%s4865_s20 + $0x50] sm:$0xf]  ;;  %v4073_v36 = vld [vmem:[%s4865_s20 + $0x58] sm:$0xf0] }
 0x33d   : > { %1053 = vmatpush.bf16.msrb.mxu0 %v3859_v16 }
 0x33e   : > { %v2566_v50 = vpop.permute.xlu0 %2565 }
 0x33f   : > { %v2604_v54 = vadd.f32 %v2566_v50, %v2348_v60  ;;  %v2179_v50 = vsel %vm1215_vm0, %v5949_v55, %v7593_v56  ;;  %v3846_v60 = vld [vmem:[%s4865_s20 + $0x98] sm:$0xf]  ;;  %v4064_v56 = vld [vmem:[%s4865_s20 + $0x10] sm:$0xf0] }
 0x342   : > { %2192 = vrot.lane.b32.xlu2 %v5935_v30, %s4673_s23 }
 0x346   : > { %v2564_v31 = vpop.permute.xlu2 %2563 }
 0x347   : > { %v2603_v20 = vadd.f32 %v2564_v31, %v2347_v5 }
 0x349   : > { %v2623_v32 = vpack.c.bf16 %v2604_v54, %v2603_v20  ;;  %v4106_v54 = vld [vmem:[%s4865_s20 + $0x160] sm:$0xf0]  ;;  %v7594_v20 = vld [vmem:[#allocation66_spill] sm:$0xff] }
 0x34a   : > { %1628 = vrot.lane.b32.xlu2 %v1590_v13, %s4674_s4  ;;  %v1573_v55 = vsel %vm1215_vm0, %v5977_v4, %v7594_v20  ;;  %v3943_v16 = vor.u32 %v4106_v54, %v3942_v58  ;;  %v3930_v13 = vld [vmem:[%s4865_s20 + $0x140] sm:$0xf]  ;;  %v3822_v4 = vld [vmem:[%s4865_s20 + $0x68] sm:$0xf] }
 0x34b   : > { %2667 = vrot.lane.b32.xlu0 %v2623_v32, %s4673_s23  ;;  %v4082_v32 = vld [vmem:[%s4865_s20 + $0xa0] sm:$0xf0]  ;;  %v1589_v48 = vmul.f32 %v1573_v55, %v5265_v42  ;;  %v3918_v54 = vld [vmem:[%s4865_s20 + $0x128] sm:$0xf] }
 0x34c   : > { %v3847_v5 = vor.u32 %v4082_v32, %v3846_v60  ;;  %1103 = vmatpush.bf16.msrb.mxu1 %v3943_v16  ;;  %v4076_v32 = vld [vmem:[%s4865_s20 + $0x70] sm:$0xf0] }
 0x34d   : > { %v4100_v16 = vld [vmem:[%s4865_s20 + $0x130] sm:$0xf0] }
 0x34e   : > { %v6134_v31 = vpop.permute.xlu2 %2569  ;;  %1054 = vmatpush.bf16.msrb.mxu0 %v3847_v5  ;;  %v3823_v5 = vor.u32 %v4076_v32, %v3822_v4  ;;  %v3919_v55 = vor.u32 %v4100_v16, %v3918_v54  ;;  %v4070_v4 = vld [vmem:[%s4865_s20 + $0x40] sm:$0xf0] }
 0x34f   : > { %v4094_v54 = vld [vmem:[%s4865_s20 + $0x100] sm:$0xf0] }
 0x352   : > { %2215 = vrot.lane.b32.xlu2 %v2179_v50, %s4673_s23  ;;  %v4103_v50 = vld [vmem:[%s4865_s20 + $0x148] sm:$0xf0]  ;;  %1055 = vmatpush.bf16.msrb.mxu0 %v3835_v6  ;;  %v3906_v6 = vld [vmem:[%s4865_s20 + $0x110] sm:$0xf] }
 0x353   : > { %v3931_v60 = vor.u32 %v4103_v50, %v3930_v13  ;;  %v3811_v13 = vor.u32 %v4073_v36, %v3810_v25  ;;  %v4097_v50 = vld [vmem:[%s4865_s20 + $0x118] sm:$0xf0]  ;;  %v3786_v36 = vld [vmem:[%s4865_s20 + $0x20] sm:$0xf] }
 0x355   : > { %1104 = vmatpush.bf16.msrb.mxu1 %v3931_v60  ;;  %v3798_v60 = vld [vmem:[%s4865_s20 + $0x38] sm:$0xf] }
 0x356   : > { %1056 = vmatpush.bf16.msrb.mxu0 %v3823_v5  ;;  %v3799_v32 = vor.u32 %v4070_v4, %v3798_v60  ;;  %v3894_v5 = vld [vmem:[%s4865_s20 + $0xf8] sm:$0xf]  ;;  %v3774_v4 = vld [vmem:[%s4865_s20 + $0x8] sm:$0xf] }
 0x359   : > { %1105 = vmatpush.bf16.msrb.mxu1 %v3919_v55  ;;  %v3895_v55 = vor.u32 %v4094_v54, %v3894_v5  ;;  %v4088_v5 = vld [vmem:[%s4865_s20 + $0xd0] sm:$0xf0]  ;;  %v7595_v54 = vld [vmem:[#allocation93_spill] sm:$0xff] }
 0x35a   : > { %1626 = vrot.lane.b32.xlu2 %v1589_v48, %s4674_s4  ;;  %1057 = vmatpush.bf16.msrb.mxu0 %v3811_v13  ;;  %v3907_v48 = vor.u32 %v4097_v50, %v3906_v6  ;;  %v4067_v13 = vld [vmem:[%s4865_s20 + $0x28] sm:$0xf0]  ;;  %v3882_v50 = vld [vmem:[%s4865_s20 + $0xe0] sm:$0xf] }
 0x35b   : > { %v3787_v6 = vor.u32 %v4067_v13, %v3786_v36 }
 0x35c   : > { %v6149_v58 = vpop.permute.xlu2 %2571 }
 0x35d   : > { %1106 = vmatpush.bf16.msrb.mxu1 %v3907_v48  ;;  %v4091_v48 = vld [vmem:[%s4865_s20 + $0xe8] sm:$0xf0] }
 0x35e   : > { %1058 = vmatpush.bf16.msrb.mxu0 %v3799_v32  ;;  %v3883_v60 = vor.u32 %v4091_v48, %v3882_v50  ;;  %v3870_v32 = vld [vmem:[%s4865_s20 + $0xc8] sm:$0xf]  ;;  %v7598_v50 = vld [vmem:[#allocation25_spill] sm:$0xff] }
 0x35f   : > { %v3871_v13 = vor.u32 %v4088_v5, %v3870_v32  ;;  %v7599_v48 = vld [vmem:[#allocation26_spill] sm:$0xff] }
 0x361   : > { %1107 = vmatpush.bf16.msrb.mxu1 %v3895_v55  ;;  %v7597_v55 = vld [vmem:[#allocation76_spill] sm:$0xff] }
 0x362   : > { %1059 = vmatpush.bf16.msrb.mxu0 %v3787_v6  ;;  %v2349_v36 = vmul.f32 %v7597_v55, %v7581_v37  ;;  %v7600_v55 = vld [vmem:[#allocation46_spill] sm:$0xff] }
 0x364   : > { %v2210_v52 = vpop.permute.xlu2 %2209 }
 0x365   : > { %v2234_v16 = vsel %vm1215_vm0, %v2210_v52, %v7571_v22  ;;  %1108 = vmatpush.bf16.msrb.mxu1 %v3883_v60  ;;  %v3775_v52 = vor.u32 %v4064_v56, %v3774_v4 }
 0x366   : > { %v2250_v25 = vmul.f32 %v2234_v16, %v7544_v29  ;;  %v7596_v16 = vld [vmem:[#allocation64_spill] sm:$0xff] }
 0x367   : > { %v2350_v39 = vmul.f32 %v7596_v16, %v7595_v54  ;;  %1060 = vmatpush.bf16.msrb.mxu0 %v3775_v52  ;;  %v1579_v52 = vsel %vm1215_vm0, %v7600_v55, %v7595_v54 }
 0x368   : > { %2289 = vrot.lane.b32.xlu2 %v2250_v25, %s4672_s30 }
 0x369   : > { %v2606_v25 = vadd.f32 %v6134_v31, %v2350_v39  ;;  %1109 = vmatpush.bf16.msrb.mxu1 %v3871_v13  ;;  %v1595_v39 = vmul.f32 %v1579_v52, %v7546_v44  ;;  %v7601_v31 = vld [vmem:[#allocation60_spill] sm:$0xff] }
 0x36a   : > { %1061 = vmatmul.bf16.vlgmr.msrb.gmra.mxu0 %v7598_v50  ;;  %v2351_v32 = vmul.f32 %v7601_v31, %v7572_v7 }
 0x36c   : > { %v6171_v22 = vpop.permute.xlu2 %1640  ;;  %1110 = vmatmul.bf16.vlgmr.msrb.gmra.mxu1 %v7599_v48  ;;  %v2607_v55 = vadd.f32 %v6149_v58, %v2351_v32 }
 0x36e   : > { %v2568_v59 = vpop.permute.xlu1 %2567 }
 0x36f   : > { %v2605_v6 = vadd.f32 %v2568_v59, %v2349_v36  ;;  %v7602_v36 = vld [vmem:[#allocation68_spill] sm:$0xff] }
 0x370   : > { %v2352_v13 = vmul.f32 %v7602_v36, %v5487_v62 }
 0x371   : > { %v2624_v56 = vpack.c.bf16 %v2606_v25, %v2605_v6 }
 0x373   : > { %2669 = vrot.lane.b32.xlu0 %v2624_v56, %s4673_s23  ;;  %v7603_v56 = vld [vmem:[#allocation27_spill] sm:$0xff] }
 0x374   : > { %v2184_v60 = vpop.permute.xlu2 %2183 }
 0x375   : > { %v2185_v4 = vsel %vm1215_vm0, %v2184_v60, %v7573_v27  ;;  %v7604_v60 = vld [vmem:[#allocation113_spill] sm:$0xff] }
 0x376   : > { %2219 = vrot.lane.b32.xlu2 %v2185_v4, %s4673_s23  ;;  %v7605_v4 = vld [vmem:[#allocation119_spill] sm:$0xff] }
 0x377   : > { %v2176_v52 = vsel %vm1215_vm0, %v7605_v4, %v7604_v60  ;;  %v7611_v4 = vld [vmem:[#allocation105_spill] sm:$0xff] }
 0x37a   : > { %1066 = vmatmul.bf16.gmra.mxu0 %v7603_v56 }
 0x37b   : > { %1638 = vrot.lane.b32.xlu0 %v1595_v39, %s4674_s4  ;;  %v7606_v39 = vld [vmem:[#allocation28_spill] sm:$0xff] }
 0x37c   : > { %v1539_v59 = vpop.permute.xlu2 %1538  ;;  %1115 = vmatmul.bf16.gmra.mxu1 %v7606_v39 }
 0x37d   : > { %v1569_v5 = vsel %vm1215_vm0, %v1539_v59, %v7577_v41  ;;  %v7607_v59 = vld [vmem:[#allocation83_spill] sm:$0xff] }
 0x37e   : > { %v1585_v25 = vmul.f32 %v1569_v5, %v5209_v1  ;;  %v2574_v6 = vpop.permute.xlu0 %2573  ;;  %v2342_v31 = vmul.f32 %v7607_v59, %v7579_v33  ;;  %v7608_v1 = vld [vmem:[#allocation75_spill] sm:$0xff] }
 0x37f   : > { %v2608_v50 = vadd.f32 %v2574_v6, %v2352_v13  ;;  %v2341_v58 = vmul.f32 %v7608_v1, %v7574_v38  ;;  %v7609_v6 = vld [vmem:[#allocation63_spill] sm:$0xff] }
 0x380   : > { %1618 = vrot.lane.b32.xlu2 %v1585_v25, %s4674_s4  ;;  %v2598_v32 = vadd.f32 %v6096_v14, %v2342_v31  ;;  %v7612_v31 = vld [vmem:[#allocation29_spill] sm:$0xff] }
 0x381   : > { %v2625_v48 = vpack.c.bf16 %v2608_v50, %v2607_v55  ;;  %v2597_v13 = vadd.f32 %v6073_v53, %v2341_v58  ;;  %v2353_v55 = vmul.f32 %v7609_v6, %v5471_v35  ;;  %v7610_v50 = vld [vmem:[#allocation72_spill] sm:$0xff] }
 0x382   : > { %v2354_v56 = vmul.f32 %v7610_v50, %v5531_v17  ;;  %v6229_v17 = vld [vmem:[%s7437_s24 + $0x60] sm:$0xff]  ;;  %v7654_v50 = vld [vmem:[#allocation82_spill] sm:$0xff] }
 0x383   : > { %2213 = vrot.lane.b32.xlu0 %v2176_v52, %s4673_s23  ;;  %2671 = vrot.lane.b32.xlu1 %v2625_v48, %s4673_s23  ;;  %v2620_v25 = vpack.c.bf16 %v2598_v32, %v2597_v13  ;;  %v2231_v48 = vsel %vm1215_vm0, %v5957_v21, %v7611_v4  ;;  %v7613_v32 = vld [vmem:[#allocation30_spill] sm:$0xff]  ;;  %7614 = vst [vmem:[#allocation95_spill] sm:$0xff] %v6229_v17 }
 0x384   : > { %v2247_v53 = vmul.f32 %v2231_v48, %v7534_v34  ;;  %v1484_v35 = vmul.f32 %v6229_v17, %v7572_v7  ;;  %v6236_v21 = vld [vmem:[%s7437_s24 + $0x68] sm:$0xff]  ;;  %v7655_v17 = vld [vmem:[#allocation81_spill] sm:$0xff] }
 0x385   : > { %7615 = vst [vmem:[#allocation117_spill] sm:$0xff] %v6236_v21 }
 0x386   : > { %v2576_v5 = vpop.permute.xlu0 %2575 }
 0x387   : > { %v2609_v36 = vadd.f32 %v2576_v5, %v2353_v55  ;;  %v7616_v5 = vld [vmem:[#allocation101_spill] sm:$0xff] }
 0x388   : > { %v2230_v13 = vsel %vm1215_vm0, %v5925_v12, %v7616_v5  ;;  %v7622_v5 = vld [vmem:[#allocation32_spill] sm:$0xff] }
 0x389   : > { %v2246_v4 = vmul.f32 %v2230_v13, %v5202_v57  ;;  %v7623_v13 = vld [vmem:[#allocation44_spill] sm:$0xff] }
 0x38a   : > { %1071 = vmatmul.bf16.gmra.mxu0 %v7612_v31  ;;  %v7618_v31 = vld [vmem:[#allocation78_spill] sm:$0xff] }
 0x38b   : > { %2661 = vrot.lane.b32.xlu0 %v2620_v25, %s4673_s23  ;;  %v1575_v25 = vsel %vm1215_vm0, %v5961_v61, %v7588_v40  ;;  %v7619_v61 = vld [vmem:[#allocation91_spill] sm:$0xff] }
 0x38c   : > { %1120 = vmatmul.bf16.gmra.mxu1 %v7613_v32  ;;  %v1591_v48 = vmul.f32 %v1575_v25, %v7544_v29  ;;  %v7620_v32 = vld [vmem:[#allocation31_spill] sm:$0xff]  ;;  %v7624_v25 = vld [vmem:[#allocation88_spill] sm:$0xff] }
 0x38e   : > { %v2578_v52 = vpop.permute.xlu1 %2577  ;;  %v1541_v39 = vpop.permute.xlu0 %1540 }
 0x38f   : > { %v2610_v14 = vadd.f32 %v2578_v52, %v2354_v56  ;;  %v1676_v56 = vadd.f32 %v6171_v22, %v1484_v35  ;;  %v7621_v35 = vld [vmem:[#allocation112_spill] sm:$0xff] }
 0x391   : > { %v2626_v58 = vpack.c.bf16 %v2610_v14, %v2609_v36  ;;  %v1485_v36 = vmul.f32 %v6236_v21, %v5487_v62  ;;  %v7617_v14 = vld [vmem:[#allocation58_spill] sm:$0xff]  ;;  %v2076_v21 = vmul.f32 %v7655_v17, %v7654_v50 }
 0x392   : > { %v2343_v62 = vmul.f32 %v7618_v31, %v7617_v14 }
 0x393   : > { %2283 = vrot.lane.b32.xlu0 %v2247_v53, %s4672_s30  ;;  %2673 = vrot.lane.b32.xlu1 %v2626_v58, %s4673_s23  ;;  %v2344_v53 = vmul.f32 %v7619_v61, %v7594_v20 }
 0x394   : > { %v2599_v22 = vadd.f32 %v6090_v10, %v2343_v62  ;;  %v7626_v10 = vld [vmem:[#allocation79_spill] sm:$0xff] }
 0x395   : > { %v2600_v58 = vadd.f32 %v6109_v18, %v2344_v53  ;;  %v7628_v53 = vld [vmem:[#allocation33_spill] sm:$0xff] }
 0x396   : > { %v1643_v55 = vpop.permute.xlu0 %1642 }
 0x397   : > { %v1677_v7 = vadd.f32 %v1643_v55, %v1485_v36  ;;  %v2621_v29 = vpack.c.bf16 %v2600_v58, %v2599_v22  ;;  %v2182_v36 = vsel %vm1215_vm0, %v5885_v43, %v7621_v35  ;;  %v2068_v55 = vmul.f32 %v7624_v25, %v7623_v13  ;;  %v7629_v22 = vld [vmem:[#allocation34_spill] sm:$0xff] }
 0x399   : > { %v1694_v52 = vpack.c.bf16 %v1677_v7, %v1676_v56  ;;  %v7625_v56 = vld [vmem:[#allocation41_spill] sm:$0xff]  ;;  %v2324_v18 = vadd.f32 %v6076_v9, %v2068_v55  ;;  %v7631_v55 = vld [vmem:[#allocation35_spill] sm:$0xff] }
 0x39a   : > { %1076 = vmatmul.bf16.gmra.mxu0 %v7620_v32  ;;  %v2067_v7 = vmul.f32 %v7626_v10, %v7625_v56 }
 0x39b   : > { %1630 = vrot.lane.b32.xlu0 %v1591_v48, %s4674_s4  ;;  %2281 = vrot.lane.b32.xlu1 %v2246_v4, %s4672_s30  ;;  %v1740_v12 = vsel %vm1696_vm1, %v1694_v52, 0  ;;  %v7627_v4 = vld [vmem:[#allocation120_spill] sm:$0xff] }
 0x39c   : > { %1746 = vmatpush.bf16.xpose.msrb.mxu2 %v1740_v12  ;;  %1125 = vmatmul.bf16.gmra.mxu1 %v7622_v5  ;;  %v1576_v48 = vsel %vm1215_vm0, %v7627_v4, %v7591_v15  ;;  %v2323_v43 = vadd.f32 %v6020_v63, %v2067_v7  ;;  %v1570_v12 = vsel %vm1215_vm0, %v1541_v39, %v7574_v38  ;;  %v7630_v63 = vld [vmem:[#allocation106_spill] sm:$0xff]  ;;  %v7632_v7 = vld [vmem:[#allocation36_spill] sm:$0xff]  ;;  %v1637_v4 = vpop.permute.xlu2 %1636 }
 0x39d   : > { %v1592_v52 = vmul.f32 %v1576_v48, %v7541_v46  ;;  %v1586_v9 = vmul.f32 %v1570_v12, %v5240_v24  ;;  %v2232_v58 = vsel %vm1215_vm0, %v5905_v51, %v7630_v63  ;;  %v2339_v24 = vmul.f32 %v7626_v10, %v7582_v47  ;;  %v1543_v48 = vpop.permute.xlu1 %1542 }
 0x39e   : > { %v2611_v62 = vpack.c.bf16 %v2324_v18, %v2323_v43  ;;  %v2187_v32 = vpop.permute.xlu0 %2186  ;;  %v1572_v10 = vsel %vm1215_vm0, %v5973_v11, %v7617_v14  ;;  %v7634_v43 = vld [vmem:[#allocation38_spill] sm:$0xff] }
 0x39f   : > { %v2188_v39 = vsel %vm1215_vm0, %v2187_v32, %v7584_v45  ;;  %v2595_v5 = vadd.f32 %v6029_v8, %v2339_v24  ;;  %v1588_v18 = vmul.f32 %v1572_v10, %v7534_v34  ;;  %v2233_v8 = vsel %vm1215_vm0, %v6082_v28, %v7560_v2  ;;  %v7635_v28 = vld [vmem:[#allocation39_spill] sm:$0xff] }
 0x3a0   : > { %v1571_v34 = vsel %vm1215_vm0, %v1543_v48, %v7579_v33  ;;  %v6335_v32 = vld [vmem:[%s7437_s24 + $0x50] sm:$0xff] }
 0x3a1   : > { %v1587_v11 = vmul.f32 %v1571_v34, %v5202_v57  ;;  %7637 = vst [vmem:[#allocation50_spill] sm:$0xff] %v6335_v32 }
 0x3a3   : > { %2217 = vrot.lane.b32.xlu0 %v2182_v36, %s4673_s23  ;;  %2663 = vrot.lane.b32.xlu1 %v2621_v29, %s4673_s23  ;;  %v2248_v29 = vmul.f32 %v2232_v58, %v5265_v42  ;;  %v2340_v36 = vmul.f32 %v7624_v25, %v7577_v41  ;;  %v2249_v25 = vmul.f32 %v2233_v8, %v7536_v19 }
 0x3a5   : > { %v2596_v51 = vadd.f32 %v6044_v0, %v2340_v36  ;;  %v7633_v0 = vld [vmem:[#allocation37_spill] sm:$0xff]  ;;  %v1537_v12 = vpop.permute.xlu1 %1536 }
 0x3a6   : > { %v1568_v19 = vsel %vm1215_vm0, %v1537_v12, %v7582_v47 }
 0x3a7   : > { %v2619_v42 = vpack.c.bf16 %v2596_v51, %v2595_v5 }
 0x3aa   : > { %1081 = vmatmul.bf16.gmra.mxu0 %v7628_v53  ;;  %v1584_v53 = vmul.f32 %v1568_v19, %v5194_v49  ;;  %v1482_v49 = vmul.f32 %v6335_v32, %v7581_v37 }
 0x3ab   : > { %1632 = vrot.lane.b32.xlu1 %v1592_v52, %s4674_s4  ;;  %2635 = vrot.lane.b32.xlu0 %v2611_v62, %s4673_s23  ;;  %v2280_v52 = vpop.permute.xlu0 %2279  ;;  %v2212_v62 = vpop.permute.xlu2 %2211 }
 0x3ac   : > { %1130 = vmatmul.bf16.gmra.mxu1 %v7629_v22  ;;  %v2235_v63 = vsel %vm1215_vm0, %v2212_v62, %v7585_v23  ;;  %v1674_v5 = vadd.f32 %v1637_v4, %v1482_v49  ;;  %v7639_v49 = vld [vmem:[#allocation48_spill] sm:$0xff] }
 0x3ad   : > { %v2251_v58 = vmul.f32 %v2235_v63, %v7541_v46 }
 0x3b3   : > { %2189 = vrot.lane.b32.xlu1 %v5953_v3, %s4673_s23  ;;  %1620 = vrot.lane.b32.xlu0 %v1586_v9, %s4674_s4  ;;  %v7636_v9 = vld [vmem:[#allocation40_spill] sm:$0xff]  ;;  %v6326_v22 = vpop.permute.xlu2 %1634 }
 0x3ba   : > { %1086 = vmatmul.bf16.gmra.mxu0 %v7631_v55 }
 0x3bb   : > { %2285 = vrot.lane.b32.xlu1 %v2248_v29, %s4672_s30  ;;  %2221 = vrot.lane.b32.xlu0 %v2188_v39, %s4673_s23  ;;  %v6342_v29 = vld [vmem:[%s7437_s24 + $0x58] sm:$0xff]  ;;  %v4432_v39 = vld [vmem:[%s5192_s29] sm:$0x7] }
 0x3bc   : > { %1135 = vmatmul.bf16.gmra.mxu1 %v7632_v7  ;;  %7638 = vst [vmem:[#allocation98_spill] sm:$0xff] %v6342_v29  ;;  %v1483_v23 = vmul.f32 %v6342_v29, %v7595_v54  ;;  %v6347_v46 = vperm.slane %v4432_v39, 2  ;;  %v6356_v54 = vpop.permute.xlu1 %2665  ;;  %v7640_v39 = vld [vmem:[#allocation55_spill] sm:$0xff]  ;;  %v7657_v29 = vld [vmem:[#allocation74_spill] sm:$0xff] }
 0x3bd   : > { %v6318_v2 = vpop.permute.xlu0 %2667 }
 0x3c3   : > { %2659 = vrot.lane.b32.xlu1 %v2619_v42, %s4673_s23  ;;  %v2193_v42 = vpop.permute.xlu2 %2192 }
 0x3ca   : > { %1091 = vmatmul.bf16.gmra.mxu0 %v7633_v0 }
 0x3cb   : > { %1624 = vrot.lane.b32.xlu1 %v1588_v18, %s4674_s4  ;;  %v2194_v18 = vsel %vm1215_vm0, %v2193_v42, %v5935_v30 }
 0x3cc   : > { %1140 = vmatmul.bf16.gmra.mxu1 %v7634_v43 }
 0x3d3   : > { %2287 = vrot.lane.b32.xlu1 %v2249_v25, %s4672_s30 }
 0x3da   : > { %1096 = vmatmul.bf16.gmra.mxu0 %v7635_v28 }
 0x3db   : > { %1622 = vrot.lane.b32.xlu1 %v1587_v11, %s4674_s4 }
 0x3dc   : > { %1145 = vmatmul.bf16.gmra.mxu1 %v7636_v9 }
 0x3e3   : > { %1616 = vrot.lane.b32.xlu1 %v1584_v53, %s4674_s4 }
 0x3e5   : > { %v2670_v57 = vpop.permute.xlu0 %2669 }
 0x3e7   : > { %v1062_v36 = vpop.f32.mrf.mxu0 }
 0x3e8   : > { %v1063_v55 = vadd.f32 %v1062_v36, %v6347_v46 }
 0x3e9   : > { %v1111_v7 = vpop.f32.mrf.mxu1 }
 0x3ea   : > { %v6350_v10 = vadd.f32 %v1111_v7, %v1063_v55 }
 0x3eb   : > { %2291 = vrot.lane.b32.xlu1 %v2251_v58, %s4672_s30  ;;  %v1629_v58 = vpop.permute.xlu2 %1628 }
 0x3ed   : > { %v1639_v24 = vpop.permute.xlu0 %1638 }
 0x3ee   : > { %v1675_v51 = vadd.f32 %v1639_v24, %v1483_v23  ;;  %v2069_v23 = vmul.f32 %v7608_v1, %v7639_v49  ;;  %v2070_v24 = vmul.f32 %v7607_v59, %v7640_v39  ;;  %v2715_v59 = vsel %vm1696_vm1, %v2670_v57, 0 }
 0x3ef   : > { %v6360_v4 = vpop.f32.mrf.mxu0 }
 0x3f0   : > { %v1693_v37 = vpack.c.bf16 %v1675_v51, %v1674_v5  ;;  %v2325_v51 = vadd.f32 %v2280_v52, %v2069_v23 }
 0x3f1   : > { %v6363_v43 = vpop.f32.mrf.mxu1 }
 0x3f2   : > { %v1737_v8 = vsel %vm1696_vm1, %v1693_v37, 0 }
 0x3f3   : > { %2225 = vrot.lane.b32.xlu1 %v2194_v18, %s4673_s23  ;;  %1747 = vmatpush.bf16.xpose.msrb.mxu2 %v1737_v8  ;;  %v2216_v1 = vpop.permute.xlu2 %2215 }
 0x3f5   : > { %v2214_v0 = vpop.permute.xlu0 %2213  ;;  %v2672_v34 = vpop.permute.xlu1 %2671 }
 0x3f6   : > { %v2236_v25 = vsel %vm1215_vm0, %v2214_v0, %v7604_v60  ;;  %v2718_v55 = vsel %vm1696_vm1, %v2672_v34, 0 }
 0x3f7   : > { %v2252_v48 = vmul.f32 %v2236_v25, %v7545_v26  ;;  %v1067_v62 = vpop.f32.mrf.mxu0 }
 0x3f8   : > { %v1068_v12 = vadd.f32 %v1067_v62, %v6347_v46 }
 0x3f9   : > { %2293 = vrot.lane.b32.xlu2 %v2252_v48, %s4672_s30  ;;  %v1116_v19 = vpop.f32.mrf.mxu1 }
 0x3fa   : > { %v6369_v28 = vadd.f32 %v1116_v19, %v1068_v12  ;;  %v6399_v19 = vld [vmem:[%s7437_s24 + $0x48] sm:$0xff] }
 0x3fd   : > { %v6366_v11 = vpop.permute.xlu0 %2661 }
 0x3ff   : > { %v6374_v63 = vpop.f32.mrf.mxu0 }
 0x401   : > { %v6376_v26 = vpop.f32.mrf.mxu1 }
 0x405   : > { %v2674_v53 = vpop.permute.xlu1 %2673  ;;  %v6371_v9 = vpop.permute.xlu0 %2283 }
 0x406   : > { %v2721_v60 = vsel %vm1696_vm1, %v2674_v53, 0  ;;  %v7641_v53 = vld [vmem:[#allocation84_spill] sm:$0xff] }
 0x407   : > { %2723 = vmatpush.bf16.xpose.msra.mxu0 %v2721_v60  ;;  %v1072_v7 = vpop.f32.mrf.mxu0  ;;  %v1481_v57 = vmul.f32 %v6399_v19, %v7641_v53 }
 0x408   : > { %v1073_v37 = vadd.f32 %v1072_v7, %v6347_v46 }
 0x409   : > { %v1121_v18 = vpop.f32.mrf.mxu1 }
 0x40a   : > { %v6384_v0 = vadd.f32 %v1121_v18, %v1073_v37  ;;  %v6419_v18 = vld [vmem:[%s7437_s24 + $0x38] sm:$0xff] }
 0x40d   : > { %v2282_v36 = vpop.permute.xlu1 %2281  ;;  %v1631_v5 = vpop.permute.xlu0 %1630 }
 0x40e   : > { %v2326_v42 = vadd.f32 %v2282_v36, %v2070_v24  ;;  %v1673_v24 = vadd.f32 %v6326_v22, %v1481_v57  ;;  %v2712_v36 = vsel %vm1696_vm1, %v6318_v2, 0  ;;  %v6428_v2 = vld [vmem:[%s7437_s24 + $0x30] sm:$0xff] }
 0x40f   : > { %2724 = vmatpush.bf16.xpose.msra.mxu0 %v2718_v55  ;;  %v6390_v34 = vpop.f32.mrf.mxu0 }
 0x410   : > { %v2612_v8 = vpack.c.bf16 %v2326_v42, %v2325_v51  ;;  %v1627_v42 = vpop.permute.xlu2 %1626 }
 0x411   : > { %v6393_v12 = vpop.f32.mrf.mxu1 }
 0x412   : > { %2637 = vrot.lane.b32.xlu0 %v2612_v8, %s4673_s23 }
 0x415   : > { %v2664_v25 = vpop.permute.xlu1 %2663  ;;  %v2218_v48 = vpop.permute.xlu0 %2217 }
 0x416   : > { %v2238_v52 = vsel %vm1215_vm0, %v2218_v48, %v7621_v35  ;;  %v6406_v35 = vld [vmem:[%s7437_s24 + $0x40] sm:$0xff] }
 0x417   : > { %v2254_v62 = vmul.f32 %v2238_v52, %v7546_v44  ;;  %2725 = vmatpush.bf16.xpose.msra.mxu0 %v2715_v59  ;;  %v1480_v44 = vmul.f32 %v6406_v35, %v7591_v15  ;;  %v1077_v55 = vpop.f32.mrf.mxu0  ;;  %v1479_v15 = vmul.f32 %v6419_v18, %v7588_v40  ;;  %v7642_v48 = vld [vmem:[#allocation65_spill] sm:$0xff]  ;;  %v2709_v40 = vsel %vm1696_vm1, %v6356_v54, 0 }
 0x418   : > { %v1078_v7 = vadd.f32 %v1077_v55, %v6347_v46  ;;  %v1478_v59 = vmul.f32 %v6428_v2, %v7642_v48  ;;  %v7643_v55 = vld [vmem:[#allocation115_spill] sm:$0xff]  ;;  %v7646_v48 = vld [vmem:[#allocation54_spill] sm:$0xff] }
 0x419   : > { %2297 = vrot.lane.b32.xlu1 %v2254_v62, %s4672_s30  ;;  %v1126_v37 = vpop.f32.mrf.mxu1  ;;  %v1671_v52 = vadd.f32 %v1631_v5, %v1479_v15  ;;  %v7645_v15 = vld [vmem:[#allocation62_spill] sm:$0xff] }
 0x41a   : > { %v6423_v22 = vadd.f32 %v1126_v37, %v1078_v7  ;;  %v1670_v53 = vadd.f32 %v1629_v58, %v1478_v59  ;;  %v2237_v58 = vsel %vm1215_vm0, %v2216_v1, %v7643_v55  ;;  %v7644_v37 = vld [vmem:[#allocation53_spill] sm:$0xff]  ;;  %v7647_v55 = vld [vmem:[#allocation59_spill] sm:$0xff] }
 0x41b   : > { %v2071_v54 = vmul.f32 %v7618_v31, %v7644_v37  ;;  %v2253_v59 = vmul.f32 %v2237_v58, %v7646_v48  ;;  %v2703_v48 = vsel %vm1696_vm1, %v6366_v11, 0 }
 0x41d   : > { %v1633_v60 = vpop.permute.xlu1 %1632  ;;  %v6410_v23 = vpop.permute.xlu0 %2635 }
 0x41e   : > { %v1672_v51 = vadd.f32 %v1633_v60, %v1480_v44 }
 0x41f   : > { %2726 = vmatpush.bf16.xpose.msra.mxu0 %v2712_v36  ;;  %v6439_v36 = vpop.f32.mrf.mxu0 }
 0x420   : > { %v1692_v8 = vpack.c.bf16 %v1673_v24, %v1672_v51  ;;  %v1691_v24 = vpack.c.bf16 %v1671_v52, %v1670_v53  ;;  %v2290_v51 = vpop.permute.xlu2 %2289  ;;  %v2327_v53 = vadd.f32 %v6371_v9, %v2071_v54 }
 0x421   : > { %v6442_v5 = vpop.f32.mrf.mxu1 }
 0x422   : > { %v1734_v62 = vsel %vm1696_vm1, %v1692_v8, 0  ;;  %v1731_v7 = vsel %vm1696_vm1, %v1691_v24, 0  ;;  %v2072_v8 = vmul.f32 %v7619_v61, %v7645_v15 }
 0x423   : > { %1748 = vmatpush.bf16.xpose.msrb.mxu2 %v1734_v62 }
 0x425   : > { %v2190_v57 = vpop.permute.xlu1 %2189  ;;  %v6433_v44 = vpop.permute.xlu0 %1620 }
 0x426   : > { %v2191_v60 = vsel %vm1215_vm0, %v2190_v57, %v5953_v3  ;;  %v2706_v57 = vsel %vm1696_vm1, %v2664_v25, 0 }
 0x427   : > { %2727 = vmatpush.bf16.xpose.msra.mxu0 %v2709_v40  ;;  %2223 = vrot.lane.b32.xlu0 %v2191_v60, %s4673_s23  ;;  %v1082_v60 = vpop.f32.mrf.mxu0 }
 0x428   : > { %v2220_v24 = vpop.permute.xlu2 %2219  ;;  %v1083_v31 = vadd.f32 %v1082_v60, %v6347_v46 }
 0x429   : > { %v1131_v61 = vpop.f32.mrf.mxu1  ;;  %v2239_v25 = vsel %vm1215_vm0, %v2220_v24, %v7573_v27 }
 0x42a   : > { %v6460_v9 = vadd.f32 %v1131_v61, %v1083_v31  ;;  %v7649_v31 = vld [vmem:[#allocation70_spill] sm:$0xff]  ;;  %v7650_v61 = vld [vmem:[#allocation71_spill] sm:$0xff] }
 0x42b   : > { %1749 = vmatpush.bf16.xpose.msrb.mxu2 %v1731_v7 }
 0x42d   : > { %v2286_v52 = vpop.permute.xlu1 %2285  ;;  %v2222_v62 = vpop.permute.xlu0 %2221 }
 0x42e   : > { %v2328_v40 = vadd.f32 %v2286_v52, %v2072_v8  ;;  %v2240_v1 = vsel %vm1215_vm0, %v2222_v62, %v7584_v45  ;;  %v7648_v45 = vld [vmem:[#allocation51_spill] sm:$0xff]  ;;  %v6476_v62 = vld [vmem:[%s7437_s24 + $0x28] sm:$0xff] }
 0x42f   : > { %v2256_v7 = vmul.f32 %v2240_v1, %v7647_v55  ;;  %2728 = vmatpush.bf16.xpose.msra.mxu0 %v2706_v57  ;;  %2295 = vrot.lane.b32.xlu0 %v2253_v59, %s4672_s30  ;;  %v2255_v54 = vmul.f32 %v2239_v25, %v7648_v45  ;;  %v6468_v59 = vpop.f32.mrf.mxu0  ;;  %v1477_v27 = vmul.f32 %v6476_v62, %v7594_v20  ;;  %v7651_v25 = vld [vmem:[#allocation69_spill] sm:$0xff]  ;;  %v7652_v45 = vld [vmem:[#allocation86_spill] sm:$0xff] }
 0x430   : > { %v2613_v58 = vpack.c.bf16 %v2328_v40, %v2327_v53  ;;  %v6483_v53 = vld [vmem:[%s7437_s24 + $0x20] sm:$0xff] }
 0x431   : > { %2301 = vrot.lane.b32.xlu1 %v2256_v7, %s4672_s30  ;;  %v6471_v52 = vpop.f32.mrf.mxu1  ;;  %v1476_v11 = vmul.f32 %v6483_v53, %v7617_v14  ;;  %v1669_v40 = vadd.f32 %v1627_v42, %v1477_v27  ;;  %v2073_v14 = vmul.f32 %v7652_v45, %v7651_v25 }
 0x432   : > { %2639 = vrot.lane.b32.xlu2 %v2613_v58, %s4673_s23  ;;  %v2074_v58 = vmul.f32 %v7650_v61, %v7649_v31 }
 0x434   : > { %v2330_v42 = vadd.f32 %v2290_v51, %v2074_v58  ;;  %v4440_v51 = vld [vmem:[%s7437_s24 + $0x18] sm:$0xff] }
 0x435   : > { %v2660_v8 = vpop.permute.xlu1 %2659 }
 0x436   : > { %v2700_v1 = vsel %vm1696_vm1, %v2660_v8, 0 }
 0x437   : > { %2729 = vmatpush.bf16.xpose.msra.mxu0 %v2703_v48  ;;  %2299 = vrot.lane.b32.xlu0 %v2255_v54, %s4672_s30  ;;  %v6488_v24 = vpop.f32.mrf.mxu0 }
 0x439   : > { %v6490_v55 = vpop.f32.mrf.mxu1 }
 0x43d   : > { %v1625_v57 = vpop.permute.xlu1 %1624 }
 0x43e   : > { %v1668_v60 = vadd.f32 %v1625_v57, %v1476_v11  ;;  %v4439_v57 = vld [vmem:[%s7437_s24 + $0x10] sm:$0xff] }
 0x43f   : > { %2730 = vmatpush.bf16.xpose.msra.mxu0 %v2700_v1  ;;  %v1089_v8 = vpop.f32.mrf.mxu0  ;;  %v1475_v1 = vmul.f32 %v4440_v51, %v7579_v33  ;;  %v4442_v33 = vld [vmem:[%s7437_s24] sm:$0xff] }
 0x440   : > { %v1690_v7 = vpack.c.bf16 %v1669_v40, %v1668_v60  ;;  %v1474_v40 = vmul.f32 %v4439_v57, %v7574_v38  ;;  %v4441_v38 = vld [vmem:[%s7437_s24 + $0x8] sm:$0xff] }
 0x441   : > { %v6499_v27 = vpop.f32.mrf.mxu1 }
 0x442   : > { %v1728_v20 = vsel %vm1696_vm1, %v1690_v7, 0 }
 0x443   : > { %1750 = vmatpush.bf16.xpose.msrb.mxu2 %v1728_v20 }
 0x445   : > { %v2288_v54 = vpop.permute.xlu1 %2287 }
 0x446   : > { %v2329_v48 = vadd.f32 %v2288_v54, %v2073_v14  ;;  %3964 = vmatmul.msk.bf16.vlgmr.msra.gmra.mxu0 %vm1696_vm1, %v6410_v23  ;;  %v1666_v23 = vadd.f32 %v6433_v44, %v1474_v40  ;;  %v1619_v14 = vpop.permute.xlu2 %1618  ;;  %v1473_v54 = vmul.f32 %v4441_v38, %v7577_v41  ;;  %v1472_v44 = vmul.f32 %v4442_v33, %v7582_v47  ;;  %v7656_v47 = vld [vmem:[#allocation77_spill] sm:$0xff] }
 0x447   : > { %v1092_v20 = vpop.f32.mrf.mxu0  ;;  %v1199_v41 = vmul.f32 %v4442_v33, %v7625_v56 }
 0x448   : > { %v2614_v11 = vpack.c.bf16 %v2330_v42, %v2329_v48  ;;  %v1665_v48 = vadd.f32 %v1619_v14, %v1473_v54  ;;  %v2075_v14 = vmul.f32 %v7657_v29, %v7656_v47  ;;  %v1093_v17 = vadd.f32 %v1092_v20, %v6347_v46 }
 0x449   : > { %v1141_v61 = vpop.f32.mrf.mxu1  ;;  %v1088_v20 = vadd.f32 %v6488_v24, %v6347_v46 }
 0x44a   : > { %2641 = vrot.lane.b32.xlu2 %v2614_v11, %s4673_s23 }
 0x44d   : > { %v1623_v60 = vpop.permute.xlu1 %1622 }
 0x44e   : > { %v1667_v7 = vadd.f32 %v1623_v60, %v1475_v1 }
 0x44f   : > { %v1094_v40 = vpop.f32.mrf.mxu0 }
 0x450   : > { %v1689_v58 = vpack.c.bf16 %v1667_v7, %v1666_v23  ;;  %v1200_v23 = vmul.f32 %v4441_v38, %v7623_v13  ;;  %v1095_v29 = vadd.f32 %v1094_v40, %v6347_v46  ;;  %v1090_v40 = vadd.f32 %v1089_v8, %v6347_v46 }
 0x451   : > { %v1143_v1 = vpop.f32.mrf.mxu1 }
 0x452   : > { %v1725_v45 = vsel %vm1696_vm1, %v1689_v58, 0  ;;  %v1139_v24 = vadd.f32 %v6499_v27, %v1090_v40 }
 0x453   : > { %1751 = vmatpush.bf16.xpose.msrb.mxu2 %v1725_v45  ;;  %v2294_v58 = vpop.permute.xlu2 %2293  ;;  %v7653_v45 = vld [vmem:[#allocation100_spill] sm:$0xff] }
 0x454   : > { %v1457_v6 = vadd.f32 %v7653_v45, %v1200_v23 }
 0x455   : > { %v1617_v42 = vpop.permute.xlu1 %1616 }
 0x456   : > { %v1664_v11 = vadd.f32 %v1617_v42, %v1472_v44  ;;  %v7658_v44 = vld [vmem:[#allocation43_spill] sm:$0xff] }
 0x457   : > { %v1456_v42 = vadd.f32 %v7658_v44, %v1199_v41  ;;  %v1097_v13 = vpop.f32.mrf.mxu0  ;;  %v1202_v44 = vmul.f32 %v4440_v51, %v7640_v39  ;;  %v1137_v51 = vadd.f32 %v6490_v55, %v1088_v20 }
 0x458   : > { %v1688_v60 = vpack.c.bf16 %v1665_v48, %v1664_v11  ;;  %v2332_v48 = vadd.f32 %v2294_v58, %v2076_v21  ;;  %v1098_v56 = vadd.f32 %v1097_v13, %v6347_v46  ;;  %v1085_v13 = vadd.f32 %v6468_v59, %v6347_v46 }
 0x459   : > { %v1146_v38 = vpop.f32.mrf.mxu1  ;;  %v6560_v59 = vpack.c.bf16 %v1139_v24, %v1137_v51 }
 0x45a   : > { %v1722_v7 = vsel %vm1696_vm1, %v1688_v60, 0  ;;  %v1680_v60 = vpack.c.bf16 %v1457_v6, %v1456_v42  ;;  %v1147_v41 = vadd.f32 %v1146_v38, %v1098_v56  ;;  %v1201_v42 = vmul.f32 %v4439_v57, %v7639_v49 }
 0x45b   : > { %1752 = vmatpush.bf16.xpose.msrb.mxu2 %v1722_v7  ;;  %v7659_v7 = vld [vmem:[#allocation56_spill] sm:$0xff]  ;;  %v1134_v38 = vadd.f32 %v6471_v52, %v1085_v13  ;;  %v1080_v49 = vadd.f32 %v6439_v36, %v6347_v46  ;;  %v1075_v57 = vadd.f32 %v6390_v34, %v6347_v46  ;;  %v1203_v36 = vmul.f32 %v6483_v53, %v7644_v37 }
 0x45c   : > { %v1204_v34 = vmul.f32 %v6476_v62, %v7645_v15  ;;  %v1065_v37 = vadd.f32 %v6360_v4, %v6347_v46  ;;  %v1205_v4 = vmul.f32 %v6428_v2, %v7651_v25  ;;  %v1207_v2 = vmul.f32 %v6406_v35, %v7656_v47  ;;  %v7667_v25 = vld [vmem:[#allocation116_spill] sm:$0xff] }
 0x45d   : > { %v2292_v54 = vpop.permute.xlu1 %2291  ;;  %v6566_v55 = vpack.c.bf16 %v1134_v38, %v6460_v9  ;;  %v1129_v27 = vadd.f32 %v6442_v5, %v1080_v49  ;;  %v1124_v52 = vadd.f32 %v6393_v12, %v1075_v57  ;;  %v7662_v9 = vld [vmem:[#allocation109_spill] sm:$0xff]  ;;  %v7663_v5 = vld [vmem:[#allocation107_spill] sm:$0xff]  ;;  %v7673_v13 = vld [vmem:[#allocation68_spill] sm:$0xff] }
 0x45e   : > { %v2331_v11 = vadd.f32 %v2292_v54, %v2075_v14  ;;  %v1144_v14 = vadd.f32 %v1143_v1, %v1095_v29  ;;  %v7661_v1 = vld [vmem:[#allocation108_spill] sm:$0xff] }
 0x45f   : > { %v1099_v21 = vpop.f32.mrf.mxu0  ;;  %v1458_v39 = vadd.f32 %v7661_v1, %v1201_v42  ;;  %v6576_v56 = vpack.c.bf16 %v1129_v27, %v6423_v22  ;;  %v6583_v12 = vpack.c.bf16 %v1124_v52, %v6384_v0  ;;  %v1114_v22 = vadd.f32 %v6363_v43, %v1065_v37  ;;  %v7664_v43 = vld [vmem:[#allocation47_spill] sm:$0xff]  ;;  %v7677_v27 = vld [vmem:[#allocation98_spill] sm:$0xff] }
 0x460   : > { %v2615_v32 = vpack.c.bf16 %v2332_v48, %v2331_v11  ;;  %v1100_v6 = vadd.f32 %v1099_v21, %v6347_v46  ;;  %v7660_v48 = vld [vmem:[#allocation96_spill] sm:$0xff] }
 0x461   : > { %v1148_v45 = vpop.f32.mrf.mxu1  ;;  %v1459_v11 = vadd.f32 %v7660_v48, %v1202_v44  ;;  %v6598_v0 = vpack.c.bf16 %v1114_v22, %v6350_v10  ;;  %v7682_v22 = vld [vmem:[#allocation121_spill] sm:$0xff] }
 0x462   : > { %2643 = vrot.lane.b32.xlu2 %v2615_v32, %s4673_s23  ;;  %3956 = vmatmul.msk.bf16.vlgmr.msrb.gmra.mxu2 %vm1696_vm1, %v1680_v60  ;;  %v1142_v32 = vadd.f32 %v1141_v61, %v1093_v17  ;;  %v1149_v54 = vadd.f32 %v1148_v45, %v1100_v6  ;;  %v1070_v60 = vadd.f32 %v6374_v63, %v6347_v46  ;;  %v7668_v6 = vld [vmem:[#allocation57_spill] sm:$0xff] }
 0x463   : > { %v1681_v8 = vpack.c.bf16 %v1459_v11, %v1458_v39  ;;  %v1461_v17 = vadd.f32 %v7663_v5, %v1204_v34  ;;  %v1206_v46 = vmul.f32 %v6419_v18, %v7649_v31  ;;  %v7666_v31 = vld [vmem:[#allocation67_spill] sm:$0xff]  ;;  %v1464_v45 = vadd.f32 %v7668_v6, %v1207_v2  ;;  %v7672_v11 = vld [vmem:[#allocation97_spill] sm:$0xff]  ;;  %v7674_v39 = vld [vmem:[#allocation94_spill] sm:$0xff] }
 0x464   : > { %v6550_v61 = vpack.c.bf16 %v1144_v14, %v1142_v32  ;;  %v1119_v63 = vadd.f32 %v6376_v26, %v1070_v60  ;;  %v2080_v1 = vmul.f32 %v7673_v13, %v7672_v11  ;;  %v1185_v6 = vld [vmem:[#allocation8 + $0x10] sm:$0xff] }
 0x465   : > { %v2226_v33 = vpop.permute.xlu1 %2225  ;;  %v1463_v26 = vadd.f32 %v7664_v43, %v1206_v46  ;;  %v7683_v46 = vld [vmem:[#allocation110_spill] sm:$0xff] }
 0x466   : > { %v2242_v23 = vsel %vm1215_vm0, %v2226_v33, %v5935_v30  ;;  %v6543_v30 = vpack.c.bf16 %v1149_v54, %v1147_v41  ;;  %v1460_v33 = vadd.f32 %v7662_v9, %v1203_v36  ;;  %v6593_v15 = vpack.c.bf16 %v1119_v63, %v6369_v28  ;;  %v7665_v28 = vld [vmem:[#allocation49_spill] sm:$0xff]  ;;  %v7669_v54 = vld [vmem:[#allocation90_spill] sm:$0xff]  ;;  %v7681_v63 = vld [vmem:[#allocation95_spill] sm:$0xff] }
 0x467   : > { %v2258_v58 = vmul.f32 %v2242_v23, %v7659_v7  ;;  %v1462_v29 = vadd.f32 %v7665_v28, %v1205_v4  ;;  %v1208_v7 = vmul.f32 %v6399_v19, %v7654_v50  ;;  %v2078_v44 = vmul.f32 %v7596_v16, %v7669_v54  ;;  %v7670_v50 = vld [vmem:[#allocation89_spill] sm:$0xff]  ;;  %v7671_v19 = vld [vmem:[#allocation76_spill] sm:$0xff]  ;;  %v7678_v36 = vld [vmem:[#allocation118_spill] sm:$0xff] }
 0x468   : > { %1922 = vmatpush.bf16.msrb.mxu3 %v6543_v30  ;;  %v1682_v53 = vpack.c.bf16 %v1461_v17, %v1460_v33  ;;  %v2077_v20 = vmul.f32 %v7671_v19, %v7670_v50  ;;  %v7675_v16 = vld [vmem:[#allocation60_spill] sm:$0xff]  ;;  %v1210_v52 = vmul.f32 %v7677_v27, %v7669_v54  ;;  %v7679_v9 = vld [vmem:[#allocation61_spill] sm:$0xff]  ;;  %v7684_v43 = vld [vmem:[#allocation102_spill] sm:$0xff] }
 0x469   : > { %2305 = vrot.lane.b32.xlu1 %v2258_v58, %s4672_s30  ;;  %v1683_v23 = vpack.c.bf16 %v1463_v26, %v1462_v29  ;;  %v1465_v41 = vadd.f32 %v7667_v25, %v1208_v7  ;;  %v2079_v51 = vmul.f32 %v7675_v16, %v7674_v39  ;;  %v7680_v17 = vld [vmem:[#allocation117_spill] sm:$0xff]  ;;  %v4444_v28 = vld [vmem:[%s7437_s24 + $0x70] sm:$0xff] }
 0x46a   : > { %v1467_v33 = vadd.f32 %v7679_v9, %v1210_v52  ;;  %v1212_v37 = vmul.f32 %v7680_v17, %v7672_v11  ;;  %v7685_v29 = vld [vmem:[#allocation99_spill] sm:$0xff] }
 0x46b   : > { %v1684_v14 = vpack.c.bf16 %v1465_v41, %v1464_v45  ;;  %v7689_v11 = vld [vmem:[#allocation63_spill] sm:$0xff] }
 0x46c   : > { %1923 = vmatpush.bf16.msrb.mxu3 %v6550_v61  ;;  %v2081_v13 = vmul.f32 %v7689_v11, %v7685_v29 }
 0x470   : > { %1924 = vmatpush.bf16.msrb.mxu3 %v6560_v59 }
 0x472   : > { %3957 = vmatmul.msk.bf16.gmra.mxu2 %vm1696_vm1, %v1681_v8  ;;  %v7676_v8 = vld [vmem:[#allocation50_spill] sm:$0xff] }
 0x473   : > { %v1209_v38 = vmul.f32 %v7676_v8, %v7670_v50  ;;  %v1186_v50 = vld [vmem:[#allocation8 + $0x18] sm:$0xff] }
 0x474   : > { %1925 = vmatpush.bf16.msrb.mxu3 %v6566_v55 }
 0x475   : > { %v1466_v60 = vadd.f32 %v7678_v36, %v1209_v38  ;;  %v1189_v38 = vld [vmem:[#allocation8 + $0x30] sm:$0xff] }
 0x477   : > { %v1685_v5 = vpack.c.bf16 %v1467_v33, %v1466_v60 }
 0x478   : > { %1926 = vmatpush.bf16.msrb.mxu3 %v6576_v56 }
 0x47c   : > { %1927 = vmatpush.bf16.msrb.mxu3 %v6583_v12 }
 0x480   : > { %1928 = vmatpush.bf16.msrb.mxu3 %v6593_v15 }
 0x482   : > { %3958 = vmatmul.msk.bf16.gmra.mxu2 %vm1696_vm1, %v1682_v53  ;;  %v1211_v53 = vmul.f32 %v7681_v63, %v7674_v39  ;;  %v1190_v63 = vld [vmem:[#allocation8 + $0x38] sm:$0xff] }
 0x484   : > { %v2638_v62 = vpop.permute.xlu0 %2637  ;;  %1929 = vmatpush.bf16.msrb.mxu3 %v6598_v0  ;;  %v1468_v4 = vadd.f32 %v7683_v46, %v1211_v53 }
 0x485   : > { %3965 = vmatmul.msk.bf16.gmra.mxu0 %vm1696_vm1, %v2638_v62  ;;  %v1469_v62 = vadd.f32 %v7682_v22, %v1212_v37 }
 0x48b   : > { %v2298_v32 = vpop.permute.xlu1 %2297 }
 0x48c   : > { %v2640_v21 = vpop.permute.xlu2 %2639  ;;  %v2334_v40 = vadd.f32 %v2298_v32, %v2078_v44 }
 0x492   : > { %3959 = vmatmul.msk.bf16.gmra.mxu2 %vm1696_vm1, %v1683_v23  ;;  %v1213_v23 = vmul.f32 %v4444_v28, %v7685_v29  ;;  %v1193_v28 = vld [vmem:[#allocation8 + $0x50] sm:$0xff]  ;;  %v1183_v29 = vld [vmem:[#allocation8] sm:$0xff] }
 0x495   : > { %3966 = vmatmul.msk.bf16.gmra.mxu0 %vm1696_vm1, %v2640_v21  ;;  %v7686_v21 = vld [vmem:[#allocation103_spill] sm:$0xff] }
 0x499   : > { %v2224_v10 = vpop.permute.xlu0 %2223 }
 0x49a   : > { %v2241_v18 = vsel %vm1215_vm0, %v2224_v10, %v5953_v3  ;;  %v7687_v10 = vld [vmem:[#allocation122_spill] sm:$0xff] }
 0x49b   : > { %v2257_v58 = vmul.f32 %v2241_v18, %v7666_v31  ;;  %v1470_v7 = vadd.f32 %v7687_v10, %v1213_v23  ;;  %v1184_v31 = vld [vmem:[#allocation8 + $0x8] sm:$0xff]  ;;  %v1191_v10 = vld [vmem:[#allocation8 + $0x40] sm:$0xff] }
 0x49d   : > { %2303 = vrot.lane.b32.xlu0 %v2257_v58, %s4672_s30 }
 0x4a1   : > { %v2296_v3 = vpop.permute.xlu0 %2295 }
 0x4a2   : > { %v2333_v42 = vadd.f32 %v2296_v3, %v2077_v20  ;;  %3960 = vmatmul.msk.bf16.gmra.mxu2 %vm1696_vm1, %v1684_v14  ;;  %v1188_v3 = vld [vmem:[#allocation8 + $0x28] sm:$0xff] }
 0x4a3   : > { %v2302_v48 = vpop.permute.xlu1 %2301 }
 0x4a4   : > { %v2616_v35 = vpack.c.bf16 %v2334_v40, %v2333_v42  ;;  %v2642_v47 = vpop.permute.xlu2 %2641  ;;  %v2336_v49 = vadd.f32 %v2302_v48, %v2080_v1 }
 0x4a5   : > { %3967 = vmatmul.msk.bf16.gmra.mxu0 %vm1696_vm1, %v2642_v47 }
 0x4a6   : > { %2645 = vrot.lane.b32.xlu2 %v2616_v35, %s4673_s23  ;;  %v7688_v35 = vld [vmem:[#allocation72_spill] sm:$0xff] }
 0x4a7   : > { %v2082_v47 = vmul.f32 %v7688_v35, %v7684_v43 }
 0x4a9   : > { %v2300_v24 = vpop.permute.xlu0 %2299 }
 0x4aa   : > { %v2335_v57 = vadd.f32 %v2300_v24, %v2079_v51 }
 0x4ac   : > { %v2617_v34 = vpack.c.bf16 %v2336_v49, %v2335_v57 }
 0x4ae   : > { %2914 = vrot.lane.b32.xlu2 %v6543_v30, %s4673_s23  ;;  %2647 = vrot.lane.b32.xlu0 %v2617_v34, %s4673_s23 }
 0x4b2   : > { %3961 = vmatmul.msk.bf16.gmra.mxu2 %vm1696_vm1, %v1685_v5 }
 0x4b6   : > { %2908 = vrot.lane.b32.xlu2 %v6566_v55, %s4673_s23  ;;  %2912 = vrot.lane.b32.xlu0 %v6550_v61, %s4673_s23  ;;  %v1686_v55 = vpack.c.bf16 %v1469_v62, %v1468_v4  ;;  %v4443_v61 = vld [vmem:[%s7437_s24 + $0x78] sm:$0xff]  ;;  %v1187_v62 = vld [vmem:[#allocation8 + $0x20] sm:$0xff]  ;;  %v1192_v4 = vld [vmem:[#allocation8 + $0x48] sm:$0xff] }
 0x4b7   : > { %v1214_v26 = vmul.f32 %v4443_v61, %v7684_v43  ;;  %v1194_v61 = vld [vmem:[#allocation8 + $0x58] sm:$0xff] }
 0x4bc   : > { %v2644_v30 = vpop.permute.xlu2 %2643 }
 0x4bd   : > { %3968 = vmatmul.msk.bf16.gmra.mxu0 %vm1696_vm1, %v2644_v30 }
 0x4be   : > { %2906 = vrot.lane.b32.xlu0 %v6576_v56, %s4673_s23  ;;  %v1471_v56 = vadd.f32 %v7686_v21, %v1214_v26 }
 0x4c2   : > { %3962 = vmatmul.msk.bf16.gmra.mxu2 %vm1696_vm1, %v1686_v55 }
 0x4c3   : > { %v6668_v18 = vpop.f32.mrf.mxu0 }
 0x4c6   : > { %2904 = vrot.lane.b32.xlu0 %v6583_v12, %s4673_s23  ;;  %v1687_v12 = vpack.c.bf16 %v1471_v56, %v1470_v7  ;;  %v6727_v56 = vadd.f32 %v6668_v18, %v1183_v29  ;;  %v6739_v18 = vld [vmem:[#allocation8 + $0x78] sm:$0xff] }
 0x4cb   : > { %v2734_v58 = vpop.f32.mrf.mxu0 }
 0x4cc   : > { %v6673_v2 = vadd.f32 %v2734_v58, %v1184_v31 }
 0x4ce   : > { %2902 = vrot.lane.b32.xlu0 %v6593_v15, %s4673_s23 }
 0x4d2   : > { %3963 = vmatmul.msk.bf16.gmra.mxu2 %vm1696_vm1, %v1687_v12 }
 0x4d6   : > { %2900 = vrot.lane.b32.xlu0 %v6598_v0, %s4673_s23 }
 0x4db   : > { %v2306_v40 = vpop.permute.xlu1 %2305 }
 0x4dc   : > { %v2338_v39 = vadd.f32 %v2306_v40, %v2082_v47 }
 0x4df   : > { %2774 = vmax.xlane.f32.xlu2 %v6673_v2 }
 0x4e5   : > { %v6676_v25 = vpop.f32.mrf.mxu2 }
 0x4ed   : > { %v1756_v41 = vpop.f32.mrf.mxu2 }
 0x4ee   : > { %v6694_v8 = vadd.f32 %v1756_v41, %v1184_v31  ;;  %v6735_v31 = vadd.f32 %v6676_v25, %v1183_v29 }
 0x4f5   : > { %v1759_v45 = vpop.f32.mrf.mxu2 }
 0x4f6   : > { %v6678_v15 = vadd.f32 %v1759_v45, %v1185_v6 }
 0x4fd   : > { %v1761_v32 = vpop.f32.mrf.mxu2 }
 0x4fe   : > { %v6707_v33 = vadd.f32 %v1761_v32, %v1186_v50 }
 0x500   : > { %v2646_v14 = vpop.permute.xlu2 %2645 }
 0x501   : > { %3969 = vmatmul.msk.bf16.gmra.mxu0 %vm1696_vm1, %v2646_v14 }
 0x502   : > { %v2737_v54 = vpop.f32.mrf.mxu0 }
 0x503   : > { %v6681_v44 = vadd.f32 %v2737_v54, %v1185_v6 }
 0x505   : > { %2776 = vmax.xlane.f32.xlu0 %v6681_v44  ;;  %v1764_v0 = vpop.f32.mrf.mxu2 }
 0x506   : > { %v6715_v30 = vadd.f32 %v1764_v0, %v1187_v62 }
 0x508   : > { %v2915_v27 = vpop.permute.xlu2 %2914 }
 0x509   : > { %2924 = vmatpush.bf16.msra.mxu1 %v2915_v27 }
 0x50a   : > { %v2739_v19 = vpop.f32.mrf.mxu0 }
 0x50b   : > { %v6684_v20 = vadd.f32 %v2739_v19, %v1186_v50 }
 0x50d   : > { %2778 = vmax.xlane.f32.xlu2 %v6684_v20  ;;  %v1766_v42 = vpop.f32.mrf.mxu2 }
 0x50e   : > { %v6689_v48 = vadd.f32 %v1766_v42, %v1188_v3  ;;  %v1195_v42 = vld [vmem:[#allocation8 + $0x60] sm:$0xff] }
 0x50f   : > { %v2304_v1 = vpop.permute.xlu0 %2303 }
 0x510   : > { %v2337_v16 = vadd.f32 %v2304_v1, %v2081_v13  ;;  %1804 = vmax.xlane.f32.xlu0 %v6689_v48  ;;  %v2909_v14 = vpop.permute.xlu2 %2908 }
 0x512   : > { %v2618_v51 = vpack.c.bf16 %v2338_v39, %v2337_v16  ;;  %v2742_v24 = vpop.f32.mrf.mxu0 }
 0x513   : > { %v6741_v6 = vadd.f32 %v2742_v24, %v1187_v62  ;;  %v1196_v24 = vld [vmem:[#allocation8 + $0x68] sm:$0xff] }
 0x514   : > { %2649 = vrot.lane.b32.xlu1 %v2618_v51, %s4673_s23 }
 0x515   : > { %v1769_v49 = vpop.f32.mrf.mxu2  ;;  %1796 = vmax.xlane.f32.xlu2 %v6694_v8 }
 0x516   : > { %v6698_v57 = vadd.f32 %v1769_v49, %v1189_v38 }
 0x518   : > { %1806 = vmax.xlane.f32.xlu0 %v6698_v57 }
 0x51a   : > { %v2744_v52 = vpop.f32.mrf.mxu0 }
 0x51b   : > { %v6701_v36 = vadd.f32 %v2744_v52, %v1188_v3 }
 0x51c   : > { %2910 = vrot.lane.b32.xlu1 %v6560_v59, %s4673_s23 }
 0x51d   : > { %v1771_v60 = vpop.f32.mrf.mxu2  ;;  %2782 = vmax.xlane.f32.xlu2 %v6701_v36 }
 0x51e   : > { %v6749_v25 = vadd.f32 %v1771_v60, %v1190_v63 }
 0x520   : > { %v2648_v34 = vpop.permute.xlu0 %2647 }
 0x521   : > { %3970 = vmatmul.msk.bf16.gmra.mxu0 %vm1696_vm1, %v2648_v34 }
 0x522   : > { %v2747_v9 = vpop.f32.mrf.mxu0 }
 0x523   : > { %v6709_v5 = vadd.f32 %v2747_v9, %v1189_v38 }
 0x525   : > { %v1774_v17 = vpop.f32.mrf.mxu2  ;;  %1800 = vmax.xlane.f32.xlu2 %v6707_v33 }
 0x526   : > { %v6752_v54 = vadd.f32 %v1774_v17, %v1191_v10 }
 0x528   : > { %v2913_v37 = vpop.permute.xlu0 %2912 }
 0x529   : > { %2925 = vmatpush.bf16.msra.mxu1 %v2913_v37 }
 0x52a   : > { %v2749_v53 = vpop.f32.mrf.mxu0 }
 0x52b   : > { %v6712_v22 = vadd.f32 %v2749_v53, %v1190_v63 }
 0x52d   : > { %v1776_v59 = vpop.f32.mrf.mxu2  ;;  %2786 = vmax.xlane.f32.xlu2 %v6712_v22 }
 0x52e   : > { %v6718_v55 = vadd.f32 %v1776_v59, %v1192_v4  ;;  %v6781_v59 = vld [vmem:[#allocation8 + $0x70] sm:$0xff] }
 0x530   : > { %v2907_v35 = vpop.permute.xlu0 %2906 }
 0x535   : > { %v1779_v46 = vpop.f32.mrf.mxu2  ;;  %1802 = vmax.xlane.f32.xlu2 %v6715_v30 }
 0x536   : > { %v6724_v23 = vadd.f32 %v1779_v46, %v1193_v28 }
 0x538   : > { %v2905_v49 = vpop.permute.xlu0 %2904 }
 0x53a   : > { %v2752_v21 = vpop.f32.mrf.mxu0 }
 0x53b   : > { %v6730_v12 = vadd.f32 %v2752_v21, %v1191_v10 }
 0x53d   : > { %v1781_v43 = vpop.f32.mrf.mxu2  ;;  %1812 = vmax.xlane.f32.xlu2 %v6718_v55 }
 0x53e   : > { %v6721_v26 = vadd.f32 %v1781_v43, %v1194_v61 }
 0x540   : > { %1816 = vmax.xlane.f32.xlu0 %v6721_v26 }
 0x542   : > { %v2754_v0 = vpop.f32.mrf.mxu0 }
 0x543   : > { %v6755_v19 = vadd.f32 %v2754_v0, %v1192_v4 }
 0x545   : > { %v1784_v7 = vpop.f32.mrf.mxu2  ;;  %1814 = vmax.xlane.f32.xlu2 %v6724_v23 }
 0x546   : > { %2772 = vmax.xlane.f32.xlu1 %v6727_v56  ;;  %v6760_v47 = vadd.f32 %v1784_v7, %v1195_v42 }
 0x548   : > { %2788 = vmax.xlane.f32.xlu0 %v6730_v12 }
 0x54d   : > { %v1786_v58 = vpop.f32.mrf.mxu2 }
 0x54e   : > { %1794 = vmax.xlane.f32.xlu1 %v6735_v31  ;;  %v6771_v52 = vadd.f32 %v1786_v58, %v1196_v24 }
 0x552   : > { %v2775_v50 = vpop.xlane.xlu2 %2774 }
 0x555   : > { %v1789_v41 = vpop.f32.mrf.mxu2 }
 0x556   : > { %1798 = vmax.xlane.f32.xlu1 %v6678_v15  ;;  %v6784_v62 = vadd.f32 %v1789_v41, %v6781_v59 }
 0x55d   : > { %v1791_v45 = vpop.f32.mrf.mxu2 }
 0x55e   : > { %v6744_v32 = vadd.f32 %v1791_v45, %v6739_v18  ;;  %2780 = vmax.xlane.f32.xlu1 %v6741_v6 }
 0x560   : > { %1824 = vmax.xlane.f32.xlu0 %v6744_v32 }
 0x566   : > { %2784 = vmax.xlane.f32.xlu1 %v6709_v5 }
 0x56e   : > { %1808 = vmax.xlane.f32.xlu1 %v6749_v25 }
 0x576   : > { %1810 = vmax.xlane.f32.xlu1 %v6752_v54 }
 0x57e   : > { %v2757_v3 = vpop.f32.mrf.mxu0  ;;  %2790 = vmax.xlane.f32.xlu1 %v6755_v19 }
 0x57f   : > { %v6768_v38 = vadd.f32 %v2757_v3, %v1193_v28  ;;  %v2805_v28 = vsub.f32 %v6673_v2, %v2775_v50 }
 0x580   : > { %v6758_v40 = vpop.xlane.xlu2 %2778 }
 0x581   : > { %v2822_v21 = vmul.f32 1.442695, %v2805_v28  ;;  %v2807_v3 = vsub.f32 %v6684_v20, %v6758_v40 }
 0x586   : > { %v2759_v11 = vpop.f32.mrf.mxu0  ;;  %v2650_v13 = vpop.permute.xlu1 %2649  ;;  %1818 = vmax.xlane.f32.xlu1 %v6760_v47 }
 0x587   : > { %v6763_v1 = vadd.f32 %v2759_v11, %v1194_v61  ;;  %3971 = vmatmul.msk.bf16.gmra.mxu0 %vm1696_vm1, %v2650_v13  ;;  %v2826_v13 = vmul.f32 1.442695, %v2807_v3 }
 0x588   : > { %v1797_v39 = vpop.xlane.xlu2 %1796 }
 0x589   : > { %v1827_v16 = vsub.f32 %v6694_v8, %v1797_v39  ;;  %2794 = vmax.xlane.f32.xlu2 %v6763_v1  ;;  %v2903_v8 = vpop.permute.xlu0 %2902 }
 0x58b   : > { %v1844_v51 = vmul.f32 1.442695, %v1827_v16 }
 0x58d   : > { %4298 = vpow2.f32 %v1844_v51 }
 0x58e   : > { %v2911_v27 = vpop.permute.xlu1 %2910  ;;  %2792 = vmax.xlane.f32.xlu1 %v6768_v38 }
 0x58f   : > { %2926 = vmatpush.bf16.msra.mxu1 %v2911_v27 }
 0x590   : > { %v6773_v60 = vpop.xlane.xlu2 %2782 }
 0x591   : > { %1820 = vmax.xlane.f32.xlu2 %v6771_v52  ;;  %v2901_v53 = vpop.permute.xlu0 %2900 }
 0x593   : > { %v4299_v34 = vpop.eup %4298  ;;  %2927 = vmatpush.bf16.msra.mxu1 %v2909_v14 }
 0x594   : > { %1876 = vadd.xlane.f32.xlu0 %v4299_v34 }
 0x597   : > { %2928 = vmatpush.bf16.msra.mxu1 %v2907_v35 }
 0x598   : > { %v1801_v9 = vpop.xlane.xlu2 %1800 }
 0x59b   : > { %2929 = vmatpush.bf16.msra.mxu1 %v2905_v49 }
 0x59e   : > { %v2762_v17 = vpop.f32.mrf.mxu0 }
 0x59f   : > { %v6776_v37 = vadd.f32 %v2762_v17, %v1195_v42  ;;  %2930 = vmatpush.bf16.msra.mxu1 %v2903_v8 }
 0x5a0   : > { %v6778_v63 = vpop.xlane.xlu2 %2786 }
 0x5a1   : > { %2796 = vmax.xlane.f32.xlu2 %v6776_v37 }
 0x5a3   : > { %2931 = vmatpush.bf16.msra.mxu1 %v2901_v53 }
 0x5a6   : > { %v2764_v29 = vpop.f32.mrf.mxu0 }
 0x5a7   : > { %v6792_v7 = vadd.f32 %v2764_v29, %v1196_v24 }
 0x5a8   : > { %v1803_v46 = vpop.xlane.xlu2 %1802 }
 0x5a9   : > { %v1830_v4 = vsub.f32 %v6715_v30, %v1803_v46  ;;  %1822 = vmax.xlane.f32.xlu2 %v6784_v62  ;;  %v2777_v30 = vpop.xlane.xlu0 %2776 }
 0x5aa   : > { %v2806_v2 = vsub.f32 %v6681_v44, %v2777_v30  ;;  %v2811_v30 = vsub.f32 %v6712_v22, %v6778_v63 }
 0x5ab   : > { %v1850_v61 = vmul.f32 1.442695, %v1830_v4 }
 0x5ac   : > { %v2824_v11 = vmul.f32 1.442695, %v2806_v2  ;;  %v2834_v3 = vmul.f32 1.442695, %v2811_v30 }
 0x5ad   : > { %4300 = vpow2.f32 %v1850_v61 }
 0x5ae   : > { %4302 = vpow2.f32 %v2822_v21 }
 0x5b3   : > { %v6788_v43 = vpop.eup %4300 }
 0x5b4   : > { %1882 = vadd.xlane.f32.xlu0 %v6788_v43  ;;  %v6797_v0 = vpop.eup %4302 }
 0x5b9   : > { %v2773_v10 = vpop.xlane.xlu1 %2772 }
 0x5ba   : > { %v2804_v58 = vsub.f32 %v6727_v56, %v2773_v10  ;;  %v1829_v56 = vsub.f32 %v6707_v33, %v1801_v9 }
 0x5bc   : > { %v2820_v41 = vmul.f32 1.442695, %v2804_v58  ;;  %2798 = vmax.xlane.f32.xlu0 %v6792_v7  ;;  %v1848_v39 = vmul.f32 1.442695, %v1829_v56 }
 0x5be   : > { %4304 = vpow2.f32 %v2820_v41 }
 0x5c1   : > { %v1795_v45 = vpop.xlane.xlu1 %1794 }
 0x5c2   : > { %v1826_v14 = vsub.f32 %v6735_v31, %v1795_v45  ;;  %v1805_v31 = vpop.xlane.xlu0 %1804 }
 0x5c3   : > { %v1831_v33 = vsub.f32 %v6689_v48, %v1805_v31  ;;  %v2809_v48 = vsub.f32 %v6701_v36, %v6773_v60 }
 0x5c4   : > { %v6800_v50 = vpop.eup %4304  ;;  %v1842_v42 = vmul.f32 1.442695, %v1826_v14 }
 0x5c5   : > { %v2884_v35 = vpack.c.bf16 %v6797_v0, %v6800_v50  ;;  %v1852_v8 = vmul.f32 1.442695, %v1831_v33  ;;  %v2830_v29 = vmul.f32 1.442695, %v2809_v48 }
 0x5c6   : > { %4306 = vpow2.f32 %v1842_v42 }
 0x5c7   : > { %2932 = vmatmul.bf16.vlgmr.msra.gmra.mxu1 %v2884_v35  ;;  %4308 = vpow2.f32 %v2824_v11 }
 0x5c8   : > { %4310 = vpow2.f32 %v2826_v13 }
 0x5c9   : > { %v1799_v16 = vpop.xlane.xlu1 %1798  ;;  %4312 = vpow2.f32 %v1848_v39 }
 0x5ca   : > { %v1828_v44 = vsub.f32 %v6678_v15, %v1799_v16  ;;  %v1807_v9 = vpop.xlane.xlu0 %1806 }
 0x5cb   : > { %v1832_v46 = vsub.f32 %v6698_v57, %v1807_v9 }
 0x5cc   : > { %v4307_v51 = vpop.eup %4306  ;;  %v1846_v24 = vmul.f32 1.442695, %v1828_v44 }
 0x5cd   : > { %1874 = vadd.xlane.f32.xlu2 %v4307_v51  ;;  %v1906_v20 = vpack.c.bf16 %v4299_v34, %v4307_v51  ;;  %v6809_v40 = vpop.eup %4308  ;;  %v1854_v61 = vmul.f32 1.442695, %v1832_v46 }
 0x5ce   : > { %4314 = vpow2.f32 %v1846_v24  ;;  %v4311_v27 = vpop.eup %4310 }
 0x5cf   : > { %1930 = vmatmul.bf16.vlgmr.msrb.gmra.mxu3 %v1906_v20  ;;  %v4313_v17 = vpop.eup %4312  ;;  %v2885_v34 = vpack.c.bf16 %v4311_v27, %v6809_v40  ;;  %4316 = vpow2.f32 %v1852_v8 }
 0x5d1   : > { %v2781_v49 = vpop.xlane.xlu1 %2780 }
 0x5d2   : > { %v2808_v15 = vsub.f32 %v6741_v6, %v2781_v49  ;;  %v6825_v14 = vpop.xlane.xlu0 %1816 }
 0x5d4   : > { %v4315_v53 = vpop.eup %4314  ;;  %v2828_v4 = vmul.f32 1.442695, %v2808_v15 }
 0x5d5   : > { %1880 = vadd.xlane.f32.xlu2 %v4313_v17  ;;  %1878 = vadd.xlane.f32.xlu1 %v4315_v53  ;;  %v4317_v21 = vpop.eup %4316  ;;  %v1907_v6 = vpack.c.bf16 %v4313_v17, %v4315_v53 }
 0x5d6   : > { %4318 = vpow2.f32 %v2828_v4  ;;  %v1908_v56 = vpack.c.bf16 %v4317_v21, %v6788_v43 }
 0x5d7   : > { %2937 = vmatmul.bf16.gmra.mxu1 %v2885_v34  ;;  %4320 = vpow2.f32 %v1854_v61 }
 0x5d8   : > { %4322 = vpow2.f32 %v2830_v29 }
 0x5d9   : > { %v2785_v28 = vpop.xlane.xlu1 %2784 }
 0x5da   : > { %v2810_v36 = vsub.f32 %v6709_v5, %v2785_v28  ;;  %v1813_v5 = vpop.xlane.xlu2 %1812  ;;  %v2789_v63 = vpop.xlane.xlu0 %2788 }
 0x5db   : > { %v1835_v49 = vsub.f32 %v6718_v55, %v1813_v5 }
 0x5dc   : > { %v6816_v10 = vpop.eup %4318  ;;  %v2832_v45 = vmul.f32 1.442695, %v2810_v36 }
 0x5dd   : > { %1884 = vadd.xlane.f32.xlu2 %v4317_v21  ;;  %v4321_v58 = vpop.eup %4320  ;;  %v1860_v17 = vmul.f32 1.442695, %v1835_v49 }
 0x5de   : > { %v6818_v41 = vpop.eup %4322  ;;  %4324 = vpow2.f32 %v2832_v45 }
 0x5df   : > { %1935 = vmatmul.bf16.gmra.mxu3 %v1907_v6  ;;  %v2886_v60 = vpack.c.bf16 %v6818_v41, %v6816_v10  ;;  %4326 = vpow2.f32 %v2834_v3  ;;  %v1837_v6 = vsub.f32 %v6721_v26, %v6825_v14 }
 0x5e1   : > { %v1809_v57 = vpop.xlane.xlu1 %1808 }
 0x5e2   : > { %v1833_v42 = vsub.f32 %v6749_v25, %v1809_v57  ;;  %v2812_v25 = vsub.f32 %v6730_v12, %v2789_v63  ;;  %v1815_v51 = vpop.xlane.xlu2 %1814  ;;  %v1825_v30 = vpop.xlane.xlu0 %1824 }
 0x5e4   : > { %v1856_v35 = vmul.f32 1.442695, %v1833_v42  ;;  %v6829_v13 = vpop.eup %4324  ;;  %v2836_v24 = vmul.f32 1.442695, %v2812_v25 }
 0x5e5   : > { %1886 = vadd.xlane.f32.xlu2 %v4321_v58  ;;  %v4327_v31 = vpop.eup %4326 }
 0x5e6   : > { %4328 = vpow2.f32 %v1856_v35  ;;  %v2887_v16 = vpack.c.bf16 %v4327_v31, %v6829_v13 }
 0x5e7   : > { %2942 = vmatmul.bf16.gmra.mxu1 %v2886_v60 }
 0x5e9   : > { %v1811_v2 = vpop.xlane.xlu1 %1810 }
 0x5ec   : > { %v6836_v44 = vpop.eup %4328 }
 0x5ed   : > { %2858 = vadd.xlane.f32.xlu2 %v4311_v27  ;;  %v1909_v33 = vpack.c.bf16 %v6836_v44, %v4321_v58  ;;  %v1864_v58 = vmul.f32 1.442695, %v1837_v6 }
 0x5ef   : > { %1940 = vmatmul.bf16.gmra.mxu3 %v1908_v56 }
 0x5f1   : > { %v2791_v11 = vpop.xlane.xlu1 %2790 }
 0x5f2   : > { %v2813_v22 = vsub.f32 %v6755_v19, %v2791_v11  ;;  %v1834_v19 = vsub.f32 %v6752_v54, %v1811_v2  ;;  %v1841_v11 = vsub.f32 %v6744_v32, %v1825_v30 }
 0x5f4   : > { %v2838_v39 = vmul.f32 1.442695, %v2813_v22  ;;  %v1858_v27 = vmul.f32 1.442695, %v1834_v19 }
 0x5f5   : > { %2866 = vadd.xlane.f32.xlu2 %v4327_v31 }
 0x5f6   : > { %4330 = vpow2.f32 %v2838_v39  ;;  %v1872_v39 = vmul.f32 1.442695, %v1841_v11 }
 0x5f7   : > { %2947 = vmatmul.bf16.gmra.mxu1 %v2887_v16  ;;  %4332 = vpow2.f32 %v2836_v24 }
 0x5f8   : > { %4334 = vpow2.f32 %v1858_v27 }
 0x5f9   : > { %v6834_v43 = vpop.xlane.xlu1 %1818 }
 0x5fa   : > { %v1838_v3 = vsub.f32 %v6760_v47, %v6834_v43 }
 0x5fc   : > { %v4331_v20 = vpop.eup %4330  ;;  %v2795_v8 = vpop.xlane.xlu2 %2794 }
 0x5fd   : > { %2870 = vadd.xlane.f32.xlu2 %v4331_v20  ;;  %v6842_v53 = vpop.eup %4332  ;;  %v2815_v48 = vsub.f32 %v6763_v1, %v2795_v8 }
 0x5fe   : > { %v2888_v34 = vpack.c.bf16 %v4331_v20, %v6842_v53 }
 0x5ff   : > { %1945 = vmatmul.bf16.gmra.mxu3 %v1909_v33  ;;  %v2842_v55 = vmul.f32 1.442695, %v2815_v48 }
 0x601   : > { %v2793_v12 = vpop.xlane.xlu1 %2792 }
 0x602   : > { %v2814_v9 = vsub.f32 %v6768_v38, %v2793_v12  ;;  %v6850_v38 = vpop.eup %4334 }
 0x604   : > { %v2840_v15 = vmul.f32 1.442695, %v2814_v9  ;;  %v2767_v46 = vpop.f32.mrf.mxu0  ;;  %v1821_v61 = vpop.xlane.xlu2 %1820 }
 0x605   : > { %v6845_v54 = vadd.f32 %v2767_v46, %v6781_v59  ;;  %v1836_v59 = vsub.f32 %v6724_v23, %v1815_v51  ;;  %v1839_v14 = vsub.f32 %v6771_v52, %v1821_v61 }
 0x606   : > { %4336 = vpow2.f32 %v2840_v15 }
 0x607   : > { %4338 = vpow2.f32 %v1860_v17  ;;  %2800 = vmax.xlane.f32.xlu0 %v6845_v54  ;;  %2952 = vmatmul.bf16.gmra.mxu1 %v2888_v34  ;;  %v1862_v57 = vmul.f32 1.442695, %v1836_v59  ;;  %v6876_v42 = vpop.xlane.xlu0 %1876 }
 0x608   : > { %4340 = vpow2.f32 %v2842_v55 }
 0x609   : > { %4342 = vpow2.f32 %v1862_v57 }
 0x60a   : > { %4344 = vpow2.f32 %v1864_v58 }
 0x60c   : > { %v4337_v4 = vpop.eup %4336  ;;  %v2769_v28 = vpop.f32.mrf.mxu0 }
 0x60d   : > { %v6852_v29 = vpop.eup %4338  ;;  %v6856_v21 = vadd.f32 %v2769_v28, %v6739_v18  ;;  %2872 = vadd.xlane.f32.xlu2 %v4337_v4 }
 0x60e   : > { %v1910_v1 = vpack.c.bf16 %v6852_v29, %v6850_v38  ;;  %v4341_v36 = vpop.eup %4340 }
 0x60f   : > { %2852 = vadd.xlane.f32.xlu0 %v6800_v50  ;;  %2802 = vmax.xlane.f32.xlu1 %v6856_v21  ;;  %v2889_v60 = vpack.c.bf16 %v4341_v36, %v4337_v4  ;;  %v6867_v26 = vpop.eup %4342 }
 0x610   : > { %1950 = vmatmul.bf16.gmra.mxu3 %v1910_v1  ;;  %v6869_v50 = vpop.eup %4344 }
 0x614   : > { %v2797_v23 = vpop.xlane.xlu2 %2796 }
 0x615   : > { %v2816_v18 = vsub.f32 %v6776_v37, %v2797_v23  ;;  %2874 = vadd.xlane.f32.xlu2 %v4341_v36  ;;  %v1911_v37 = vpack.c.bf16 %v6869_v50, %v6867_v26 }
 0x617   : > { %v2844_v45 = vmul.f32 1.442695, %v2816_v18  ;;  %2854 = vadd.xlane.f32.xlu1 %v6797_v0  ;;  %2860 = vadd.xlane.f32.xlu0 %v6816_v10  ;;  %v1868_v0 = vmul.f32 1.442695, %v1839_v14  ;;  %v1866_v10 = vmul.f32 1.442695, %v1838_v3 }
 0x618   : > { %2957 = vmatmul.bf16.gmra.mxu1 %v2889_v60 }
 0x619   : > { %4346 = vpow2.f32 %v2844_v45 }
 0x61a   : > { %4348 = vpow2.f32 %v1868_v0 }
 0x61b   : > { %4350 = vpow2.f32 %v1866_v10 }
 0x61c   : > { %v1823_v52 = vpop.xlane.xlu2 %1822 }
 0x61d   : > { %v1840_v47 = vsub.f32 %v6784_v62, %v1823_v52 }
 0x61f   : > { %v4347_v2 = vpop.eup %4346  ;;  %2856 = vadd.xlane.f32.xlu1 %v6809_v40  ;;  %v1870_v31 = vmul.f32 1.442695, %v1840_v47 }
 0x620   : > { %1955 = vmatmul.bf16.gmra.mxu3 %v1911_v37  ;;  %2876 = vadd.xlane.f32.xlu2 %v4347_v2  ;;  %v6882_v5 = vpop.eup %4348 }
 0x621   : > { %v6884_v35 = vpop.eup %4350 }
 0x622   : > { %v1912_v40 = vpack.c.bf16 %v6882_v5, %v6884_v35 }
 0x627   : > { %v6879_v56 = vpop.xlane.xlu0 %1882  ;;  %2862 = vadd.xlane.f32.xlu1 %v6818_v41 }
 0x62f   : > { %v2799_v22 = vpop.xlane.xlu0 %2798  ;;  %2864 = vadd.xlane.f32.xlu1 %v6829_v13 }
 0x630   : > { %v2817_v63 = vsub.f32 %v6792_v7, %v2799_v22  ;;  %1960 = vmatmul.bf16.gmra.mxu3 %v1912_v40 }
 0x632   : > { %v2846_v41 = vmul.f32 1.442695, %v2817_v63 }
 0x634   : > { %4352 = vpow2.f32 %v2846_v41 }
 0x635   : > { %4354 = vpow2.f32 %v1870_v31 }
 0x636   : > { %4356 = vpow2.f32 %v1872_v39 }
 0x637   : > { %2868 = vadd.xlane.f32.xlu1 %v6842_v53 }
 0x63a   : > { %v6893_v62 = vpop.eup %4352 }
 0x63b   : > { %v6895_v16 = vpop.eup %4354  ;;  %v2890_v32 = vpack.c.bf16 %v6893_v62, %v4347_v2 }
 0x63c   : > { %v6898_v25 = vpop.eup %4356 }
 0x63d   : > { %2962 = vmatmul.bf16.gmra.mxu1 %v2890_v32  ;;  %v1913_v7 = vpack.c.bf16 %v6898_v25, %v6895_v16  ;;  %v4030_v32 = vld [vmem:[%s4872_s21 + $0x70] sm:$0xf] }
 0x640   : > { %1965 = vmatmul.bf16.gmra.mxu3 %v1913_v7  ;;  %v6902_v43 = vpop.xlane.xlu2 %1874  ;;  %v4125_v7 = vld [vmem:[%s4872_s21 + $0x74] sm:$0xf0] }
 0x644   : > { %v2933_v13 = vpop.f32.mrf.mxu1 }
 0x648   : > { %v6904_v24 = vpop.xlane.xlu2 %1880  ;;  %v6906_v19 = vpop.xlane.xlu1 %1878 }
 0x64c   : > { %v2935_v51 = vpop.f32.mrf.mxu1 }
 0x650   : > { %v6908_v33 = vpop.xlane.xlu2 %1884 }
 0x654   : > { %v2938_v20 = vpop.f32.mrf.mxu1 }
 0x658   : > { %v6912_v53 = vpop.xlane.xlu2 %1886 }
 0x65c   : > { %v2940_v12 = vpop.f32.mrf.mxu1 }
 0x660   : > { %v2859_v61 = vpop.xlane.xlu2 %2858 }
 0x664   : > { %v2943_v34 = vpop.f32.mrf.mxu1 }
 0x668   : > { %v2867_v3 = vpop.xlane.xlu2 %2866 }
 0x66c   : > { %v2945_v57 = vpop.f32.mrf.mxu1 }
 0x674   : > { %v2948_v37 = vpop.f32.mrf.mxu1 }
 0x67a   : > { %v2801_v49 = vpop.xlane.xlu0 %2800 }
 0x67b   : > { %v2818_v27 = vsub.f32 %v6845_v54, %v2801_v49  ;;  %v4022_v49 = vld [vmem:[%s4872_s21 + $0x60] sm:$0xf] }
 0x67c   : > { %v2950_v11 = vpop.f32.mrf.mxu1 }
 0x67d   : > { %v2848_v8 = vmul.f32 1.442695, %v2818_v27  ;;  %v4123_v27 = vld [vmem:[%s4872_s21 + $0x64] sm:$0xf0] }
 0x67f   : > { %4358 = vpow2.f32 %v2848_v8  ;;  %v4122_v8 = vld [vmem:[%s4872_s21 + $0x64] sm:$0xf] }
 0x682   : > { %v2803_v9 = vpop.xlane.xlu1 %2802  ;;  %v2853_v46 = vpop.xlane.xlu0 %2852 }
 0x683   : > { %v2819_v17 = vsub.f32 %v6856_v21, %v2803_v9  ;;  %v4024_v9 = vld [vmem:[%s4872_s21 + $0x68] sm:$0xf0] }
 0x685   : > { %v2850_v15 = vmul.f32 1.442695, %v2819_v17  ;;  %v6914_v55 = vpop.eup %4358  ;;  %v4014_v17 = vld [vmem:[%s4872_s21 + $0x50] sm:$0xf] }
 0x687   : > { %4360 = vpow2.f32 %v2850_v15  ;;  %v4121_v15 = vld [vmem:[%s4872_s21 + $0x54] sm:$0xf0] }
 0x688   : > { %4362 = vrcp.f32 %v2853_v46  ;;  %v4120_v46 = vld [vmem:[%s4872_s21 + $0x54] sm:$0xf] }
 0x68a   : > { %v2855_v48 = vpop.xlane.xlu1 %2854  ;;  %v2861_v36 = vpop.xlane.xlu0 %2860 }
 0x68b   : > { %4364 = vrcp.f32 %v2855_v48  ;;  %v4015_v48 = vor.u32 %v4121_v15, %v4014_v17 }
 0x68c   : > { %4366 = vrcp.f32 %v2859_v61  ;;  %v4006_v61 = vld [vmem:[%s4872_s21 + $0x40] sm:$0xf] }
 0x68d   : > { %v4361_v4 = vpop.eup %4360 }
 0x68e   : > { %2882 = vadd.xlane.f32.xlu2 %v4361_v4  ;;  %v2891_v54 = vpack.c.bf16 %v4361_v4, %v6914_v55  ;;  %v4363_v28 = vpop.eup %4362 }
 0x68f   : > { %v2989_v21 = vmul.f32 %v4363_v28, %v2933_v13  ;;  %v4124_v13 = vld [vmem:[%s4872_s21 + $0x74] sm:$0xf]  ;;  %v4118_v28 = vld [vmem:[%s4872_s21 + $0x44] sm:$0xf] }
 0x690   : > { %2967 = vmatmul.bf16.gmra.mxu1 %v2891_v54  ;;  %v4119_v54 = vld [vmem:[%s4872_s21 + $0x44] sm:$0xf0] }
 0x691   : > { %v4365_v59 = vpop.eup %4364 }
 0x692   : > { %v2990_v1 = vmul.f32 %v4365_v59, %v2935_v51  ;;  %v2857_v6 = vpop.xlane.xlu1 %2856  ;;  %v4367_v23 = vpop.eup %4366  ;;  %v4031_v51 = vor.u32 %v4125_v7, %v4030_v32  ;;  %v4008_v59 = vld [vmem:[%s4872_s21 + $0x48] sm:$0xf0]  ;;  %v4111_v32 = vld [vmem:[%s4872_s21 + $0x4] sm:$0xf0]  ;;  %v4110_v7 = vld [vmem:[%s4872_s21 + $0x4] sm:$0xf] }
 0x693   : > { %4368 = vrcp.f32 %v2857_v6  ;;  %v2992_v60 = vmul.f32 %v4367_v23, %v2940_v12  ;;  %v4011_v6 = vor.u32 %v4118_v28, %v4008_v59 }
 0x694   : > { %v4258_v58 = vpack.i.bf16 %v2990_v1, %v2989_v21  ;;  %4370 = vrcp.f32 %v2861_v36  ;;  %3189 = vmatpush.bf16.msra.mxu2 %v4031_v51  ;;  %v2953_v21 = vpop.f32.mrf.mxu1  ;;  %v4007_v1 = vor.u32 %v4119_v54, %v4006_v61  ;;  %v4116_v36 = vld [vmem:[%s4872_s21 + $0x34] sm:$0xf] }
 0x696   : > { %4259 = vrot.lane.b32.xlu0 %v4258_v58, %s4673_s23  ;;  %v4117_v58 = vld [vmem:[%s4872_s21 + $0x34] sm:$0xf0] }
 0x699   : > { %v4369_v18 = vpop.eup %4368 }
 0x69a   : > { %v2991_v30 = vmul.f32 %v4369_v18, %v2938_v20  ;;  %v2863_v45 = vpop.xlane.xlu1 %2862  ;;  %v4371_v2 = vpop.eup %4370  ;;  %v4032_v20 = vld [vmem:[%s4872_s21 + $0x78] sm:$0xf0] }
 0x69b   : > { %4372 = vrcp.f32 %v2863_v45  ;;  %v2993_v10 = vmul.f32 %v4371_v2, %v2943_v34  ;;  %v4035_v12 = vor.u32 %v4124_v13, %v4032_v20  ;;  %v4016_v34 = vld [vmem:[%s4872_s21 + $0x58] sm:$0xf0]  ;;  %v4115_v45 = vld [vmem:[%s4872_s21 + $0x24] sm:$0xf0]  ;;  %v3992_v2 = vld [vmem:[%s4872_s21 + $0x28] sm:$0xf0] }
 0x69c   : > { %v4263_v14 = vpack.i.bf16 %v2992_v60, %v2991_v30  ;;  %4374 = vrcp.f32 %v2867_v3  ;;  %v4019_v4 = vor.u32 %v4120_v46, %v4016_v34  ;;  %v4000_v18 = vld [vmem:[%s4872_s21 + $0x38] sm:$0xf0]  ;;  %v3990_v30 = vld [vmem:[%s4872_s21 + $0x20] sm:$0xf]  ;;  %v3976_v20 = vld [vmem:[%s4872_s21 + $0x8] sm:$0xf0] }
 0x69d   : > { %3238 = vmatpush.bf16.msra.mxu3 %v4035_v12  ;;  %v4003_v60 = vor.u32 %v4116_v36, %v4000_v18 }
 0x69e   : > { %4264 = vrot.lane.b32.xlu1 %v4263_v14, %s4673_s23  ;;  %v4114_v14 = vld [vmem:[%s4872_s21 + $0x24] sm:$0xf] }
 0x6a1   : > { %v4373_v0 = vpop.eup %4372 }
 0x6a2   : > { %v2994_v52 = vmul.f32 %v4373_v0, %v2945_v57  ;;  %v2865_v47 = vpop.xlane.xlu1 %2864  ;;  %v4375_v22 = vpop.eup %4374  ;;  %v3998_v57 = vld [vmem:[%s4872_s21 + $0x30] sm:$0xf]  ;;  %v3995_v0 = vor.u32 %v4114_v14, %v3992_v2 }
 0x6a3   : > { %4376 = vrcp.f32 %v2865_v47  ;;  %v2996_v31 = vmul.f32 %v4375_v22, %v2950_v11  ;;  %v3999_v23 = vor.u32 %v4117_v58, %v3998_v57  ;;  %v4112_v47 = vld [vmem:[%s4872_s21 + $0x14] sm:$0xf]  ;;  %v3984_v11 = vld [vmem:[%s4872_s21 + $0x18] sm:$0xf0]  ;;  %v1931_v22 = vpop.f32.mrf.mxu3 }
 0x6a4   : > { %v4268_v40 = vpack.i.bf16 %v2994_v52, %v2993_v10  ;;  %v3982_v10 = vld [vmem:[%s4872_s21 + $0x10] sm:$0xf]  ;;  %v4113_v52 = vld [vmem:[%s4872_s21 + $0x14] sm:$0xf0] }
 0x6a6   : > { %4269 = vrot.lane.b32.xlu1 %v4268_v40, %s4673_s23  ;;  %v3983_v40 = vor.u32 %v4113_v52, %v3982_v10 }
 0x6a9   : > { %v4377_v63 = vpop.eup %4376 }
 0x6aa   : > { %v2995_v41 = vmul.f32 %v4377_v63, %v2948_v37  ;;  %v3991_v37 = vor.u32 %v4115_v45, %v3990_v30  ;;  %v3987_v63 = vor.u32 %v4112_v47, %v3984_v11 }
 0x6ab   : > { %v1933_v12 = vpop.f32.mrf.mxu3 }
 0x6ac   : > { %v4273_v39 = vpack.i.bf16 %v2996_v31, %v2995_v41 }
 0x6ae   : > { %4274 = vrot.lane.b32.xlu2 %v4273_v39, %s4673_s23  ;;  %v3974_v39 = vld [vmem:[%s4872_s21] sm:$0xf]  ;;  %s7056_s21 = scalar_lea.vmem [#allocation9], %s4885_s17 }
 0x6af   : > { %v3975_v51 = vor.u32 %v4111_v32, %v3974_v39 }
 0x6c0   : > { %2878 = vadd.xlane.f32.xlu0 %v6893_v62  ;;  %v4027_v62 = vor.u32 %v4122_v8, %v4024_v9 }
 0x6c2   : > { %3239 = vmatpush.bf16.msra.mxu3 %v4027_v62  ;;  %v1936_v62 = vpop.f32.mrf.mxu3 }
 0x6c6   : > { %3240 = vmatpush.bf16.msra.mxu3 %v4019_v4 }
 0x6c8   : > { %1890 = vadd.xlane.f32.xlu0 %v6850_v38  ;;  %v4023_v38 = vor.u32 %v4123_v27, %v4022_v49  ;;  %v3979_v49 = vor.u32 %v4110_v7, %v3976_v20 }
 0x6ca   : > { %3190 = vmatpush.bf16.msra.mxu2 %v4023_v38  ;;  %3241 = vmatpush.bf16.msra.mxu3 %v4011_v6  ;;  %v1938_v46 = vpop.f32.mrf.mxu3 }
 0x6ce   : > { %3191 = vmatpush.bf16.msra.mxu2 %v4015_v48  ;;  %3242 = vmatpush.bf16.msra.mxu3 %v4003_v60 }
 0x6d0   : > { %1892 = vadd.xlane.f32.xlu0 %v6852_v29  ;;  %1888 = vadd.xlane.f32.xlu1 %v6836_v44  ;;  %v2869_v29 = vpop.xlane.xlu1 %2868  ;;  %v2871_v44 = vpop.xlane.xlu2 %2870 }
 0x6d1   : > { %4378 = vrcp.f32 %v2869_v29 }
 0x6d2   : > { %3192 = vmatpush.bf16.msra.mxu2 %v4007_v1  ;;  %4380 = vrcp.f32 %v2871_v44  ;;  %3243 = vmatpush.bf16.msra.mxu3 %v3995_v0  ;;  %v1941_v6 = vpop.f32.mrf.mxu3 }
 0x6d6   : > { %3193 = vmatpush.bf16.msra.mxu2 %v3999_v23  ;;  %3244 = vmatpush.bf16.msra.mxu3 %v3987_v63 }
 0x6d7   : > { %1900 = vadd.xlane.f32.xlu2 %v6882_v5  ;;  %v2955_v5 = vpop.f32.mrf.mxu1 }
 0x6d8   : > { %2880 = vadd.xlane.f32.xlu0 %v6914_v55  ;;  %v4379_v55 = vpop.eup %4378  ;;  %v2873_v3 = vpop.xlane.xlu2 %2872 }
 0x6da   : > { %3194 = vmatpush.bf16.msra.mxu2 %v3991_v37  ;;  %3245 = vmatpush.bf16.msra.mxu3 %v3979_v49 }
 0x6de   : > { %3195 = vmatpush.bf16.msra.mxu2 %v3983_v40 }
 0x6df   : > { %1902 = vadd.xlane.f32.xlu2 %v6895_v16  ;;  %v2997_v16 = vmul.f32 %v4379_v55, %v2953_v21  ;;  %v2958_v13 = vpop.f32.mrf.mxu1 }
 0x6e0   : > { %1894 = vadd.xlane.f32.xlu0 %v6867_v26  ;;  %v4381_v26 = vpop.eup %4380  ;;  %v2875_v27 = vpop.xlane.xlu2 %2874 }
 0x6e1   : > { %v2998_v31 = vmul.f32 %v4381_v26, %v2955_v5  ;;  %4382 = vrcp.f32 %v2875_v27  ;;  %v1943_v5 = vpop.f32.mrf.mxu3 }
 0x6e2   : > { %3196 = vmatpush.bf16.msra.mxu2 %v3975_v51  ;;  %4384 = vrcp.f32 %v2873_v3 }
 0x6e3   : > { %v4278_v41 = vpack.i.bf16 %v2998_v31, %v2997_v16  ;;  %4386 = vrcp.f32 %v6876_v42 }
 0x6e4   : > { %4388 = vrcp.f32 %v6902_v43 }
 0x6e5   : > { %4390 = vrcp.f32 %v6904_v24 }
 0x6e6   : > { %4392 = vrcp.f32 %v6906_v19 }
 0x6e7   : > { %v2960_v8 = vpop.f32.mrf.mxu1  ;;  %v4383_v9 = vpop.eup %4382  ;;  %4394 = vrcp.f32 %v6879_v56 }
 0x6e8   : > { %1896 = vadd.xlane.f32.xlu0 %v6869_v50  ;;  %v3000_v38 = vmul.f32 %v4383_v9, %v2960_v8  ;;  %v4385_v50 = vpop.eup %4384  ;;  %4396 = vrcp.f32 %v6908_v33  ;;  %v2877_v0 = vpop.xlane.xlu2 %2876 }
 0x6e9   : > { %4279 = vrot.lane.b32.xlu1 %v4278_v41, %s4673_s23  ;;  %v2999_v17 = vmul.f32 %v4385_v50, %v2958_v13  ;;  %v4387_v34 = vpop.eup %4386  ;;  %4398 = vrcp.f32 %v2877_v0 }
 0x6ea   : > { %v4389_v48 = vpop.eup %4388  ;;  %v1988_v54 = vmul.f32 %v4387_v34, %v1933_v12 }
 0x6eb   : > { %v4283_v15 = vpack.i.bf16 %v3000_v38, %v2999_v17  ;;  %v1987_v61 = vmul.f32 %v4389_v48, %v1931_v22  ;;  %v4391_v29 = vpop.eup %4390 }
 0x6ec   : > { %v4393_v43 = vpop.eup %4392  ;;  %v1990_v57 = vmul.f32 %v4391_v29, %v1938_v46 }
 0x6ed   : > { %v1989_v44 = vmul.f32 %v4393_v43, %v1936_v62  ;;  %v4395_v60 = vpop.eup %4394 }
 0x6ee   : > { %v4397_v55 = vpop.eup %4396  ;;  %v1991_v45 = vmul.f32 %v4395_v60, %v1941_v6 }
 0x6ef   : > { %v1992_v56 = vmul.f32 %v4397_v55, %v1943_v5  ;;  %v2963_v10 = vpop.f32.mrf.mxu1  ;;  %v4399_v16 = vpop.eup %4398 }
 0x6f0   : > { %v3001_v26 = vmul.f32 %v4399_v16, %v2963_v10 }
 0x6f7   : > { %v2965_v11 = vpop.f32.mrf.mxu1 }
 0x6fc   : > { %4284 = vrot.lane.b32.xlu0 %v4283_v15, %s4673_s23 }
 0x701   : > { %v2883_v31 = vpop.xlane.xlu2 %2882 }
 0x708   : > { %v4260_v4 = vpop.permute.xlu0 %4259 }
 0x709   : > { %v4262_v28 = vunpack.i.h.bf16 %v4260_v4  ;;  %v4261_v59 = vunpack.i.l.bf16 %v4260_v4  ;;  %v4275_v51 = vpop.permute.xlu2 %4274 }
 0x70a   : > { %v4276_v49 = vunpack.i.l.bf16 %v4275_v51  ;;  %v4277_v9 = vunpack.i.h.bf16 %v4275_v51 }
 0x70b   : > { %v3070_v21 = vsel %vm1696_vm1, %v1988_v54, %v4262_v28  ;;  %v3069_v1 = vsel %vm1696_vm1, %v1987_v61, %v4261_v59 }
 0x70c   : > { %v3085_v42 = vpack.c.bf16 %v3070_v21, %v3069_v1 }
 0x70d   : > { %v2968_v13 = vpop.f32.mrf.mxu1 }
 0x70e   : > { %3197 = vmatmul.bf16.vlgmr.msra.gmra.mxu2 %v3085_v42  ;;  %3246 = vmatmul.bf16.vlgmr.msra.gmra.mxu3 %v3085_v42 }
 0x710   : > { %v4265_v24 = vpop.permute.xlu1 %4264 }
 0x711   : > { %v4267_v58 = vunpack.i.h.bf16 %v4265_v24  ;;  %v4266_v36 = vunpack.i.l.bf16 %v4265_v24 }
 0x713   : > { %1898 = vadd.xlane.f32.xlu1 %v6884_v35  ;;  %v3071_v19 = vsel %vm1696_vm1, %v1989_v44, %v4266_v36  ;;  %v3072_v23 = vsel %vm1696_vm1, %v1990_v57, %v4267_v58  ;;  %v1946_v35 = vpop.f32.mrf.mxu3 }
 0x714   : > { %v3086_v18 = vpack.c.bf16 %v3072_v23, %v3071_v19 }
 0x715   : > { %v2970_v46 = vpop.f32.mrf.mxu1 }
 0x718   : > { %v4270_v30 = vpop.permute.xlu1 %4269 }
 0x719   : > { %v4272_v14 = vunpack.i.h.bf16 %v4270_v30  ;;  %v4271_v37 = vunpack.i.l.bf16 %v4270_v30 }
 0x71b   : > { %v3073_v2 = vsel %vm1696_vm1, %v1991_v45, %v4271_v37  ;;  %v3074_v3 = vsel %vm1696_vm1, %v1992_v56, %v4272_v14  ;;  %v1948_v47 = vpop.f32.mrf.mxu3 }
 0x71c   : > { %v3087_v33 = vpack.c.bf16 %v3074_v3, %v3073_v2 }
 0x71e   : > { %3202 = vmatmul.bf16.gmra.mxu2 %v3086_v18  ;;  %3251 = vmatmul.bf16.gmra.mxu3 %v3086_v18 }
 0x723   : > { %v1951_v39 = vpop.f32.mrf.mxu3 }
 0x72b   : > { %v1953_v50 = vpop.f32.mrf.mxu3 }
 0x72e   : > { %3207 = vmatmul.bf16.gmra.mxu2 %v3087_v33  ;;  %3256 = vmatmul.bf16.gmra.mxu3 %v3087_v33 }
 0x733   : > { %v2879_v52 = vpop.xlane.xlu0 %2878  ;;  %v1956_v54 = vpop.f32.mrf.mxu3 }
 0x734   : > { %4400 = vrcp.f32 %v2879_v52 }
 0x735   : > { %4402 = vrcp.f32 %v6912_v53 }
 0x73a   : > { %v4401_v40 = vpop.eup %4400 }
 0x73b   : > { %v3002_v22 = vmul.f32 %v4401_v40, %v2965_v11  ;;  %v1891_v63 = vpop.xlane.xlu0 %1890  ;;  %v4403_v20 = vpop.eup %4402 }
 0x73c   : > { %v1993_v8 = vmul.f32 %v4403_v20, %v1946_v35  ;;  %v1958_v58 = vpop.f32.mrf.mxu3 }
 0x73d   : > { %v4288_v41 = vpack.i.bf16 %v3002_v22, %v3001_v26 }
 0x73e   : > { %v3075_v62 = vsel %vm1696_vm1, %v1993_v8, %v4276_v49 }
 0x73f   : > { %4289 = vrot.lane.b32.xlu0 %v4288_v41, %s4673_s23 }
 0x743   : > { %v1893_v32 = vpop.xlane.xlu0 %1892  ;;  %v1889_v7 = vpop.xlane.xlu1 %1888 }
 0x744   : > { %4404 = vrcp.f32 %v1889_v7  ;;  %v1961_v23 = vpop.f32.mrf.mxu3 }
 0x745   : > { %4406 = vrcp.f32 %v2883_v31 }
 0x74a   : > { %v4405_v27 = vpop.eup %4404  ;;  %v1901_v16 = vpop.xlane.xlu2 %1900 }
 0x74b   : > { %v2881_v12 = vpop.xlane.xlu0 %2880  ;;  %v1994_v38 = vmul.f32 %v4405_v27, %v1948_v47  ;;  %v4407_v53 = vpop.eup %4406 }
 0x74c   : > { %4408 = vrcp.f32 %v2881_v12  ;;  %v3004_v48 = vmul.f32 %v4407_v53, %v2970_v46  ;;  %v1963_v2 = vpop.f32.mrf.mxu3 }
 0x74d   : > { %v3076_v17 = vsel %vm1696_vm1, %v1994_v38, %v4277_v9  ;;  %4410 = vrcp.f32 %v1891_v63 }
 0x74e   : > { %v3088_v15 = vpack.c.bf16 %v3076_v17, %v3075_v62  ;;  %4412 = vrcp.f32 %v1893_v32 }
 0x750   : > { %3212 = vmatmul.bf16.gmra.mxu2 %v3088_v15  ;;  %3261 = vmatmul.bf16.gmra.mxu3 %v3088_v15 }
 0x752   : > { %v4409_v34 = vpop.eup %4408 }
 0x753   : > { %v3003_v4 = vmul.f32 %v4409_v34, %v2968_v13  ;;  %v4411_v28 = vpop.eup %4410  ;;  %v1895_v21 = vpop.xlane.xlu0 %1894 }
 0x754   : > { %v4413_v59 = vpop.eup %4412  ;;  %v1995_v6 = vmul.f32 %v4411_v28, %v1951_v39  ;;  %4414 = vrcp.f32 %v1895_v21  ;;  %v1966_v3 = vpop.f32.mrf.mxu3 }
 0x755   : > { %v4293_v61 = vpack.i.bf16 %v3004_v48, %v3003_v4  ;;  %v1996_v42 = vmul.f32 %v4413_v59, %v1953_v50  ;;  %v1903_v50 = vpop.xlane.xlu2 %1902 }
 0x757   : > { %4294 = vrot.lane.b32.xlu2 %v4293_v61, %s4673_s23 }
 0x75a   : > { %v4415_v19 = vpop.eup %4414 }
 0x75b   : > { %v4280_v1 = vpop.permute.xlu1 %4279  ;;  %v1897_v36 = vpop.xlane.xlu0 %1896  ;;  %v1997_v5 = vmul.f32 %v4415_v19, %v1956_v54 }
 0x75c   : > { %v4282_v29 = vunpack.i.h.bf16 %v4280_v1  ;;  %v4281_v43 = vunpack.i.l.bf16 %v4280_v1  ;;  %4416 = vrcp.f32 %v1897_v36  ;;  %v1968_v33 = vpop.f32.mrf.mxu3 }
 0x75d   : > { %4418 = vrcp.f32 %v1901_v16 }
 0x75e   : > { %v3077_v24 = vsel %vm1696_vm1, %v1995_v6, %v4281_v43  ;;  %v3078_v44 = vsel %vm1696_vm1, %v1996_v42, %v4282_v29 }
 0x75f   : > { %v3089_v57 = vpack.c.bf16 %v3078_v44, %v3077_v24 }
 0x761   : > { %3217 = vmatmul.bf16.gmra.mxu2 %v3089_v57  ;;  %3266 = vmatmul.bf16.gmra.mxu3 %v3089_v57 }
 0x762   : > { %v4417_v18 = vpop.eup %4416 }
 0x763   : > { %v1998_v55 = vmul.f32 %v4417_v18, %v1958_v58  ;;  %v4419_v22 = vpop.eup %4418 }
 0x764   : > { %v2000_v41 = vmul.f32 %v4419_v22, %v1963_v2 }
 0x769   : > { %1904 = vadd.xlane.f32.xlu0 %v6898_v25 }
 0x76e   : > { %v4285_v60 = vpop.permute.xlu0 %4284 }
 0x76f   : > { %v4287_v30 = vunpack.i.h.bf16 %v4285_v60  ;;  %v4286_v45 = vunpack.i.l.bf16 %v4285_v60 }
 0x771   : > { %v3079_v56 = vsel %vm1696_vm1, %v1997_v5, %v4286_v45  ;;  %v3080_v14 = vsel %vm1696_vm1, %v1998_v55, %v4287_v30 }
 0x772   : > { %v3090_v37 = vpack.c.bf16 %v3080_v14, %v3079_v56 }
 0x774   : > { %3222 = vmatmul.bf16.gmra.mxu2 %v3090_v37  ;;  %3271 = vmatmul.bf16.gmra.mxu3 %v3090_v37 }
 0x786   : > { %v1899_v40 = vpop.xlane.xlu1 %1898 }
 0x787   : > { %4420 = vrcp.f32 %v1899_v40 }
 0x788   : > { %4422 = vrcp.f32 %v1903_v50 }
 0x78d   : > { %v4421_v63 = vpop.eup %4420 }
 0x78e   : > { %v1999_v39 = vmul.f32 %v4421_v63, %v1961_v23  ;;  %v4423_v53 = vpop.eup %4422 }
 0x78f   : > { %v2001_v54 = vmul.f32 %v4423_v53, %v1966_v3 }
 0x791   : > { %v6987_v35 = vpop.f32.mrf.mxu2  ;;  %v6989_v25 = vpop.f32.mrf.mxu3 }
 0x799   : > { %v6991_v0 = vpop.f32.mrf.mxu2  ;;  %v6993_v10 = vpop.f32.mrf.mxu3 }
 0x7a1   : > { %v6995_v52 = vpop.f32.mrf.mxu2  ;;  %v6997_v47 = vpop.f32.mrf.mxu3 }
 0x7a9   : > { %v6999_v11 = vpop.f32.mrf.mxu2  ;;  %v7001_v26 = vpop.f32.mrf.mxu3 }
 0x7b1   : > { %v4290_v31 = vpop.permute.xlu0 %4289  ;;  %v7003_v13 = vpop.f32.mrf.mxu2 }
 0x7b2   : > { %v4292_v32 = vunpack.i.h.bf16 %v4290_v31  ;;  %v4291_v7 = vunpack.i.l.bf16 %v4290_v31  ;;  %v7005_v51 = vpop.f32.mrf.mxu3  ;;  %v4295_v46 = vpop.permute.xlu2 %4294 }
 0x7b3   : > { %v4296_v34 = vunpack.i.l.bf16 %v4295_v46  ;;  %v4297_v28 = vunpack.i.h.bf16 %v4295_v46 }
 0x7b4   : > { %v3081_v20 = vsel %vm1696_vm1, %v1999_v39, %v4291_v7  ;;  %v3082_v49 = vsel %vm1696_vm1, %v2000_v41, %v4292_v32 }
 0x7b5   : > { %v3091_v27 = vpack.c.bf16 %v3082_v49, %v3081_v20  ;;  %v3083_v21 = vsel %vm1696_vm1, %v2001_v54, %v4296_v34 }
 0x7b7   : > { %3227 = vmatmul.bf16.gmra.mxu2 %v3091_v27  ;;  %3276 = vmatmul.bf16.gmra.mxu3 %v3091_v27 }
 0x7b9   : > { %v7009_v12 = vpop.f32.mrf.mxu2 }
 0x7ba   : > { %v7011_v8 = vpop.f32.mrf.mxu3 }
 0x7d3   : > { %v7013_v9 = vpop.f32.mrf.mxu2  ;;  %v7015_v38 = vpop.f32.mrf.mxu3 }
 0x7db   : > { %v7017_v62 = vpop.f32.mrf.mxu2  ;;  %v7019_v17 = vpop.f32.mrf.mxu3 }
 0x7dc   : > { %v1905_v15 = vpop.xlane.xlu0 %1904 }
 0x7dd   : > { %4424 = vrcp.f32 %v1905_v15 }
 0x7e3   : > { %v4425_v48 = vpop.eup %4424 }
 0x7e4   : > { %v7021_v4 = vpop.f32.mrf.mxu2  ;;  %v7023_v61 = vpop.f32.mrf.mxu3  ;;  %v2002_v59 = vmul.f32 %v4425_v48, %v1968_v33 }
 0x7e6   : > { %v3084_v1 = vsel %vm1696_vm1, %v2002_v59, %v4297_v28 }
 0x7e7   : > { %v3092_v6 = vpack.c.bf16 %v3084_v1, %v3083_v21 }
 0x7e9   : > { %3232 = vmatmul.bf16.gmra.mxu2 %v3092_v6  ;;  %3281 = vmatmul.bf16.gmra.mxu3 %v3092_v6 }
 0x7ec   : > { %v7027_v42 = vpop.f32.mrf.mxu2  ;;  %v7029_v29 = vpop.f32.mrf.mxu3 }
 0x7f7   : > { %v7031_v43 = vpop.f32.mrf.mxu2  ;;  %v7033_v24 = vpop.f32.mrf.mxu3 }
 0x7ff   : > { %v7035_v44 = vpop.f32.mrf.mxu2  ;;  %v7037_v57 = vpop.f32.mrf.mxu3 }
 0x83a   : > { %v7039_v58 = vpop.f32.mrf.mxu2  ;;  %v7041_v36 = vpop.f32.mrf.mxu3 }
 0x842   : > { %v7043_v19 = vpop.f32.mrf.mxu2  ;;  %v7045_v23 = vpop.f32.mrf.mxu3 }
 0x86c   : > { %v7047_v18 = vpop.f32.mrf.mxu2  ;;  %v7049_v60 = vpop.f32.mrf.mxu3 }
 0x870   : > { %3290 = sbr.rel (%p4036_p11) target bundleno = 2197 (0x895), region = 68 }
 0x874   : > { %v7051_v5 = vpop.f32.mrf.mxu2  ;;  %v7053_v55 = vpop.f32.mrf.mxu3 }
 0x875   : > { %3291 = vst [vmem:[#allocation2 + $0xb0] sm:$0xff] %v6987_v35 }
 0x876   : > { %3292 = vst [vmem:[#allocation2] sm:$0xff] %v6989_v25 }
 0x877   : > { %3293 = vst [vmem:[#allocation2 + $0xd8] sm:$0xff] %v6991_v0 }
 0x878   : > { %3294 = vst [vmem:[#allocation2 + $0x18] sm:$0xff] %v6993_v10 }
 0x879   : > { %3295 = vst [vmem:[#allocation2 + $0x50] sm:$0xff] %v6995_v52 }
 0x87a   : > { %3296 = vst [vmem:[#allocation2 + $0x68] sm:$0xff] %v6997_v47 }
 0x87b   : > { %3297 = vst [vmem:[#allocation2 + $0x30] sm:$0xff] %v6999_v11 }
 0x87c   : > { %3298 = vst [vmem:[#allocation2 + $0x48] sm:$0xff] %v7001_v26 }
 0x87d   : > { %3299 = vst [vmem:[#allocation2 + $0x80] sm:$0xff] %v7003_v13 }
 0x87e   : > { %3300 = vst [vmem:[#allocation2 + $0x88] sm:$0xff] %v7005_v51 }
 0x87f   : > { %3301 = vst [vmem:[#allocation2 + $0xe8] sm:$0xff] %v7009_v12 }
 0x880   : > { %3302 = vst [vmem:[#allocation2 + $0xb8] sm:$0xff] %v7011_v8 }
 0x881   : > { %3303 = vst [vmem:[#allocation2 + $0x60] sm:$0xff] %v7013_v9 }
 0x882   : > { %3304 = vst [vmem:[#allocation2 + $0xf0] sm:$0xff] %v7015_v38 }
 0x883   : > { %3305 = vst [vmem:[#allocation2 + $0x8] sm:$0xff] %v7017_v62 }
 0x884   : > { %3306 = vst [vmem:[#allocation2 + $0x78] sm:$0xff] %v7019_v17 }
 0x885   : > { %3307 = vst [vmem:[#allocation2 + $0x38] sm:$0xff] %v7021_v4 }
 0x886   : > { %3308 = vst [vmem:[#allocation2 + $0x58] sm:$0xff] %v7023_v61 }
 0x887   : > { %3309 = vst [vmem:[#allocation2 + $0x40] sm:$0xff] %v7027_v42 }
 0x888   : > { %3310 = vst [vmem:[#allocation2 + $0xc8] sm:$0xff] %v7029_v29 }
 0x889   : > { %3311 = vst [vmem:[#allocation2 + $0xe0] sm:$0xff] %v7031_v43 }
 0x88a   : > { %3312 = vst [vmem:[#allocation2 + $0x90] sm:$0xff] %v7033_v24 }
 0x88b   : > { %3313 = vst [vmem:[#allocation2 + $0x70] sm:$0xff] %v7035_v44 }
 0x88c   : > { %3314 = vst [vmem:[#allocation2 + $0xc0] sm:$0xff] %v7037_v57 }
 0x88d   : > { %3315 = vst [vmem:[#allocation2 + $0xa8] sm:$0xff] %v7039_v58 }
 0x88e   : > { %3316 = vst [vmem:[#allocation2 + $0xd0] sm:$0xff] %v7041_v36 }
 0x88f   : > { %3317 = vst [vmem:[#allocation2 + $0x10] sm:$0xff] %v7043_v19 }
 0x890   : > { %3318 = vst [vmem:[#allocation2 + $0x28] sm:$0xff] %v7045_v23 }
 0x891   : > { %3319 = vst [vmem:[#allocation2 + $0xa0] sm:$0xff] %v7047_v18 }
 0x892   : > { %3320 = vst [vmem:[#allocation2 + $0xf8] sm:$0xff] %v7049_v60 }
 0x893   : > { %3321 = vst [vmem:[#allocation2 + $0x20] sm:$0xff] %v7051_v5 }
 0x894   : > { %3322 = vst [vmem:[#allocation2 + $0x98] sm:$0xff] %v7053_v55 }
 0x895 PF: > { %s7690_s17 = sld [smem:[#allocation17_spill]] }
 0x89b   : > { %p4037_p0 = scmp.eq.s32.totalorder %s7690_s17, 0 }
 0x89d   : > { %3326 = sbr.rel (%p4037_p0) target bundleno = 2245 (0x8c5), region = 72 }
 0x8a2   : > { %v3327_v30 = vld [vmem:[#allocation2 + $0xb0] sm:$0xff]  ;;  %v3328_v45 = vld [vmem:[#allocation2] sm:$0xff]  ;;  %v3329_v56 = vld [vmem:[#allocation2 + $0xd8] sm:$0xff] }
 0x8a3   : > { %v3359_v14 = vadd.f32 %v3327_v30, %v6987_v35  ;;  %v3360_v37 = vadd.f32 %v3328_v45, %v6989_v25  ;;  %v3361_v2 = vadd.f32 %v3329_v56, %v6991_v0  ;;  %v3330_v3 = vld [vmem:[#allocation2 + $0x18] sm:$0xff]  ;;  %v3331_v33 = vld [vmem:[#allocation2 + $0x50] sm:$0xff]  ;;  %v3332_v16 = vld [vmem:[#allocation2 + $0x68] sm:$0xff] }
 0x8a4   : > { %v3362_v40 = vadd.f32 %v3330_v3, %v6993_v10  ;;  %v3333_v22 = vld [vmem:[#allocation2 + $0x30] sm:$0xff]  ;;  %v3363_v63 = vadd.f32 %v3331_v33, %v6995_v52  ;;  %v3334_v31 = vld [vmem:[#allocation2 + $0x48] sm:$0xff]  ;;  %v3364_v41 = vadd.f32 %v3332_v16, %v6997_v47  ;;  %v3335_v39 = vld [vmem:[#allocation2 + $0x80] sm:$0xff] }
 0x8a5   : > { %3391 = vst [vmem:[#allocation2 + $0xb0] sm:$0xff] %v3359_v14  ;;  %v3365_v35 = vadd.f32 %v3333_v22, %v6999_v11  ;;  %v3336_v25 = vld [vmem:[#allocation2 + $0x88] sm:$0xff]  ;;  %v3366_v0 = vadd.f32 %v3334_v31, %v7001_v26  ;;  %v3367_v10 = vadd.f32 %v3335_v39, %v7003_v13  ;;  %v3338_v7 = vld [vmem:[#allocation2 + $0xb8] sm:$0xff]  ;;  %v3339_v20 = vld [vmem:[#allocation2 + $0x60] sm:$0xff] }
 0x8a6   : > { %3392 = vst [vmem:[#allocation2] sm:$0xff] %v3360_v37  ;;  %v3337_v32 = vld [vmem:[#allocation2 + $0xe8] sm:$0xff]  ;;  %v3368_v52 = vadd.f32 %v3336_v25, %v7005_v51  ;;  %v3340_v49 = vld [vmem:[#allocation2 + $0xf0] sm:$0xff]  ;;  %v3370_v11 = vadd.f32 %v3338_v7, %v7011_v8  ;;  %v3371_v26 = vadd.f32 %v3339_v20, %v7013_v9  ;;  %v3342_v50 = vld [vmem:[#allocation2 + $0x78] sm:$0xff] }
 0x8a7   : > { %3393 = vst [vmem:[#allocation2 + $0xd8] sm:$0xff] %v3361_v2  ;;  %v3369_v47 = vadd.f32 %v3337_v32, %v7009_v12  ;;  %v3341_v27 = vld [vmem:[#allocation2 + $0x8] sm:$0xff]  ;;  %v3372_v13 = vadd.f32 %v3340_v49, %v7015_v38  ;;  %v3343_v15 = vld [vmem:[#allocation2 + $0x38] sm:$0xff]  ;;  %v3374_v12 = vadd.f32 %v3342_v50, %v7019_v17  ;;  %v3345_v53 = vld [vmem:[#allocation2 + $0x40] sm:$0xff] }
 0x8a8   : > { %3394 = vst [vmem:[#allocation2 + $0x18] sm:$0xff] %v3362_v40  ;;  %v3373_v51 = vadd.f32 %v3341_v27, %v7017_v62  ;;  %v3344_v46 = vld [vmem:[#allocation2 + $0x58] sm:$0xff]  ;;  %v3375_v8 = vadd.f32 %v3343_v15, %v7021_v4  ;;  %v3346_v34 = vld [vmem:[#allocation2 + $0xc8] sm:$0xff]  ;;  %v3347_v48 = vld [vmem:[#allocation2 + $0xe0] sm:$0xff]  ;;  %v3377_v38 = vadd.f32 %v3345_v53, %v7027_v42 }
 0x8a9   : > { %3395 = vst [vmem:[#allocation2 + $0x50] sm:$0xff] %v3363_v63  ;;  %v3376_v9 = vadd.f32 %v3344_v46, %v7023_v61  ;;  %v3348_v54 = vld [vmem:[#allocation2 + $0x90] sm:$0xff]  ;;  %v3378_v62 = vadd.f32 %v3346_v34, %v7029_v29  ;;  %v3379_v17 = vadd.f32 %v3347_v48, %v7031_v43  ;;  %v3350_v59 = vld [vmem:[#allocation2 + $0xc0] sm:$0xff]  ;;  %v3351_v21 = vld [vmem:[#allocation2 + $0xa8] sm:$0xff] }
 0x8aa   : > { %3396 = vst [vmem:[#allocation2 + $0x68] sm:$0xff] %v3364_v41  ;;  %v3349_v28 = vld [vmem:[#allocation2 + $0x70] sm:$0xff]  ;;  %v3380_v4 = vadd.f32 %v3348_v54, %v7033_v24  ;;  %v3382_v6 = vadd.f32 %v3350_v59, %v7037_v57  ;;  %v3383_v29 = vadd.f32 %v3351_v21, %v7039_v58  ;;  %v3354_v30 = vld [vmem:[#allocation2 + $0x28] sm:$0xff]  ;;  %v3355_v45 = vld [vmem:[#allocation2 + $0xa0] sm:$0xff] }
 0x8ab   : > { %3397 = vst [vmem:[#allocation2 + $0x30] sm:$0xff] %v3365_v35  ;;  %v3381_v61 = vadd.f32 %v3349_v28, %v7035_v44  ;;  %v3352_v1 = vld [vmem:[#allocation2 + $0xd0] sm:$0xff]  ;;  %v3356_v56 = vld [vmem:[#allocation2 + $0xf8] sm:$0xff]  ;;  %v3386_v44 = vadd.f32 %v3354_v30, %v7045_v23  ;;  %v3357_v14 = vld [vmem:[#allocation2 + $0x20] sm:$0xff]  ;;  %v3387_v57 = vadd.f32 %v3355_v45, %v7047_v18 }
 0x8ac   : > { %3398 = vst [vmem:[#allocation2 + $0x48] sm:$0xff] %v3366_v0  ;;  %v3353_v42 = vld [vmem:[#allocation2 + $0x10] sm:$0xff]  ;;  %v3384_v43 = vadd.f32 %v3352_v1, %v7041_v36  ;;  %v3358_v37 = vld [vmem:[#allocation2 + $0x98] sm:$0xff]  ;;  %v3388_v58 = vadd.f32 %v3356_v56, %v7049_v60  ;;  %v3389_v2 = vadd.f32 %v3357_v14, %v7051_v5 }
 0x8ad   : > { %3399 = vst [vmem:[#allocation2 + $0x80] sm:$0xff] %v3367_v10  ;;  %v3385_v24 = vadd.f32 %v3353_v42, %v7043_v19  ;;  %v3390_v36 = vadd.f32 %v3358_v37, %v7053_v55 }
 0x8ae   : > { %3400 = vst [vmem:[#allocation2 + $0x88] sm:$0xff] %v3368_v52 }
 0x8af   : > { %3401 = vst [vmem:[#allocation2 + $0xe8] sm:$0xff] %v3369_v47 }
 0x8b0   : > { %3402 = vst [vmem:[#allocation2 + $0xb8] sm:$0xff] %v3370_v11 }
 0x8b1   : > { %3403 = vst [vmem:[#allocation2 + $0x60] sm:$0xff] %v3371_v26 }
 0x8b2   : > { %3404 = vst [vmem:[#allocation2 + $0xf0] sm:$0xff] %v3372_v13 }
 0x8b3   : > { %3405 = vst [vmem:[#allocation2 + $0x8] sm:$0xff] %v3373_v51 }
 0x8b4   : > { %3406 = vst [vmem:[#allocation2 + $0x78] sm:$0xff] %v3374_v12 }
 0x8b5   : > { %3407 = vst [vmem:[#allocation2 + $0x38] sm:$0xff] %v3375_v8 }
 0x8b6   : > { %3408 = vst [vmem:[#allocation2 + $0x58] sm:$0xff] %v3376_v9 }
 0x8b7   : > { %3409 = vst [vmem:[#allocation2 + $0x40] sm:$0xff] %v3377_v38 }
 0x8b8   : > { %3410 = vst [vmem:[#allocation2 + $0xc8] sm:$0xff] %v3378_v62 }
 0x8b9   : > { %3411 = vst [vmem:[#allocation2 + $0xe0] sm:$0xff] %v3379_v17 }
 0x8ba   : > { %3412 = vst [vmem:[#allocation2 + $0x90] sm:$0xff] %v3380_v4 }
 0x8bb   : > { %3413 = vst [vmem:[#allocation2 + $0x70] sm:$0xff] %v3381_v61 }
 0x8bc   : > { %3414 = vst [vmem:[#allocation2 + $0xc0] sm:$0xff] %v3382_v6 }
 0x8bd   : > { %3415 = vst [vmem:[#allocation2 + $0xa8] sm:$0xff] %v3383_v29 }
 0x8be   : > { %3416 = vst [vmem:[#allocation2 + $0xd0] sm:$0xff] %v3384_v43 }
 0x8bf   : > { %3417 = vst [vmem:[#allocation2 + $0x10] sm:$0xff] %v3385_v24 }
 0x8c0   : > { %3418 = vst [vmem:[#allocation2 + $0x28] sm:$0xff] %v3386_v44 }
 0x8c1   : > { %3419 = vst [vmem:[#allocation2 + $0xa0] sm:$0xff] %v3387_v57 }
 0x8c2   : > { %3420 = vst [vmem:[#allocation2 + $0xf8] sm:$0xff] %v3388_v58 }
 0x8c3   : > { %3421 = vst [vmem:[#allocation2 + $0x20] sm:$0xff] %v3389_v2 }
 0x8c4   : > { %3422 = vst [vmem:[#allocation2 + $0x98] sm:$0xff] %v3390_v36 }
 0x8c5 PF: > { %s7691_s23 = sld [smem:[#allocation17_spill]] }
 0x8cb   : > { %p4038_p2 = scmp.ne.s32.totalorder %s7691_s23, 1 }
 0x8cc   : > { %s7692_s27 = sld [smem:[#allocation124_spill]] (!%p4038_p2) }
 0x8cd   : > { %3426 = sbr.rel (%p4038_p2) target bundleno = 2295 (0x8f7), region = 76 }
 0x8d2   : > { %v3427_v19 = vld [vmem:[#allocation2 + $0xb0] sm:$0xff]  ;;  %v3459_v23 = vld [vmem:[%s7692_s27] sm:$0x3]  ;;  %v3429_v55 = vld [vmem:[#allocation2 + $0xd8] sm:$0xff] }
 0x8d3   : > { %v3428_v18 = vld [vmem:[#allocation2] sm:$0xff]  ;;  %v7128_v60 = vperm.slane %v3459_v23, 0  ;;  %v7130_v5 = vperm.slane %v3459_v23, 1  ;;  %v3430_v3 = vld [vmem:[#allocation2 + $0x18] sm:$0xff]  ;;  %v3431_v33 = vld [vmem:[#allocation2 + $0x50] sm:$0xff] }
 0x8d4   : > { %v3432_v63 = vld [vmem:[#allocation2 + $0x68] sm:$0xff]  ;;  %v3433_v41 = vld [vmem:[#allocation2 + $0x30] sm:$0xff]  ;;  %v3435_v0 = vld [vmem:[#allocation2 + $0x80] sm:$0xff] }
 0x8d5   : > { %v3465_v16 = vadd.f32 %v7128_v60, %v3427_v19  ;;  %v3466_v40 = vadd.f32 %v7130_v5, %v3428_v18  ;;  %v3467_v22 = vadd.f32 %v7128_v60, %v3429_v55  ;;  %v3468_v31 = vadd.f32 %v7130_v5, %v3430_v3  ;;  %v3434_v35 = vld [vmem:[#allocation2 + $0x48] sm:$0xff]  ;;  %v3438_v47 = vld [vmem:[#allocation2 + $0xb8] sm:$0xff]  ;;  %v3439_v11 = vld [vmem:[#allocation2 + $0x60] sm:$0xff] }
 0x8d6   : > { %v3469_v39 = vadd.f32 %v7128_v60, %v3431_v33  ;;  %v3470_v25 = vadd.f32 %v7130_v5, %v3432_v63  ;;  %v3471_v32 = vadd.f32 %v7128_v60, %v3433_v41  ;;  %v3436_v10 = vld [vmem:[#allocation2 + $0x88] sm:$0xff]  ;;  %v3472_v7 = vadd.f32 %v7130_v5, %v3434_v35  ;;  %v3440_v26 = vld [vmem:[#allocation2 + $0xf0] sm:$0xff]  ;;  %v3442_v51 = vld [vmem:[#allocation2 + $0x78] sm:$0xff] }
 0x8d7   : > { %3497 = vst [vmem:[%s7056_s21] sm:$0xff] %v3465_v16  ;;  %v3437_v52 = vld [vmem:[#allocation2 + $0xe8] sm:$0xff]  ;;  %v3473_v20 = vadd.f32 %v7128_v60, %v3435_v0  ;;  %v3474_v49 = vadd.f32 %v7130_v5, %v3436_v10  ;;  %v3476_v50 = vadd.f32 %v7130_v5, %v3438_v47  ;;  %v3477_v15 = vadd.f32 %v7128_v60, %v3439_v11  ;;  %v3443_v12 = vld [vmem:[#allocation2 + $0x38] sm:$0xff]  ;;  %v3445_v9 = vld [vmem:[#allocation2 + $0x40] sm:$0xff] }
 0x8d8   : > { %3498 = vst [vmem:[%s7056_s21 + $0x8] sm:$0xff] %v3466_v40  ;;  %v3475_v27 = vadd.f32 %v7128_v60, %v3437_v52  ;;  %v3441_v13 = vld [vmem:[#allocation2 + $0x8] sm:$0xff]  ;;  %v3478_v46 = vadd.f32 %v7130_v5, %v3440_v26  ;;  %v3444_v8 = vld [vmem:[#allocation2 + $0x58] sm:$0xff]  ;;  %v3480_v34 = vadd.f32 %v7130_v5, %v3442_v51  ;;  %v3481_v48 = vadd.f32 %v7128_v60, %v3443_v12  ;;  %v3447_v62 = vld [vmem:[#allocation2 + $0xe0] sm:$0xff] }
 0x8d9   : > { %3499 = vst [vmem:[%s7056_s21 + $0x10] sm:$0xff] %v3467_v22  ;;  %v3479_v53 = vadd.f32 %v7128_v60, %v3441_v13  ;;  %v3446_v38 = vld [vmem:[#allocation2 + $0xc8] sm:$0xff]  ;;  %v3482_v54 = vadd.f32 %v7130_v5, %v3444_v8  ;;  %v3483_v28 = vadd.f32 %v7128_v60, %v3445_v9  ;;  %v3448_v17 = vld [vmem:[#allocation2 + $0x90] sm:$0xff]  ;;  %v3485_v21 = vadd.f32 %v7128_v60, %v3447_v62  ;;  %v3450_v61 = vld [vmem:[#allocation2 + $0xc0] sm:$0xff] }
 0x8da   : > { %3500 = vst [vmem:[%s7056_s21 + $0x18] sm:$0xff] %v3468_v31  ;;  %v3484_v59 = vadd.f32 %v7130_v5, %v3446_v38  ;;  %v3449_v4 = vld [vmem:[#allocation2 + $0x70] sm:$0xff]  ;;  %v3486_v1 = vadd.f32 %v7130_v5, %v3448_v17  ;;  %v3451_v6 = vld [vmem:[#allocation2 + $0xa8] sm:$0xff]  ;;  %v3488_v30 = vadd.f32 %v7130_v5, %v3450_v61  ;;  %v3455_v44 = vld [vmem:[#allocation2 + $0xa0] sm:$0xff] }
 0x8db   : > { %3501 = vst [vmem:[%s7056_s21 + $0x20] sm:$0xff] %v3469_v39  ;;  %v3487_v42 = vadd.f32 %v7128_v60, %v3449_v4  ;;  %v3452_v29 = vld [vmem:[#allocation2 + $0xd0] sm:$0xff]  ;;  %v3489_v45 = vadd.f32 %v7128_v60, %v3451_v6  ;;  %v3454_v24 = vld [vmem:[#allocation2 + $0x28] sm:$0xff]  ;;  %v3456_v57 = vld [vmem:[#allocation2 + $0xf8] sm:$0xff]  ;;  %v3493_v2 = vadd.f32 %v7128_v60, %v3455_v44 }
 0x8dc   : > { %3502 = vst [vmem:[%s7056_s21 + $0x28] sm:$0xff] %v3470_v25  ;;  %v3453_v43 = vld [vmem:[#allocation2 + $0x10] sm:$0xff]  ;;  %v3490_v56 = vadd.f32 %v7130_v5, %v3452_v29  ;;  %v3492_v37 = vadd.f32 %v7130_v5, %v3454_v24  ;;  %v3457_v58 = vld [vmem:[#allocation2 + $0x20] sm:$0xff]  ;;  %v3458_v36 = vld [vmem:[#allocation2 + $0x98] sm:$0xff]  ;;  %v3494_v19 = vadd.f32 %v7130_v5, %v3456_v57 }
 0x8dd   : > { %3503 = vst [vmem:[%s7056_s21 + $0x30] sm:$0xff] %v3471_v32  ;;  %v3491_v14 = vadd.f32 %v7128_v60, %v3453_v43  ;;  %v3495_v23 = vadd.f32 %v7128_v60, %v3457_v58  ;;  %v3496_v18 = vadd.f32 %v7130_v5, %v3458_v36 }
 0x8de   : > { %3504 = vst [vmem:[%s7056_s21 + $0x38] sm:$0xff] %v3472_v7 }
 0x8df   : > { %3505 = vst [vmem:[%s7056_s21 + $0x40] sm:$0xff] %v3473_v20 }
 0x8e0   : > { %3506 = vst [vmem:[%s7056_s21 + $0x48] sm:$0xff] %v3474_v49 }
 0x8e1   : > { %3507 = vst [vmem:[%s7056_s21 + $0x50] sm:$0xff] %v3475_v27 }
 0x8e2   : > { %3508 = vst [vmem:[%s7056_s21 + $0x58] sm:$0xff] %v3476_v50 }
 0x8e3   : > { %3509 = vst [vmem:[%s7056_s21 + $0x60] sm:$0xff] %v3477_v15 }
 0x8e4   : > { %3510 = vst [vmem:[%s7056_s21 + $0x68] sm:$0xff] %v3478_v46 }
 0x8e5   : > { %3511 = vst [vmem:[%s7056_s21 + $0x70] sm:$0xff] %v3479_v53 }
 0x8e6   : > { %3512 = vst [vmem:[%s7056_s21 + $0x78] sm:$0xff] %v3480_v34 }
 0x8e7   : > { %3513 = vst [vmem:[%s7056_s21 + $0x80] sm:$0xff] %v3481_v48 }
 0x8e8   : > { %3514 = vst [vmem:[%s7056_s21 + $0x88] sm:$0xff] %v3482_v54 }
 0x8e9   : > { %3515 = vst [vmem:[%s7056_s21 + $0x90] sm:$0xff] %v3483_v28 }
 0x8ea   : > { %3516 = vst [vmem:[%s7056_s21 + $0x98] sm:$0xff] %v3484_v59 }
 0x8eb   : > { %3517 = vst [vmem:[%s7056_s21 + $0xa0] sm:$0xff] %v3485_v21 }
 0x8ec   : > { %3518 = vst [vmem:[%s7056_s21 + $0xa8] sm:$0xff] %v3486_v1 }
 0x8ed   : > { %3519 = vst [vmem:[%s7056_s21 + $0xb0] sm:$0xff] %v3487_v42 }
 0x8ee   : > { %3520 = vst [vmem:[%s7056_s21 + $0xb8] sm:$0xff] %v3488_v30 }
 0x8ef   : > { %3521 = vst [vmem:[%s7056_s21 + $0xc0] sm:$0xff] %v3489_v45 }
 0x8f0   : > { %3522 = vst [vmem:[%s7056_s21 + $0xc8] sm:$0xff] %v3490_v56 }
 0x8f1   : > { %3523 = vst [vmem:[%s7056_s21 + $0xd0] sm:$0xff] %v3491_v14 }
 0x8f2   : > { %3524 = vst [vmem:[%s7056_s21 + $0xd8] sm:$0xff] %v3492_v37 }
 0x8f3   : > { %3525 = vst [vmem:[%s7056_s21 + $0xe0] sm:$0xff] %v3493_v2 }
 0x8f4   : > { %3526 = vst [vmem:[%s7056_s21 + $0xe8] sm:$0xff] %v3494_v19 }
 0x8f5   : > { %3527 = vst [vmem:[%s7056_s21 + $0xf0] sm:$0xff] %v3495_v23 }
 0x8f6   : > { %3528 = vst [vmem:[%s7056_s21 + $0xf8] sm:$0xff] %v3496_v18 }
 0x8f7 PF: > { %s4126_s10 = sshll.u32 %s4653_s12, 8  ;;  %s7694_s2 = sld [smem:[#allocation127_spill]] }
 0x8f8   : > { %s3542_s29 = sshll.u32 %s7056_s21, 4  ;;  %s3530_s19 = scalar_lea.sflag [#allocation5], %s421_s25  ;;  %s3543_s29 = int_to_ptr.vmem [resolvable:$true] %s3542_s29 }
 0x8fd   : > { %s3541_s5 = scalar_lea.hbm %s7694_s2, %s4126_s10  ;;  %s4555_s12 = scalar_lea.hbm %s7694_s2, 512 }
 0x8fe   : > { %s3544_s4 = sshll.u32 %s3541_s5, 4  ;;  %s3545_s4 = int_to_ptr.hbm [resolvable:$true] %s3544_s4 }
 0x8ff   : > { %s4549_s16 = sshra.s32 %s3545_s4, 4  ;;  %s4550_s16 = int_to_ptr.hbm [resolvable:$true] %s4549_s16 }
 0x900   : > { %s4551_s30 = scalar_lea.hbm %s4550_s16, 256  ;;  %p4556_p8 = scmp.lt.s32.totalorder %s4550_s16, %s7694_s2 }
 0x901   : > { %p4552_p4 = scmp.ne.s32.totalorder %s4550_s16, %s4551_s30  ;;  %p4557_p10 = scmp.lt.s32.totalorder %s4555_s12, %s4551_s30 }
 0x903   : > { %p4553_p5 = pnand %p4552_p4, %p4793_p7  ;;  %p4558_p12 = por %p4557_p10, %p4556_p8 }
 0x905   : > { %p4554_p6 = pneg %p4553_p5 }
 0x907   : > { %p4559_p13 = pnand %p4558_p12, %p4554_p6 }
 0x909   : > { %4562 = shalt.err (!%p4559_p13)
}
 0x90a   : > { %s4675_s25 = smov 256   ;;  %s4676_s21 = smov 16  }
 0x90b   : > { %4139 = dma.vmem_to_hbm [thread:$0]  (%p4793_p7), %s3543_s29, 4096, %s3545_s4, %s3530_s19, %s4675_s25, %s4675_s25, %s4676_s21  }
 0x90c PF: > { %s7695_s23 = sld [smem:[#allocation14_spill]]  ;;  %p4159_p1 = scmp.ge.s32.totalorder %s4665_s15, 2 }
 0x90e   : > { %p4153_p3 = pnand %p4159_p1, %p4798_p9 }
 0x910   : > { %p4154_p11 = pneg %p4153_p3 }
 0x912   : > { %s3559_s8 = sand.u32 1, %s7695_s23  }
 0x913   : > { %s3560_s27 = scalar_lea.sflag [#allocation5], %s3559_s8 }
 0x914   : > { %4620 = dma.done.wait (%p4154_p11), %s3560_s27, 4096  }
 0x915   : > { %4622 = vsyncadd (%p4154_p11), %s3560_s27, 4294963200  ;;  %s27_s15 = sadd.s32 1, %s4665_s15   ;;  %s7697_s10 = sld [smem:[#allocation15_spill]] }
 0x916   : > { %p24_p0 = scmp.ge.s32.totalorder %s27_s15, 6   ;;  %s7698_s29 = sld [smem:[#allocation24_spill]] }
 0x917   : > { %s7699_s18 = sld [smem:[#allocation16_spill]]  ;;  %s7704_s27 = smov %s4629_s28 }
 0x918   : > { %s7700_s11 = sld [smem:[#allocation23_spill]]  ;;  %s7706_s30 = smov %s4641_s9 }
 0x919   : > { %s7701_s12 = sld [smem:[#allocation18_spill]] }
 0x91a   : > { %s7702_s14 = sld [smem:[#allocation21_spill]] }
 0x91b   : > { %s7703_s5 = sld [smem:[#allocation22_spill]]  ;;  %s7705_s28 = smov %s7697_s10 }
 0x91d   : > { %s7707_s9 = smov %s7699_s18  ;;  %26 = sbr.rel (!%p24_p0) target bundleno = 17 (0x11), region = 132 }
 0x91e   : > { %s7708_s10 = smov %s7700_s11  ;;  %s7709_s11 = smov %s4657_s13 }
 0x920   : > { %s7710_s13 = smov %s7702_s14 }
 0x921   : > { %s7711_s14 = smov %s7703_s5 }
 0x922   :  { %3566 = vsyncpa [#allocation4], 1 }
 0x923   :  { %3568 = vsyncpa [#allocation4 + $0x1], 1 }
 0x924   :  { %3569 = vsyncpa [#allocation7], 1 }
 0x925   :  { %3571 = vsyncpa [#allocation7 + $0x1], 1 }
 0x926   :  { %3572 = vsyncpa [#allocation5], 1 }
 0x927   :  { %3574 = vsyncpa [#allocation5 + $0x1], 1 }

</bundles_post_ra>
